<compile_context>
chip_gen: v7x
topology: tpu7x:2x2x1
jax: 0.10.0
libtpu: 0.0.40
codegen_flags: <defaults>
</compile_context>

<pallas_src>
import functools

import jax
import jax.numpy as jnp
from jax.experimental import pallas as pl
from jax.experimental.pallas import tpu as pltpu


# ----------------------------------------------------------------------------
# Small helpers
# ----------------------------------------------------------------------------
def _leaky(y):
    # LeakyReLU(0.01): slope < 1, so max(y, 0.01*y) == leaky_relu(y).
    return jnp.maximum(y, 0.01 * y)


def conv_dims(L):
    """Static output lengths of the CNN2 conv stack for input length L."""
    L1 = (L - 5) // 5 + 1                  # conv1: k=5, s=5, p=0
    P1 = (L1 - 2) // 2 + 1                 # pool1: k=2, s=2
    L2 = (P1 + 2 * 2 - 4) // 2 + 1         # conv2: k=4, s=2, p=2
    P2 = (L2 - 4) // 2 + 1                 # pool2: k=4, s=2
    L3 = (P2 + 2 * 2 - 4) // 2 + 1         # conv3: k=4, s=2, p=2
    P3 = (L3 - 4) // 2 + 1                 # pool3: k=4, s=2
    assert L1 >= 2 and L2 >= 4 and L3 >= 4, (L1, L2, L3)
    return L1, P1, L2, P2, L3, P3


def _blockdiag_sel(tb, out_len, in_len, stride, offset):
    """Block-diagonal strided row-selection matrix (per batch tile of tb).

    M[b*out_len + o, b*in_len + l] = 1.0  iff  l == stride*o + offset.
    Targets outside [0, in_len) give all-zero rows (== zero padding)."""
    r = jnp.arange(tb * out_len)
    c = jnp.arange(tb * in_len)
    br, o = r // out_len, r % out_len
    bc, l = c // in_len, c % in_len
    tgt = stride * o + offset
    m = (br[:, None] == bc[None, :]) & (l[None, :] == tgt[:, None])
    return m.astype(jnp.float32)


def _sel_stack(tb, out_len, in_len, stride, offsets):
    return jnp.stack([_blockdiag_sel(tb, out_len, in_len, stride, off)
                      for off in offsets])


# ----------------------------------------------------------------------------
# Parameters
# ----------------------------------------------------------------------------
def init_params(key, in_num, out_num):
    """Parameters in native PyTorch layouts (Conv1d: (Cout,Cin,K); Linear: (out,in))."""
    def dense(k, shape, fan_in):
        return jax.random.normal(k, shape, jnp.float32) / jnp.sqrt(float(fan_in))

    ks = jax.random.split(key, 14)
    return {
        "conv1_w": dense(ks[0], (8, 1, 5), 5),        "conv1_b": dense(ks[1], (8,), 5),
        "conv2_w": dense(ks[2], (32, 8, 4), 32),      "conv2_b": dense(ks[3], (32,), 32),
        "conv3_w": dense(ks[4], (64, 32, 4), 128),    "conv3_b": dense(ks[5], (64,), 128),
        "fc1_w": dense(ks[6], (1024, in_num), in_num), "fc1_b": dense(ks[7], (1024,), in_num),
        "fc2_w": dense(ks[8], (256, 1024), 1024),      "fc2_b": dense(ks[9], (256,), 1024),
        "fc3_w": dense(ks[10], (128, 256), 256),       "fc3_b": dense(ks[11], (128,), 256),
        "fc4_w": dense(ks[12], (out_num, 128), 128),   "fc4_b": dense(ks[13], (out_num,), 128),
    }


def pack_params(p, L, batch_tile=8):
    """One-time layout prep (outside the hot path):
       * conv1 weight doubled into (10, 16) for the fused conv1+pool1 matmul,
       * conv2/conv3 weights as per-tap (K, Cin, Cout) matrices,
       * precomputed block-diagonal selection matrices for the strided convs
         and the overlapping max-pools (sized for the batch tile),
       * fc weights transposed to (in, out) and stored bf16; biases f32."""
    L1, P1, L2, P2, L3, P3 = conv_dims(L)
    tb = batch_tile

    # Pool selections must never clip a window (VALID pooling): guarantees the
    # zero-padding-by-empty-row trick is exact (never clamps negatives to 0).
    assert 2 * (P2 - 1) + 3 < L2 and 2 * (P3 - 1) + 3 < L3, (L2, P2, L3, P3)

    w1 = jnp.transpose(p["conv1_w"][:, 0, :], (1, 0))            # (5, 8)
    z = jnp.zeros_like(w1)
    w1_two = jnp.concatenate(
        [jnp.concatenate([w1, z], axis=1),
         jnp.concatenate([z, w1], axis=1)], axis=0)              # (10, 16)

    return {
        "w1_two": w1_two,
        "b1": p["conv1_b"].reshape(1, -1),
        "sel2": _sel_stack(tb, L2, P1, 2, [k - 2 for k in range(4)]),   # conv2, pad=2
        "w2": jnp.transpose(p["conv2_w"], (2, 1, 0)),                   # (4, 8, 32)
        "b2": p["conv2_b"].reshape(1, -1),
        "selp2": _sel_stack(tb, P2, L2, 2, list(range(4))),             # pool2
        "sel3": _sel_stack(tb, L3, P2, 2, [k - 2 for k in range(4)]),   # conv3, pad=2
        "w3": jnp.transpose(p["conv3_w"], (2, 1, 0)),                   # (4, 32, 64)
        "b3": p["conv3_b"].reshape(1, -1),
        "selp3": _sel_stack(tb, P3, L3, 2, list(range(4))),             # pool3
        "fc1_w": p["fc1_w"].T.astype(jnp.bfloat16), "fc1_b": p["fc1_b"].reshape(1, -1),
        "fc2_w": p["fc2_w"].T.astype(jnp.bfloat16), "fc2_b": p["fc2_b"].reshape(1, -1),
        "fc3_w": p["fc3_w"].T.astype(jnp.bfloat16), "fc3_b": p["fc3_b"].reshape(1, -1),
        "fc4_w": p["fc4_w"].T.astype(jnp.bfloat16), "fc4_b": p["fc4_b"].reshape(1, -1),
    }


# ----------------------------------------------------------------------------
# The fused kernel: conv stack + MLP, one batch tile per grid step
# ----------------------------------------------------------------------------
def _cnn2_kernel(x_ref, w1_ref, b1_ref,
                 sel2_ref, w2_ref, b2_ref, selp2_ref,
                 sel3_ref, w3_ref, b3_ref, selp3_ref,
                 f1w_ref, f1b_ref, f2w_ref, f2b_ref,
                 f3w_ref, f3b_ref, f4w_ref, f4b_ref,
                 o_ref):
    f32 = jnp.float32
    bf16 = jnp.bfloat16

    def dotf(a, b):
        return jnp.dot(a, b, preferred_element_type=f32)

    # conv1 (k=5,s=5,p=0) + LeakyReLU + MaxPool(2,2): both pooling windows are
    # pre-packed into the 10 input columns; leaky is monotone increasing, so
    # maxpool(leaky(y + b)) == leaky(max(y_even, y_odd) + b).
    y = dotf(x_ref[...], w1_ref[...])                                  # (tb*P1, 16)
    c1 = y.shape[1] // 2
    p1 = _leaky(jnp.maximum(y[:, :c1], y[:, c1:]) + b1_ref[...])       # (tb*P1, 8)

    # conv2 (k=4,s=2,p=2) + LeakyReLU, via per-tap block-diag row selections.
    acc = None
    for k in range(sel2_ref.shape[0]):
        xk = dotf(sel2_ref[k], p1)                                     # (tb*L2, 8)
        v = dotf(xk, w2_ref[k])                                        # (tb*L2, 32)
        acc = v if acc is None else acc + v
    y2 = _leaky(acc + b2_ref[...])

    # MaxPool(4, 2)
    p2 = None
    for k in range(selp2_ref.shape[0]):
        v = dotf(selp2_ref[k], y2)                                     # (tb*P2, 32)
        p2 = v if p2 is None else jnp.maximum(p2, v)

    # conv3 (k=4,s=2,p=2) + LeakyReLU
    acc = None
    for k in range(sel3_ref.shape[0]):
        xk = dotf(sel3_ref[k], p2)                                     # (tb*L3, 32)
        v = dotf(xk, w3_ref[k])                                        # (tb*L3, 64)
        acc = v if acc is None else acc + v
    y3 = _leaky(acc + b3_ref[...])

    # MaxPool(4, 2) -> (tb*P3, 64); with P3 == 1 this is already the
    # channel-major flattened (tb, in_num) MLP input (PyTorch view(-1, in_num)).
    h = None
    for k in range(selp3_ref.shape[0]):
        v = dotf(selp3_ref[k], y3)
        h = v if h is None else jnp.maximum(h, v)

    # Fused MLP (fc1..fc4): bf16 x bf16 -> f32 dots on the MXU; bias adds and
    # activations stay f32 (v5e-safe elementwise path).
    h = _leaky(dotf(h.astype(bf16), f1w_ref[...]) + f1b_ref[...])
    h = _leaky(dotf(h.astype(bf16), f2w_ref[...]) + f2b_ref[...])
    h = _leaky(dotf(h.astype(bf16), f3w_ref[...]) + f3b_ref[...])
    out = dotf(h.astype(bf16), f4w_ref[...]) + f4b_ref[...]
    o_ref[...] = out.astype(o_ref.dtype)


# ----------------------------------------------------------------------------
# Forward pass (matches CNN2.forward)
# ----------------------------------------------------------------------------
def cnn2_forward(x, packed, in_num, out_num, batch_tile=8):
    N, c_in, L = x.shape
    assert c_in == 1
    L1, P1, L2, P2, L3, P3 = conv_dims(L)
    assert in_num == 64 * P3, (in_num, P3)
    # TODO(synk): P3 > 1 would need the channel-major flatten folded into fc1.
    assert P3 == 1, "fused kernel requires the conv stack to reduce length to 1"

    tb = batch_tile
    n_pad = ((N + tb - 1) // tb) * tb
    grid = (n_pad // tb,)

    # conv1 im2col + pool1 window pairing is a pure reshape: each pool1 output
    # position consumes 10 consecutive input samples.
    x_cols = x[:, 0, : P1 * 10].reshape(N, P1 * 10)
    if n_pad != N:
        x_cols = jnp.pad(x_cols, ((0, n_pad - N), (0, 0)))
    x_cols = x_cols.reshape(n_pad * P1, 10)

    ins = [x_cols,
           packed["w1_two"], packed["b1"],
           packed["sel2"], packed["w2"], packed["b2"], packed["selp2"],
           packed["sel3"], packed["w3"], packed["b3"], packed["selp3"],
           packed["fc1_w"], packed["fc1_b"], packed["fc2_w"], packed["fc2_b"],
           packed["fc3_w"], packed["fc3_b"], packed["fc4_w"], packed["fc4_b"]]

    def _const2(i):
        return (0, 0)

    def _const3(i):
        return (0, 0, 0)

    in_specs = [pl.BlockSpec((tb * P1, 10), lambda i: (i, 0))]
    for a in ins[1:]:
        in_specs.append(pl.BlockSpec(a.shape, _const2 if a.ndim == 2 else _const3))

    # Advisory cost estimate (MLP matmuls + conv/pool selection matmuls).
    mlp_flops = 2 * n_pad * (in_num * 1024 + 1024 * 256 + 256 * 128 + 128 * out_num)
    conv_flops = 2 * n_pad * P1 * 10 * 16
    conv_flops += grid[0] * sum(
        2 * s.shape[0] * s.shape[1] * s.shape[2] * c
        for s, c in ((packed["sel2"], 8), (packed["selp2"], 32),
                     (packed["sel3"], 32), (packed["selp3"], 64)))
    conv_flops += 2 * n_pad * (L2 * 4 * 8 * 32 + L3 * 4 * 32 * 64)
    nbytes = (int(x_cols.size) * 4 + n_pad * out_num * 4
              + sum(int(a.size) * a.dtype.itemsize for a in ins[1:]))

    out = pl.pallas_call(
        _cnn2_kernel,
        out_shape=jax.ShapeDtypeStruct((n_pad, out_num), jnp.float32),
        grid=grid,
        in_specs=in_specs,
        out_specs=pl.BlockSpec((tb, out_num), lambda i: (i, 0)),
        compiler_params=pltpu.CompilerParams(dimension_semantics=("parallel",)),
        cost_estimate=pl.CostEstimate(flops=int(mlp_flops + conv_flops),
                                      transcendentals=0,
                                      bytes_accessed=int(nbytes)),
    )(*ins)
    return out[:N]


# ----------------------------------------------------------------------------
# Plain-JAX reference (PyTorch semantics, full f32)
# ----------------------------------------------------------------------------
def _reference_forward(x, params, in_num, out_num):
    hp = jax.lax.Precision.HIGHEST

    def conv1d(y, w, b, stride, padding):
        out = jax.lax.conv_general_dilated(
            y, w, window_strides=(stride,), padding=[(padding, padding)],
            dimension_numbers=("NCH", "OIH", "NCH"), precision=hp)
        return out + b[None, :, None]

    def leaky(y):
        return jnp.where(y >= 0, y, 0.01 * y)

    def maxpool(y, k, s):
        return jax.lax.reduce_window(y, -jnp.inf, jax.lax.max,
                                     (1, 1, k), (1, 1, s), "VALID")

    y = maxpool(leaky(conv1d(x, params["conv1_w"], params["conv1_b"], 5, 0)), 2, 2)
    y = maxpool(leaky(conv1d(y, params["conv2_w"], params["conv2_b"], 2, 2)), 4, 2)
    y = maxpool(leaky(conv1d(y, params["conv3_w"], params["conv3_b"], 2, 2)), 4, 2)
    h = y.reshape(-1, in_num)
    h = leaky(jnp.dot(h, params["fc1_w"].T, precision=hp) + params["fc1_b"])
    h = leaky(jnp.dot(h, params["fc2_w"].T, precision=hp) + params["fc2_b"])
    h = leaky(jnp.dot(h, params["fc3_w"].T, precision=hp) + params["fc3_b"])
    h = jnp.dot(h, params["fc4_w"].T, precision=hp) + params["fc4_b"]
    return h.reshape(-1, out_num)


if __name__ == "__main__":
    # L = 320 collapses the conv stack to (64 channels x length 1), so
    # in_num = 64, matching CNN2.forward's view(-1, in_num).
    batch, L = 2, 320
    in_num, out_num = 64, 10
    TB = 8   # batch tile per grid step (batch is zero-padded up to a multiple)

    key = jax.random.PRNGKey(0)
    kx, kp = jax.random.split(key)
    x = jax.random.normal(kx, (batch, 1, L), jnp.float32)

    params = init_params(kp, in_num, out_num)       # PyTorch-layout weights
    packed = pack_params(params, L, batch_tile=TB)  # one-time layout prep

    fwd = jax.jit(functools.partial(cnn2_forward, in_num=in_num,
                                    out_num=out_num, batch_tile=TB))
    out = jax.block_until_ready(fwd(x, packed))
    assert out.shape == (batch, out_num), out.shape

    ref = jax.block_until_ready(
        jax.jit(functools.partial(_reference_forward, in_num=in_num,
                                  out_num=out_num))(x, params))
    # fc weights/activations feed the MXU in bf16 -> compare at bf16 tolerance.
    assert jnp.allclose(out, ref, rtol=2e-2, atol=2e-2), \
        float(jnp.max(jnp.abs(out - ref)))

    print("KERNEL_OK")
</pallas_src>

<mosaic_0001>
module attributes {stable_mosaic.version = 11 : i64} {
  func.func @_cnn2_kernel(%arg0: i32, %arg1: memref<256x10xf32, #tpu.memory_space<vmem>>, %arg2: memref<10x16xf32, #tpu.memory_space<vmem>>, %arg3: memref<1x8xf32, #tpu.memory_space<vmem>>, %arg4: memref<4x136x256xf32, #tpu.memory_space<vmem>>, %arg5: memref<4x8x32xf32, #tpu.memory_space<vmem>>, %arg6: memref<1x32xf32, #tpu.memory_space<vmem>>, %arg7: memref<4x56x136xf32, #tpu.memory_space<vmem>>, %arg8: memref<4x32x56xf32, #tpu.memory_space<vmem>>, %arg9: memref<4x32x64xf32, #tpu.memory_space<vmem>>, %arg10: memref<1x64xf32, #tpu.memory_space<vmem>>, %arg11: memref<4x8x32xf32, #tpu.memory_space<vmem>>, %arg12: memref<64x1024xbf16, #tpu.memory_space<vmem>>, %arg13: memref<1x1024xf32, #tpu.memory_space<vmem>>, %arg14: memref<1024x256xbf16, #tpu.memory_space<vmem>>, %arg15: memref<1x256xf32, #tpu.memory_space<vmem>>, %arg16: memref<256x128xbf16, #tpu.memory_space<vmem>>, %arg17: memref<1x128xf32, #tpu.memory_space<vmem>>, %arg18: memref<128x10xbf16, #tpu.memory_space<vmem>>, %arg19: memref<1x10xf32, #tpu.memory_space<vmem>>, %arg20: memref<8x10xf32, #tpu.memory_space<vmem>>) attributes {dimension_semantics = [#tpu.dimension_semantics<parallel>], iteration_bounds = array<i64: 1>, scalar_prefetch = 0 : i64, scratch_operands = 0 : i64, tpu.core_type = #tpu.core_type<tc>, window_params = [{transform_indices = @transform_0, window_bounds = array<i64: 256, 10>}, {pipeline_mode = #tpu.pipeline_mode<synchronous>, transform_indices = @transform_1, window_bounds = array<i64: 10, 16>}, {pipeline_mode = #tpu.pipeline_mode<synchronous>, transform_indices = @transform_2, window_bounds = array<i64: 1, 8>}, {pipeline_mode = #tpu.pipeline_mode<synchronous>, transform_indices = @transform_3, window_bounds = array<i64: 4, 136, 256>}, {pipeline_mode = #tpu.pipeline_mode<synchronous>, transform_indices = @transform_4, window_bounds = array<i64: 4, 8, 32>}, {pipeline_mode = #tpu.pipeline_mode<synchronous>, transform_indices = @transform_5, window_bounds = array<i64: 1, 32>}, {pipeline_mode = #tpu.pipeline_mode<synchronous>, transform_indices = @transform_6, window_bounds = array<i64: 4, 56, 136>}, {pipeline_mode = #tpu.pipeline_mode<synchronous>, transform_indices = @transform_7, window_bounds = array<i64: 4, 32, 56>}, {pipeline_mode = #tpu.pipeline_mode<synchronous>, transform_indices = @transform_8, window_bounds = array<i64: 4, 32, 64>}, {pipeline_mode = #tpu.pipeline_mode<synchronous>, transform_indices = @transform_9, window_bounds = array<i64: 1, 64>}, {pipeline_mode = #tpu.pipeline_mode<synchronous>, transform_indices = @transform_10, window_bounds = array<i64: 4, 8, 32>}, {pipeline_mode = #tpu.pipeline_mode<synchronous>, transform_indices = @transform_11, window_bounds = array<i64: 64, 1024>}, {pipeline_mode = #tpu.pipeline_mode<synchronous>, transform_indices = @transform_12, window_bounds = array<i64: 1, 1024>}, {pipeline_mode = #tpu.pipeline_mode<synchronous>, transform_indices = @transform_13, window_bounds = array<i64: 1024, 256>}, {pipeline_mode = #tpu.pipeline_mode<synchronous>, transform_indices = @transform_14, window_bounds = array<i64: 1, 256>}, {pipeline_mode = #tpu.pipeline_mode<synchronous>, transform_indices = @transform_15, window_bounds = array<i64: 256, 128>}, {pipeline_mode = #tpu.pipeline_mode<synchronous>, transform_indices = @transform_16, window_bounds = array<i64: 1, 128>}, {pipeline_mode = #tpu.pipeline_mode<synchronous>, transform_indices = @transform_17, window_bounds = array<i64: 128, 10>}, {pipeline_mode = #tpu.pipeline_mode<synchronous>, transform_indices = @transform_18, window_bounds = array<i64: 1, 10>}, {transform_indices = @transform_19, window_bounds = array<i64: 8, 10>}]} {
    %c0 = arith.constant 0 : index
    %c0_0 = arith.constant 0 : index
    %0 = vector.load %arg1[%c0, %c0_0] : memref<256x10xf32, #tpu.memory_space<vmem>>, vector<256x10xf32>
    %c0_1 = arith.constant 0 : index
    %c0_2 = arith.constant 0 : index
    %1 = vector.load %arg2[%c0_1, %c0_2] : memref<10x16xf32, #tpu.memory_space<vmem>>, vector<10x16xf32>
    %cst = arith.constant dense<0.000000e+00> : vector<256x16xf32>
    %2 = tpu.matmul %0, %1, %cst {dimension_numbers = #tpu.dot_dimension_numbers<[1], [0], [0], [1], [0, 0, 1, 1], [], []>} : vector<256x10xf32>, vector<10x16xf32>, vector<256x16xf32> -> vector<256x16xf32>
    %3 = vector.extract_strided_slice %2 {offsets = [0, 0], sizes = [256, 8], strides = [1, 1]} : vector<256x16xf32> to vector<256x8xf32>
    %4 = vector.extract_strided_slice %2 {offsets = [0, 8], sizes = [256, 8], strides = [1, 1]} : vector<256x16xf32> to vector<256x8xf32>
    %5 = arith.maximumf %3, %4 : vector<256x8xf32>
    %c0_3 = arith.constant 0 : index
    %c0_4 = arith.constant 0 : index
    %6 = vector.load %arg3[%c0_3, %c0_4] : memref<1x8xf32, #tpu.memory_space<vmem>>, vector<1x8xf32>
    %7 = vector.broadcast %6 : vector<1x8xf32> to vector<256x8xf32>
    %8 = arith.addf %5, %7 : vector<256x8xf32>
    %cst_5 = arith.constant 0.00999999977 : f32
    %9 = vector.broadcast %cst_5 : f32 to vector<256x8xf32>
    %10 = arith.mulf %9, %8 : vector<256x8xf32>
    %11 = arith.maximumf %8, %10 : vector<256x8xf32>
    %c0_6 = arith.constant 0 : index
    %c0_7 = arith.constant 0 : index
    %c0_8 = arith.constant 0 : index
    %12 = vector.load %arg4[%c0_6, %c0_7, %c0_8] : memref<4x136x256xf32, #tpu.memory_space<vmem>>, vector<1x136x256xf32>
    %13 = vector.shape_cast %12 : vector<1x136x256xf32> to vector<136x256xf32>
    %cst_9 = arith.constant dense<0.000000e+00> : vector<136x8xf32>
    %14 = tpu.matmul %13, %11, %cst_9 {dimension_numbers = #tpu.dot_dimension_numbers<[1], [0], [0], [1], [0, 0, 1, 1], [], []>} : vector<136x256xf32>, vector<256x8xf32>, vector<136x8xf32> -> vector<136x8xf32>
    %c0_10 = arith.constant 0 : index
    %c0_11 = arith.constant 0 : index
    %c0_12 = arith.constant 0 : index
    %15 = vector.load %arg5[%c0_10, %c0_11, %c0_12] : memref<4x8x32xf32, #tpu.memory_space<vmem>>, vector<1x8x32xf32>
    %16 = vector.shape_cast %15 : vector<1x8x32xf32> to vector<8x32xf32>
    %cst_13 = arith.constant dense<0.000000e+00> : vector<136x32xf32>
    %17 = tpu.matmul %14, %16, %cst_13 {dimension_numbers = #tpu.dot_dimension_numbers<[1], [0], [0], [1], [0, 0, 1, 1], [], []>} : vector<136x8xf32>, vector<8x32xf32>, vector<136x32xf32> -> vector<136x32xf32>
    %c1 = arith.constant 1 : index
    %c0_14 = arith.constant 0 : index
    %c0_15 = arith.constant 0 : index
    %18 = vector.load %arg4[%c1, %c0_14, %c0_15] : memref<4x136x256xf32, #tpu.memory_space<vmem>>, vector<1x136x256xf32>
    %19 = vector.shape_cast %18 : vector<1x136x256xf32> to vector<136x256xf32>
    %cst_16 = arith.constant dense<0.000000e+00> : vector<136x8xf32>
    %20 = tpu.matmul %19, %11, %cst_16 {dimension_numbers = #tpu.dot_dimension_numbers<[1], [0], [0], [1], [0, 0, 1, 1], [], []>} : vector<136x256xf32>, vector<256x8xf32>, vector<136x8xf32> -> vector<136x8xf32>
    %c1_17 = arith.constant 1 : index
    %c0_18 = arith.constant 0 : index
    %c0_19 = arith.constant 0 : index
    %21 = vector.load %arg5[%c1_17, %c0_18, %c0_19] : memref<4x8x32xf32, #tpu.memory_space<vmem>>, vector<1x8x32xf32>
    %22 = vector.shape_cast %21 : vector<1x8x32xf32> to vector<8x32xf32>
    %cst_20 = arith.constant dense<0.000000e+00> : vector<136x32xf32>
    %23 = tpu.matmul %20, %22, %cst_20 {dimension_numbers = #tpu.dot_dimension_numbers<[1], [0], [0], [1], [0, 0, 1, 1], [], []>} : vector<136x8xf32>, vector<8x32xf32>, vector<136x32xf32> -> vector<136x32xf32>
    %24 = arith.addf %17, %23 : vector<136x32xf32>
    %c2 = arith.constant 2 : index
    %c0_21 = arith.constant 0 : index
    %c0_22 = arith.constant 0 : index
    %25 = vector.load %arg4[%c2, %c0_21, %c0_22] : memref<4x136x256xf32, #tpu.memory_space<vmem>>, vector<1x136x256xf32>
    %26 = vector.shape_cast %25 : vector<1x136x256xf32> to vector<136x256xf32>
    %cst_23 = arith.constant dense<0.000000e+00> : vector<136x8xf32>
    %27 = tpu.matmul %26, %11, %cst_23 {dimension_numbers = #tpu.dot_dimension_numbers<[1], [0], [0], [1], [0, 0, 1, 1], [], []>} : vector<136x256xf32>, vector<256x8xf32>, vector<136x8xf32> -> vector<136x8xf32>
    %c2_24 = arith.constant 2 : index
    %c0_25 = arith.constant 0 : index
    %c0_26 = arith.constant 0 : index
    %28 = vector.load %arg5[%c2_24, %c0_25, %c0_26] : memref<4x8x32xf32, #tpu.memory_space<vmem>>, vector<1x8x32xf32>
    %29 = vector.shape_cast %28 : vector<1x8x32xf32> to vector<8x32xf32>
    %cst_27 = arith.constant dense<0.000000e+00> : vector<136x32xf32>
    %30 = tpu.matmul %27, %29, %cst_27 {dimension_numbers = #tpu.dot_dimension_numbers<[1], [0], [0], [1], [0, 0, 1, 1], [], []>} : vector<136x8xf32>, vector<8x32xf32>, vector<136x32xf32> -> vector<136x32xf32>
    %31 = arith.addf %24, %30 : vector<136x32xf32>
    %c3 = arith.constant 3 : index
    %c0_28 = arith.constant 0 : index
    %c0_29 = arith.constant 0 : index
    %32 = vector.load %arg4[%c3, %c0_28, %c0_29] : memref<4x136x256xf32, #tpu.memory_space<vmem>>, vector<1x136x256xf32>
    %33 = vector.shape_cast %32 : vector<1x136x256xf32> to vector<136x256xf32>
    %cst_30 = arith.constant dense<0.000000e+00> : vector<136x8xf32>
    %34 = tpu.matmul %33, %11, %cst_30 {dimension_numbers = #tpu.dot_dimension_numbers<[1], [0], [0], [1], [0, 0, 1, 1], [], []>} : vector<136x256xf32>, vector<256x8xf32>, vector<136x8xf32> -> vector<136x8xf32>
    %c3_31 = arith.constant 3 : index
    %c0_32 = arith.constant 0 : index
    %c0_33 = arith.constant 0 : index
    %35 = vector.load %arg5[%c3_31, %c0_32, %c0_33] : memref<4x8x32xf32, #tpu.memory_space<vmem>>, vector<1x8x32xf32>
    %36 = vector.shape_cast %35 : vector<1x8x32xf32> to vector<8x32xf32>
    %cst_34 = arith.constant dense<0.000000e+00> : vector<136x32xf32>
    %37 = tpu.matmul %34, %36, %cst_34 {dimension_numbers = #tpu.dot_dimension_numbers<[1], [0], [0], [1], [0, 0, 1, 1], [], []>} : vector<136x8xf32>, vector<8x32xf32>, vector<136x32xf32> -> vector<136x32xf32>
    %38 = arith.addf %31, %37 : vector<136x32xf32>
    %c0_35 = arith.constant 0 : index
    %c0_36 = arith.constant 0 : index
    %39 = vector.load %arg6[%c0_35, %c0_36] : memref<1x32xf32, #tpu.memory_space<vmem>>, vector<1x32xf32>
    %40 = vector.broadcast %39 : vector<1x32xf32> to vector<136x32xf32>
    %41 = arith.addf %38, %40 : vector<136x32xf32>
    %cst_37 = arith.constant 0.00999999977 : f32
    %42 = vector.broadcast %cst_37 : f32 to vector<136x32xf32>
    %43 = arith.mulf %42, %41 : vector<136x32xf32>
    %44 = arith.maximumf %41, %43 : vector<136x32xf32>
    %c0_38 = arith.constant 0 : index
    %c0_39 = arith.constant 0 : index
    %c0_40 = arith.constant 0 : index
    %45 = vector.load %arg7[%c0_38, %c0_39, %c0_40] : memref<4x56x136xf32, #tpu.memory_space<vmem>>, vector<1x56x136xf32>
    %46 = vector.shape_cast %45 : vector<1x56x136xf32> to vector<56x136xf32>
    %cst_41 = arith.constant dense<0.000000e+00> : vector<56x32xf32>
    %47 = tpu.matmul %46, %44, %cst_41 {dimension_numbers = #tpu.dot_dimension_numbers<[1], [0], [0], [1], [0, 0, 1, 1], [], []>} : vector<56x136xf32>, vector<136x32xf32>, vector<56x32xf32> -> vector<56x32xf32>
    %c1_42 = arith.constant 1 : index
    %c0_43 = arith.constant 0 : index
    %c0_44 = arith.constant 0 : index
    %48 = vector.load %arg7[%c1_42, %c0_43, %c0_44] : memref<4x56x136xf32, #tpu.memory_space<vmem>>, vector<1x56x136xf32>
    %49 = vector.shape_cast %48 : vector<1x56x136xf32> to vector<56x136xf32>
    %cst_45 = arith.constant dense<0.000000e+00> : vector<56x32xf32>
    %50 = tpu.matmul %49, %44, %cst_45 {dimension_numbers = #tpu.dot_dimension_numbers<[1], [0], [0], [1], [0, 0, 1, 1], [], []>} : vector<56x136xf32>, vector<136x32xf32>, vector<56x32xf32> -> vector<56x32xf32>
    %51 = arith.maximumf %47, %50 : vector<56x32xf32>
    %c2_46 = arith.constant 2 : index
    %c0_47 = arith.constant 0 : index
    %c0_48 = arith.constant 0 : index
    %52 = vector.load %arg7[%c2_46, %c0_47, %c0_48] : memref<4x56x136xf32, #tpu.memory_space<vmem>>, vector<1x56x136xf32>
    %53 = vector.shape_cast %52 : vector<1x56x136xf32> to vector<56x136xf32>
    %cst_49 = arith.constant dense<0.000000e+00> : vector<56x32xf32>
    %54 = tpu.matmul %53, %44, %cst_49 {dimension_numbers = #tpu.dot_dimension_numbers<[1], [0], [0], [1], [0, 0, 1, 1], [], []>} : vector<56x136xf32>, vector<136x32xf32>, vector<56x32xf32> -> vector<56x32xf32>
    %55 = arith.maximumf %51, %54 : vector<56x32xf32>
    %c3_50 = arith.constant 3 : index
    %c0_51 = arith.constant 0 : index
    %c0_52 = arith.constant 0 : index
    %56 = vector.load %arg7[%c3_50, %c0_51, %c0_52] : memref<4x56x136xf32, #tpu.memory_space<vmem>>, vector<1x56x136xf32>
    %57 = vector.shape_cast %56 : vector<1x56x136xf32> to vector<56x136xf32>
    %cst_53 = arith.constant dense<0.000000e+00> : vector<56x32xf32>
    %58 = tpu.matmul %57, %44, %cst_53 {dimension_numbers = #tpu.dot_dimension_numbers<[1], [0], [0], [1], [0, 0, 1, 1], [], []>} : vector<56x136xf32>, vector<136x32xf32>, vector<56x32xf32> -> vector<56x32xf32>
    %59 = arith.maximumf %55, %58 : vector<56x32xf32>
    %c0_54 = arith.constant 0 : index
    %c0_55 = arith.constant 0 : index
    %c0_56 = arith.constant 0 : index
    %60 = vector.load %arg8[%c0_54, %c0_55, %c0_56] : memref<4x32x56xf32, #tpu.memory_space<vmem>>, vector<1x32x56xf32>
    %61 = vector.shape_cast %60 : vector<1x32x56xf32> to vector<32x56xf32>
    %cst_57 = arith.constant dense<0.000000e+00> : vector<32x32xf32>
    %62 = tpu.matmul %61, %59, %cst_57 {dimension_numbers = #tpu.dot_dimension_numbers<[1], [0], [0], [1], [0, 0, 1, 1], [], []>} : vector<32x56xf32>, vector<56x32xf32>, vector<32x32xf32> -> vector<32x32xf32>
    %c0_58 = arith.constant 0 : index
    %c0_59 = arith.constant 0 : index
    %c0_60 = arith.constant 0 : index
    %63 = vector.load %arg9[%c0_58, %c0_59, %c0_60] : memref<4x32x64xf32, #tpu.memory_space<vmem>>, vector<1x32x64xf32>
    %64 = vector.shape_cast %63 : vector<1x32x64xf32> to vector<32x64xf32>
    %cst_61 = arith.constant dense<0.000000e+00> : vector<32x64xf32>
    %65 = tpu.matmul %62, %64, %cst_61 {dimension_numbers = #tpu.dot_dimension_numbers<[1], [0], [0], [1], [0, 0, 1, 1], [], []>} : vector<32x32xf32>, vector<32x64xf32>, vector<32x64xf32> -> vector<32x64xf32>
    %c1_62 = arith.constant 1 : index
    %c0_63 = arith.constant 0 : index
    %c0_64 = arith.constant 0 : index
    %66 = vector.load %arg8[%c1_62, %c0_63, %c0_64] : memref<4x32x56xf32, #tpu.memory_space<vmem>>, vector<1x32x56xf32>
    %67 = vector.shape_cast %66 : vector<1x32x56xf32> to vector<32x56xf32>
    %cst_65 = arith.constant dense<0.000000e+00> : vector<32x32xf32>
    %68 = tpu.matmul %67, %59, %cst_65 {dimension_numbers = #tpu.dot_dimension_numbers<[1], [0], [0], [1], [0, 0, 1, 1], [], []>} : vector<32x56xf32>, vector<56x32xf32>, vector<32x32xf32> -> vector<32x32xf32>
    %c1_66 = arith.constant 1 : index
    %c0_67 = arith.constant 0 : index
    %c0_68 = arith.constant 0 : index
    %69 = vector.load %arg9[%c1_66, %c0_67, %c0_68] : memref<4x32x64xf32, #tpu.memory_space<vmem>>, vector<1x32x64xf32>
    %70 = vector.shape_cast %69 : vector<1x32x64xf32> to vector<32x64xf32>
    %cst_69 = arith.constant dense<0.000000e+00> : vector<32x64xf32>
    %71 = tpu.matmul %68, %70, %cst_69 {dimension_numbers = #tpu.dot_dimension_numbers<[1], [0], [0], [1], [0, 0, 1, 1], [], []>} : vector<32x32xf32>, vector<32x64xf32>, vector<32x64xf32> -> vector<32x64xf32>
    %72 = arith.addf %65, %71 : vector<32x64xf32>
    %c2_70 = arith.constant 2 : index
    %c0_71 = arith.constant 0 : index
    %c0_72 = arith.constant 0 : index
    %73 = vector.load %arg8[%c2_70, %c0_71, %c0_72] : memref<4x32x56xf32, #tpu.memory_space<vmem>>, vector<1x32x56xf32>
    %74 = vector.shape_cast %73 : vector<1x32x56xf32> to vector<32x56xf32>
    %cst_73 = arith.constant dense<0.000000e+00> : vector<32x32xf32>
    %75 = tpu.matmul %74, %59, %cst_73 {dimension_numbers = #tpu.dot_dimension_numbers<[1], [0], [0], [1], [0, 0, 1, 1], [], []>} : vector<32x56xf32>, vector<56x32xf32>, vector<32x32xf32> -> vector<32x32xf32>
    %c2_74 = arith.constant 2 : index
    %c0_75 = arith.constant 0 : index
    %c0_76 = arith.constant 0 : index
    %76 = vector.load %arg9[%c2_74, %c0_75, %c0_76] : memref<4x32x64xf32, #tpu.memory_space<vmem>>, vector<1x32x64xf32>
    %77 = vector.shape_cast %76 : vector<1x32x64xf32> to vector<32x64xf32>
    %cst_77 = arith.constant dense<0.000000e+00> : vector<32x64xf32>
    %78 = tpu.matmul %75, %77, %cst_77 {dimension_numbers = #tpu.dot_dimension_numbers<[1], [0], [0], [1], [0, 0, 1, 1], [], []>} : vector<32x32xf32>, vector<32x64xf32>, vector<32x64xf32> -> vector<32x64xf32>
    %79 = arith.addf %72, %78 : vector<32x64xf32>
    %c3_78 = arith.constant 3 : index
    %c0_79 = arith.constant 0 : index
    %c0_80 = arith.constant 0 : index
    %80 = vector.load %arg8[%c3_78, %c0_79, %c0_80] : memref<4x32x56xf32, #tpu.memory_space<vmem>>, vector<1x32x56xf32>
    %81 = vector.shape_cast %80 : vector<1x32x56xf32> to vector<32x56xf32>
    %cst_81 = arith.constant dense<0.000000e+00> : vector<32x32xf32>
    %82 = tpu.matmul %81, %59, %cst_81 {dimension_numbers = #tpu.dot_dimension_numbers<[1], [0], [0], [1], [0, 0, 1, 1], [], []>} : vector<32x56xf32>, vector<56x32xf32>, vector<32x32xf32> -> vector<32x32xf32>
    %c3_82 = arith.constant 3 : index
    %c0_83 = arith.constant 0 : index
    %c0_84 = arith.constant 0 : index
    %83 = vector.load %arg9[%c3_82, %c0_83, %c0_84] : memref<4x32x64xf32, #tpu.memory_space<vmem>>, vector<1x32x64xf32>
    %84 = vector.shape_cast %83 : vector<1x32x64xf32> to vector<32x64xf32>
    %cst_85 = arith.constant dense<0.000000e+00> : vector<32x64xf32>
    %85 = tpu.matmul %82, %84, %cst_85 {dimension_numbers = #tpu.dot_dimension_numbers<[1], [0], [0], [1], [0, 0, 1, 1], [], []>} : vector<32x32xf32>, vector<32x64xf32>, vector<32x64xf32> -> vector<32x64xf32>
    %86 = arith.addf %79, %85 : vector<32x64xf32>
    %c0_86 = arith.constant 0 : index
    %c0_87 = arith.constant 0 : index
    %87 = vector.load %arg10[%c0_86, %c0_87] : memref<1x64xf32, #tpu.memory_space<vmem>>, vector<1x64xf32>
    %88 = vector.broadcast %87 : vector<1x64xf32> to vector<32x64xf32>
    %89 = arith.addf %86, %88 : vector<32x64xf32>
    %cst_88 = arith.constant 0.00999999977 : f32
    %90 = vector.broadcast %cst_88 : f32 to vector<32x64xf32>
    %91 = arith.mulf %90, %89 : vector<32x64xf32>
    %92 = arith.maximumf %89, %91 : vector<32x64xf32>
    %c0_89 = arith.constant 0 : index
    %c0_90 = arith.constant 0 : index
    %c0_91 = arith.constant 0 : index
    %93 = vector.load %arg11[%c0_89, %c0_90, %c0_91] : memref<4x8x32xf32, #tpu.memory_space<vmem>>, vector<1x8x32xf32>
    %94 = vector.shape_cast %93 : vector<1x8x32xf32> to vector<8x32xf32>
    %cst_92 = arith.constant dense<0.000000e+00> : vector<8x64xf32>
    %95 = tpu.matmul %94, %92, %cst_92 {dimension_numbers = #tpu.dot_dimension_numbers<[1], [0], [0], [1], [0, 0, 1, 1], [], []>} : vector<8x32xf32>, vector<32x64xf32>, vector<8x64xf32> -> vector<8x64xf32>
    %c1_93 = arith.constant 1 : index
    %c0_94 = arith.constant 0 : index
    %c0_95 = arith.constant 0 : index
    %96 = vector.load %arg11[%c1_93, %c0_94, %c0_95] : memref<4x8x32xf32, #tpu.memory_space<vmem>>, vector<1x8x32xf32>
    %97 = vector.shape_cast %96 : vector<1x8x32xf32> to vector<8x32xf32>
    %cst_96 = arith.constant dense<0.000000e+00> : vector<8x64xf32>
    %98 = tpu.matmul %97, %92, %cst_96 {dimension_numbers = #tpu.dot_dimension_numbers<[1], [0], [0], [1], [0, 0, 1, 1], [], []>} : vector<8x32xf32>, vector<32x64xf32>, vector<8x64xf32> -> vector<8x64xf32>
    %99 = arith.maximumf %95, %98 : vector<8x64xf32>
    %c2_97 = arith.constant 2 : index
    %c0_98 = arith.constant 0 : index
    %c0_99 = arith.constant 0 : index
    %100 = vector.load %arg11[%c2_97, %c0_98, %c0_99] : memref<4x8x32xf32, #tpu.memory_space<vmem>>, vector<1x8x32xf32>
    %101 = vector.shape_cast %100 : vector<1x8x32xf32> to vector<8x32xf32>
    %cst_100 = arith.constant dense<0.000000e+00> : vector<8x64xf32>
    %102 = tpu.matmul %101, %92, %cst_100 {dimension_numbers = #tpu.dot_dimension_numbers<[1], [0], [0], [1], [0, 0, 1, 1], [], []>} : vector<8x32xf32>, vector<32x64xf32>, vector<8x64xf32> -> vector<8x64xf32>
    %103 = arith.maximumf %99, %102 : vector<8x64xf32>
    %c3_101 = arith.constant 3 : index
    %c0_102 = arith.constant 0 : index
    %c0_103 = arith.constant 0 : index
    %104 = vector.load %arg11[%c3_101, %c0_102, %c0_103] : memref<4x8x32xf32, #tpu.memory_space<vmem>>, vector<1x8x32xf32>
    %105 = vector.shape_cast %104 : vector<1x8x32xf32> to vector<8x32xf32>
    %cst_104 = arith.constant dense<0.000000e+00> : vector<8x64xf32>
    %106 = tpu.matmul %105, %92, %cst_104 {dimension_numbers = #tpu.dot_dimension_numbers<[1], [0], [0], [1], [0, 0, 1, 1], [], []>} : vector<8x32xf32>, vector<32x64xf32>, vector<8x64xf32> -> vector<8x64xf32>
    %107 = arith.maximumf %103, %106 : vector<8x64xf32>
    %108 = arith.truncf %107 : vector<8x64xf32> to vector<8x64xbf16>
    %c0_105 = arith.constant 0 : index
    %c0_106 = arith.constant 0 : index
    %109 = vector.load %arg12[%c0_105, %c0_106] : memref<64x1024xbf16, #tpu.memory_space<vmem>>, vector<64x1024xbf16>
    %cst_107 = arith.constant dense<0.000000e+00> : vector<8x1024xf32>
    %110 = tpu.matmul %108, %109, %cst_107 {dimension_numbers = #tpu.dot_dimension_numbers<[1], [0], [0], [1], [0, 0, 1, 1], [], []>} : vector<8x64xbf16>, vector<64x1024xbf16>, vector<8x1024xf32> -> vector<8x1024xf32>
    %c0_108 = arith.constant 0 : index
    %c0_109 = arith.constant 0 : index
    %111 = vector.load %arg13[%c0_108, %c0_109] : memref<1x1024xf32, #tpu.memory_space<vmem>>, vector<1x1024xf32>
    %112 = vector.broadcast %111 : vector<1x1024xf32> to vector<8x1024xf32>
    %113 = arith.addf %110, %112 : vector<8x1024xf32>
    %cst_110 = arith.constant 0.00999999977 : f32
    %114 = vector.broadcast %cst_110 : f32 to vector<8x1024xf32>
    %115 = arith.mulf %114, %113 : vector<8x1024xf32>
    %116 = arith.maximumf %113, %115 : vector<8x1024xf32>
    %117 = arith.truncf %116 : vector<8x1024xf32> to vector<8x1024xbf16>
    %c0_111 = arith.constant 0 : index
    %c0_112 = arith.constant 0 : index
    %118 = vector.load %arg14[%c0_111, %c0_112] : memref<1024x256xbf16, #tpu.memory_space<vmem>>, vector<1024x256xbf16>
    %cst_113 = arith.constant dense<0.000000e+00> : vector<8x256xf32>
    %119 = tpu.matmul %117, %118, %cst_113 {dimension_numbers = #tpu.dot_dimension_numbers<[1], [0], [0], [1], [0, 0, 1, 1], [], []>} : vector<8x1024xbf16>, vector<1024x256xbf16>, vector<8x256xf32> -> vector<8x256xf32>
    %c0_114 = arith.constant 0 : index
    %c0_115 = arith.constant 0 : index
    %120 = vector.load %arg15[%c0_114, %c0_115] : memref<1x256xf32, #tpu.memory_space<vmem>>, vector<1x256xf32>
    %121 = vector.broadcast %120 : vector<1x256xf32> to vector<8x256xf32>
    %122 = arith.addf %119, %121 : vector<8x256xf32>
    %cst_116 = arith.constant 0.00999999977 : f32
    %123 = vector.broadcast %cst_116 : f32 to vector<8x256xf32>
    %124 = arith.mulf %123, %122 : vector<8x256xf32>
    %125 = arith.maximumf %122, %124 : vector<8x256xf32>
    %126 = arith.truncf %125 : vector<8x256xf32> to vector<8x256xbf16>
    %c0_117 = arith.constant 0 : index
    %c0_118 = arith.constant 0 : index
    %127 = vector.load %arg16[%c0_117, %c0_118] : memref<256x128xbf16, #tpu.memory_space<vmem>>, vector<256x128xbf16>
    %cst_119 = arith.constant dense<0.000000e+00> : vector<8x128xf32>
    %128 = tpu.matmul %126, %127, %cst_119 {dimension_numbers = #tpu.dot_dimension_numbers<[1], [0], [0], [1], [0, 0, 1, 1], [], []>} : vector<8x256xbf16>, vector<256x128xbf16>, vector<8x128xf32> -> vector<8x128xf32>
    %c0_120 = arith.constant 0 : index
    %c0_121 = arith.constant 0 : index
    %129 = vector.load %arg17[%c0_120, %c0_121] : memref<1x128xf32, #tpu.memory_space<vmem>>, vector<1x128xf32>
    %130 = vector.broadcast %129 : vector<1x128xf32> to vector<8x128xf32>
    %131 = arith.addf %128, %130 : vector<8x128xf32>
    %cst_122 = arith.constant 0.00999999977 : f32
    %132 = vector.broadcast %cst_122 : f32 to vector<8x128xf32>
    %133 = arith.mulf %132, %131 : vector<8x128xf32>
    %134 = arith.maximumf %131, %133 : vector<8x128xf32>
    %135 = arith.truncf %134 : vector<8x128xf32> to vector<8x128xbf16>
    %c0_123 = arith.constant 0 : index
    %c0_124 = arith.constant 0 : index
    %136 = vector.load %arg18[%c0_123, %c0_124] : memref<128x10xbf16, #tpu.memory_space<vmem>>, vector<128x10xbf16>
    %cst_125 = arith.constant dense<0.000000e+00> : vector<8x10xf32>
    %137 = tpu.matmul %135, %136, %cst_125 {dimension_numbers = #tpu.dot_dimension_numbers<[1], [0], [0], [1], [0, 0, 1, 1], [], []>} : vector<8x128xbf16>, vector<128x10xbf16>, vector<8x10xf32> -> vector<8x10xf32>
    %c0_126 = arith.constant 0 : index
    %c0_127 = arith.constant 0 : index
    %138 = vector.load %arg19[%c0_126, %c0_127] : memref<1x10xf32, #tpu.memory_space<vmem>>, vector<1x10xf32>
    %139 = vector.broadcast %138 : vector<1x10xf32> to vector<8x10xf32>
    %140 = arith.addf %137, %139 : vector<8x10xf32>
    %c0_128 = arith.constant 0 : index
    %c0_129 = arith.constant 0 : index
    %141 = vector.load %arg20[%c0_128, %c0_129] : memref<8x10xf32, #tpu.memory_space<vmem>>, vector<8x10xf32>
    tpu.vector_store %arg20[%c0_128, %c0_129], %140 {strides = array<i32>} : memref<8x10xf32, #tpu.memory_space<vmem>>, vector<8x10xf32>,
    return
  }
  func.func @transform_0(%arg0: i32) -> (i32, i32) {
    %c0_i32 = arith.constant 0 : i32
    %c0_i32_0 = arith.constant 0 : i32
    return %arg0, %c0_i32 : i32, i32
  }
  func.func @transform_1(%arg0: i32) -> (i32, i32) {
    %c0_i32 = arith.constant 0 : i32
    %c0_i32_0 = arith.constant 0 : i32
    %c0_i32_1 = arith.constant 0 : i32
    return %c0_i32, %c0_i32_0 : i32, i32
  }
  func.func @transform_2(%arg0: i32) -> (i32, i32) {
    %c0_i32 = arith.constant 0 : i32
    %c0_i32_0 = arith.constant 0 : i32
    %c0_i32_1 = arith.constant 0 : i32
    return %c0_i32, %c0_i32_0 : i32, i32
  }
  func.func @transform_3(%arg0: i32) -> (i32, i32, i32) {
    %c0_i32 = arith.constant 0 : i32
    %c0_i32_0 = arith.constant 0 : i32
    %c0_i32_1 = arith.constant 0 : i32
    %c0_i32_2 = arith.constant 0 : i32
    return %c0_i32, %c0_i32_0, %c0_i32_1 : i32, i32, i32
  }
  func.func @transform_4(%arg0: i32) -> (i32, i32, i32) {
    %c0_i32 = arith.constant 0 : i32
    %c0_i32_0 = arith.constant 0 : i32
    %c0_i32_1 = arith.constant 0 : i32
    %c0_i32_2 = arith.constant 0 : i32
    return %c0_i32, %c0_i32_0, %c0_i32_1 : i32, i32, i32
  }
  func.func @transform_5(%arg0: i32) -> (i32, i32) {
    %c0_i32 = arith.constant 0 : i32
    %c0_i32_0 = arith.constant 0 : i32
    %c0_i32_1 = arith.constant 0 : i32
    return %c0_i32, %c0_i32_0 : i32, i32
  }
  func.func @transform_6(%arg0: i32) -> (i32, i32, i32) {
    %c0_i32 = arith.constant 0 : i32
    %c0_i32_0 = arith.constant 0 : i32
    %c0_i32_1 = arith.constant 0 : i32
    %c0_i32_2 = arith.constant 0 : i32
    return %c0_i32, %c0_i32_0, %c0_i32_1 : i32, i32, i32
  }
  func.func @transform_7(%arg0: i32) -> (i32, i32, i32) {
    %c0_i32 = arith.constant 0 : i32
    %c0_i32_0 = arith.constant 0 : i32
    %c0_i32_1 = arith.constant 0 : i32
    %c0_i32_2 = arith.constant 0 : i32
    return %c0_i32, %c0_i32_0, %c0_i32_1 : i32, i32, i32
  }
  func.func @transform_8(%arg0: i32) -> (i32, i32, i32) {
    %c0_i32 = arith.constant 0 : i32
    %c0_i32_0 = arith.constant 0 : i32
    %c0_i32_1 = arith.constant 0 : i32
    %c0_i32_2 = arith.constant 0 : i32
    return %c0_i32, %c0_i32_0, %c0_i32_1 : i32, i32, i32
  }
  func.func @transform_9(%arg0: i32) -> (i32, i32) {
    %c0_i32 = arith.constant 0 : i32
    %c0_i32_0 = arith.constant 0 : i32
    %c0_i32_1 = arith.constant 0 : i32
    return %c0_i32, %c0_i32_0 : i32, i32
  }
  func.func @transform_10(%arg0: i32) -> (i32, i32, i32) {
    %c0_i32 = arith.constant 0 : i32
    %c0_i32_0 = arith.constant 0 : i32
    %c0_i32_1 = arith.constant 0 : i32
    %c0_i32_2 = arith.constant 0 : i32
    return %c0_i32, %c0_i32_0, %c0_i32_1 : i32, i32, i32
  }
  func.func @transform_11(%arg0: i32) -> (i32, i32) {
    %c0_i32 = arith.constant 0 : i32
    %c0_i32_0 = arith.constant 0 : i32
    %c0_i32_1 = arith.constant 0 : i32
    return %c0_i32, %c0_i32_0 : i32, i32
  }
  func.func @transform_12(%arg0: i32) -> (i32, i32) {
    %c0_i32 = arith.constant 0 : i32
    %c0_i32_0 = arith.constant 0 : i32
    %c0_i32_1 = arith.constant 0 : i32
    return %c0_i32, %c0_i32_0 : i32, i32
  }
  func.func @transform_13(%arg0: i32) -> (i32, i32) {
    %c0_i32 = arith.constant 0 : i32
    %c0_i32_0 = arith.constant 0 : i32
    %c0_i32_1 = arith.constant 0 : i32
    return %c0_i32, %c0_i32_0 : i32, i32
  }
  func.func @transform_14(%arg0: i32) -> (i32, i32) {
    %c0_i32 = arith.constant 0 : i32
    %c0_i32_0 = arith.constant 0 : i32
    %c0_i32_1 = arith.constant 0 : i32
    return %c0_i32, %c0_i32_0 : i32, i32
  }
  func.func @transform_15(%arg0: i32) -> (i32, i32) {
    %c0_i32 = arith.constant 0 : i32
    %c0_i32_0 = arith.constant 0 : i32
    %c0_i32_1 = arith.constant 0 : i32
    return %c0_i32, %c0_i32_0 : i32, i32
  }
  func.func @transform_16(%arg0: i32) -> (i32, i32) {
    %c0_i32 = arith.constant 0 : i32
    %c0_i32_0 = arith.constant 0 : i32
    %c0_i32_1 = arith.constant 0 : i32
    return %c0_i32, %c0_i32_0 : i32, i32
  }
  func.func @transform_17(%arg0: i32) -> (i32, i32) {
    %c0_i32 = arith.constant 0 : i32
    %c0_i32_0 = arith.constant 0 : i32
    %c0_i32_1 = arith.constant 0 : i32
    return %c0_i32, %c0_i32_0 : i32, i32
  }
  func.func @transform_18(%arg0: i32) -> (i32, i32) {
    %c0_i32 = arith.constant 0 : i32
    %c0_i32_0 = arith.constant 0 : i32
    %c0_i32_1 = arith.constant 0 : i32
    return %c0_i32, %c0_i32_0 : i32, i32
  }
  func.func @transform_19(%arg0: i32) -> (i32, i32) {
    %c0_i32 = arith.constant 0 : i32
    %c0_i32_0 = arith.constant 0 : i32
    return %arg0, %c0_i32 : i32, i32
  }
}

</mosaic_0001>

<bundles_post_ra>
// kernel: cnn2_forward.1
= control target key start
LH: loop header
LB: loop body
LE: loop exit
PB: predicated region body
PF: predicated region fallthrough
CT: control target
= control target key end

     0   :  { %s9418_s0 = inlined_call_operand.vmem [shape: f32[256,10], index: 0, kind: input, shape index: {}]   ;;  %s9419_s1 = inlined_call_operand.vmem [shape: f32[10,16], index: 1, kind: input, shape index: {}]   ;;  %s9420_s2 = inlined_call_operand.vmem [shape: f32[1,8], index: 2, kind: input, shape index: {}]   ;;  %s9421_s3 = inlined_call_operand.hbm [shape: f32[4,136,256], index: 3, kind: input, shape index: {}]   ;;  %s9422_s4 = inlined_call_operand.vmem [shape: f32[4,8,32], index: 4, kind: input, shape index: {}]   ;;  %s9423_s5 = inlined_call_operand.hbm [shape: f32[1,32], index: 5, kind: input, shape index: {}]   ;;  %s9424_s6 = inlined_call_operand.hbm [shape: f32[4,56,136], index: 6, kind: input, shape index: {}]   ;;  %s9425_s7 = inlined_call_operand.vmem [shape: f32[4,32,56], index: 7, kind: input, shape index: {}]   ;;  %s9426_s8 = inlined_call_operand.hbm [shape: f32[4,32,64], index: 8, kind: input, shape index: {}]   ;;  %s9427_s9 = inlined_call_operand.hbm [shape: f32[1,64], index: 9, kind: input, shape index: {}]   ;;  %s9428_s10 = inlined_call_operand.hbm [shape: f32[4,8,32], index: 10, kind: input, shape index: {}]   ;;  %s9429_s11 = inlined_call_operand.vmem [shape: bf16[64,1024], index: 11, kind: input, shape index: {}]   ;;  %s9430_s12 = inlined_call_operand.vmem [shape: f32[1,1024], index: 12, kind: input, shape index: {}]   ;;  %s9431_s13 = inlined_call_operand.hbm [shape: bf16[1024,256], index: 13, kind: input, shape index: {}]   ;;  %s9432_s14 = inlined_call_operand.hbm [shape: f32[1,256], index: 14, kind: input, shape index: {}]   ;;  %s9433_s15 = inlined_call_operand.hbm [shape: bf16[256,128], index: 15, kind: input, shape index: {}]   ;;  %s9434_s16 = inlined_call_operand.hbm [shape: f32[1,128], index: 16, kind: input, shape index: {}]   ;;  %s9435_s17 = inlined_call_operand.vmem [shape: bf16[128,10], index: 17, kind: input, shape index: {}]   ;;  %s9436_s18 = inlined_call_operand.hbm [shape: f32[1,10], index: 18, kind: input, shape index: {}]   ;;  %s9437_s19 = inlined_call_operand.vmem [shape: f32[8,10], index: 19, kind: output, shape index: {}]  }
   0x1   :  { %9441 = sst [smem:[#allocation25_spill]] %s9418_s0 }
   0x2   :  { %9442 = sst [smem:[#allocation26_spill]] %s9419_s1 }
   0x3   :  { %9443 = sst [smem:[#allocation27_spill]] %s9420_s2 }
   0x4   :  { %9444 = sst [smem:[#allocation28_spill]] %s9421_s3 }
   0x5   :  { %24 = vsyncpa [#allocation3], 0 }
   0x6   :  { %25 = vsyncpa [#allocation5], 0 }
   0x7   :  { %26 = vsyncpa [#allocation8], 0 }
   0x8   :  { %27 = vsyncpa [#allocation11], 0 }
   0x9   :  { %28 = vsyncpa [#allocation14], 0 }
   0xa   :  { %29 = vsyncpa [#allocation17], 0  ;;  %s7841_s0 = smov [#allocation4]   ;;  %s7842_s20 = smov [#allocation7]  }
   0xb   :  { %s56_s30 = sshll.u32 %s7841_s0, 4  ;;  %s79_s21 = sshll.u32 %s7842_s20, 4  ;;  %s57_s30 = int_to_ptr.vmem [resolvable:$true] %s56_s30  ;;  %s7964_s21 = int_to_ptr.vmem [resolvable:$true] %s79_s21 }
   0xc   :  { %s7587_s2 = scalar_lea.hbm %s9423_s5, 16 }
   0xd   :  { %p7588_p0 = scmp.ne.s32.totalorder %s9423_s5, %s7587_s2  ;;  %p7591_p1 = scmp.lt.u32.totalorder %s7587_s2, %s9423_s5 }
   0xf   :  { %p7593_p2 = pnand %p7591_p1, %p7588_p0 }
  0x11   :  { %7596 = shalt.err (!%p7593_p2)
}
  0x12   :  { %s7597_s26 = scalar_lea.vmem %s57_s30, 16  ;;  %s7601_s27 = scalar_lea.vmem %s57_s30, 32 }
  0x13   :  { %p7598_p3 = scmp.ne.s32.totalorder %s57_s30, %s7597_s26  ;;  %p7602_p4 = scmp.lt.s32.totalorder %s57_s30, %s57_s30 }
  0x14   :  { %p7603_p5 = scmp.lt.s32.totalorder %s7601_s27, %s7597_s26 }
  0x16   :  { %p7604_p6 = por %p7603_p5, %p7602_p4 }
  0x18   :  { %p7605_p7 = pnand %p7604_p6, %p7598_p3 }
  0x1a   :  { %7608 = shalt.err (!%p7605_p7)
}
  0x1b   :  { %59 = dma.hbm_to_vmem [thread:$0]  %s9423_s5, 16, %s57_s30, [#allocation5]  }
  0x1c   :  { %s7609_s1 = scalar_lea.hbm %s9426_s8, 2048 }
  0x1d   :  { %p7610_p8 = scmp.ne.s32.totalorder %s9426_s8, %s7609_s1  ;;  %p7613_p9 = scmp.lt.u32.totalorder %s7609_s1, %s9426_s8 }
  0x1f   :  { %p7615_p10 = pnand %p7613_p9, %p7610_p8 }
  0x21   :  { %7618 = shalt.err (!%p7615_p10)
}
  0x22   :  { %s7619_s25 = scalar_lea.vmem %s7964_s21, 2048  ;;  %p7624_p12 = scmp.lt.s32.totalorder %s7964_s21, %s7964_s21 }
  0x23   :  { %p7620_p11 = scmp.ne.s32.totalorder %s7964_s21, %s7619_s25  ;;  %p7625_p13 = scmp.lt.s32.totalorder %s7619_s25, %s7619_s25 }
  0x25   :  { %p7626_p0 = por %p7625_p13, %p7624_p12 }
  0x27   :  { %p7627_p1 = pnand %p7626_p0, %p7620_p11 }
  0x29   :  { %7630 = shalt.err (!%p7627_p1)
}
  0x2a   :  { %s7843_s5 = smov 128   ;;  %s7844_s30 = smov 8  }
  0x2b   :  { %85 = dma.hbm_to_vmem [thread:$0]  %s9426_s8, 2048, %s7964_s21, [#allocation8], %s7843_s5, %s7843_s5, %s7844_s30  }
  0x2c   :  { %s7845_s27 = smov [#allocation10]   ;;  %s7846_s29 = smov [#allocation13]  }
  0x2d   :  { %s101_s28 = sshll.u32 %s7845_s27, 4  ;;  %s130_s0 = sshll.u32 %s7846_s29, 4  ;;  %s102_s28 = int_to_ptr.vmem [resolvable:$true] %s101_s28  ;;  %s131_s0 = int_to_ptr.vmem [resolvable:$true] %s130_s0 }
  0x2e   :  { %s7631_s22 = scalar_lea.hbm %s9428_s10, 512 }
  0x2f   :  { %p7632_p2 = scmp.ne.s32.totalorder %s9428_s10, %s7631_s22  ;;  %p7635_p3 = scmp.lt.u32.totalorder %s7631_s22, %s9428_s10 }
  0x31   :  { %p7637_p4 = pnand %p7635_p3, %p7632_p2 }
  0x33   :  { %7640 = shalt.err (!%p7637_p4)
}
  0x34   :  { %s7641_s8 = scalar_lea.vmem %s102_s28, 512  ;;  %p7646_p6 = scmp.lt.s32.totalorder %s102_s28, %s102_s28 }
  0x35   :  { %p7642_p5 = scmp.ne.s32.totalorder %s102_s28, %s7641_s8  ;;  %p7647_p7 = scmp.lt.s32.totalorder %s7641_s8, %s7641_s8 }
  0x37   :  { %p7648_p8 = por %p7647_p7, %p7646_p6 }
  0x39   :  { %p7649_p9 = pnand %p7648_p8, %p7642_p5 }
  0x3b   :  { %7652 = shalt.err (!%p7649_p9)
}
  0x3c   :  { %107 = dma.hbm_to_vmem [thread:$0]  %s9428_s10, 512, %s102_s28, [#allocation11], %s7843_s5, %s7843_s5, %s7844_s30  }
  0x3d   :  { %s7653_s29 = scalar_lea.hbm %s9432_s14, 32 }
  0x3e   :  { %p7654_p10 = scmp.ne.s32.totalorder %s9432_s14, %s7653_s29  ;;  %p7657_p11 = scmp.lt.u32.totalorder %s7653_s29, %s9432_s14 }
  0x40   :  { %p7659_p12 = pnand %p7657_p11, %p7654_p10 }
  0x42   :  { %7662 = shalt.err (!%p7659_p12)
}
  0x43   :  { %s7663_s23 = scalar_lea.vmem %s131_s0, 32  ;;  %p7668_p0 = scmp.lt.s32.totalorder %s131_s0, %s131_s0 }
  0x44   :  { %p7664_p13 = scmp.ne.s32.totalorder %s131_s0, %s7663_s23  ;;  %p7669_p1 = scmp.lt.s32.totalorder %s7663_s23, %s7663_s23 }
  0x46   :  { %p7670_p2 = por %p7669_p1, %p7668_p0 }
  0x48   :  { %p7671_p3 = pnand %p7670_p2, %p7664_p13 }
  0x4a   :  { %7674 = shalt.err (!%p7671_p3)
}
  0x4b   :  { %133 = dma.hbm_to_vmem [thread:$0]  %s9432_s14, 32, %s131_s0, [#allocation14]  }
  0x4c   :  { %s7847_s24 = smov [#allocation16]   ;;  %s7848_s8 = smov [#allocation2]  }
  0x4d   :  { %s152_s25 = sshll.u32 %s7847_s24, 4  ;;  %s41_s21 = sshll.u32 %s7848_s8, 4  ;;  %s153_s25 = int_to_ptr.vmem [resolvable:$true] %s152_s25  ;;  %s8025_s21 = int_to_ptr.vmem [resolvable:$true] %s41_s21 }
  0x4e   :  { %s7675_s27 = scalar_lea.hbm %s9434_s16, 16 }
  0x4f   :  { %p7676_p4 = scmp.ne.s32.totalorder %s9434_s16, %s7675_s27  ;;  %p7679_p5 = scmp.lt.u32.totalorder %s7675_s27, %s9434_s16 }
  0x51   :  { %p7681_p6 = pnand %p7679_p5, %p7676_p4 }
  0x53   :  { %7684 = shalt.err (!%p7681_p6)
}
  0x54   :  { %s7685_s14 = scalar_lea.vmem %s153_s25, 16  ;;  %s7689_s0 = scalar_lea.vmem %s153_s25, 32 }
  0x55   :  { %p7686_p7 = scmp.ne.s32.totalorder %s153_s25, %s7685_s14  ;;  %p7690_p8 = scmp.lt.s32.totalorder %s153_s25, %s153_s25 }
  0x56   :  { %p7691_p9 = scmp.lt.s32.totalorder %s7689_s0, %s7685_s14 }
  0x58   :  { %p7692_p10 = por %p7691_p9, %p7690_p8 }
  0x5a   :  { %p7693_p11 = pnand %p7692_p10, %p7686_p7 }
  0x5c   :  { %7696 = shalt.err (!%p7693_p11)
}
  0x5d   :  { %155 = dma.hbm_to_vmem [thread:$0]  %s9434_s16, 16, %s153_s25, [#allocation17]  }
  0x5e   :  { %s9445_s24 = sld [smem:[#allocation28_spill]] }
  0x64   :  { %s7697_s8 = scalar_lea.hbm %s9445_s24, 17408 }
  0x65   :  { %p7698_p12 = scmp.ne.s32.totalorder %s9445_s24, %s7697_s8  ;;  %p7701_p13 = scmp.lt.u32.totalorder %s7697_s8, %s9445_s24 }
  0x67   :  { %p7703_p0 = pnand %p7701_p13, %p7698_p12 }
  0x69   :  { %7706 = shalt.err (!%p7703_p0)
}
  0x6a   :  { %s7707_s20 = scalar_lea.vmem %s8025_s21, 17408  ;;  %p7712_p2 = scmp.lt.s32.totalorder %s8025_s21, %s8025_s21 }
  0x6b   :  { %p7708_p1 = scmp.ne.s32.totalorder %s8025_s21, %s7707_s20  ;;  %p7713_p3 = scmp.lt.s32.totalorder %s7707_s20, %s7707_s20 }
  0x6d   :  { %p7714_p4 = por %p7713_p3, %p7712_p2 }
  0x6f   :  { %p7715_p5 = pnand %p7714_p4, %p7708_p1 }
  0x71   :  { %7718 = shalt.err (!%p7715_p5)
}
  0x72   :  { %s7849_s16 = smov 256   ;;  %s7850_s25 = smov 16  }
  0x73   :  { %47 = dma.hbm_to_vmem [thread:$0]  %s9445_s24, 17408, %s8025_s21, [#allocation3], %s7849_s16, %s7849_s16, %s7850_s25  }
  0x74   :  { %s7851_s14 = smov [#allocation6]   ;;  %s7852_s2 = smov [#allocation9]  }
  0x75   :  { %s65_s0 = sshll.u32 %s7851_s14, 4  ;;  %s92_s23 = sshll.u32 %s7852_s2, 4  ;;  %s66_s0 = int_to_ptr.vmem [resolvable:$true] %s65_s0  ;;  %s93_s23 = int_to_ptr.vmem [resolvable:$true] %s92_s23 }
  0x76   :  { %s7719_s8 = scalar_lea.hbm %s9424_s6, 7168 }
  0x77   :  { %p7720_p6 = scmp.ne.s32.totalorder %s9424_s6, %s7719_s8  ;;  %p7723_p7 = scmp.lt.u32.totalorder %s7719_s8, %s9424_s6 }
  0x79   :  { %p7725_p8 = pnand %p7723_p7, %p7720_p6 }
  0x7b   :  { %7728 = shalt.err (!%p7725_p8)
}
  0x7c   :  { %s7729_s21 = scalar_lea.vmem %s66_s0, 7168  ;;  %p7734_p10 = scmp.lt.s32.totalorder %s66_s0, %s66_s0 }
  0x7d   :  { %p7730_p9 = scmp.ne.s32.totalorder %s66_s0, %s7729_s21  ;;  %p7735_p11 = scmp.lt.s32.totalorder %s7729_s21, %s7729_s21 }
  0x7f   :  { %p7736_p12 = por %p7735_p11, %p7734_p10 }
  0x81   :  { %p7737_p13 = pnand %p7736_p12, %p7730_p9 }
  0x83   :  { %7740 = shalt.err (!%p7737_p13)
}
  0x84   :  { %71 = dma.hbm_to_vmem [thread:$0]  %s9424_s6, 7168, %s66_s0, [#allocation5], %s7849_s16, %s7849_s16, %s7850_s25  }
  0x85   :  { %s7741_s14 = scalar_lea.hbm %s9427_s9, 16 }
  0x86   :  { %p7742_p0 = scmp.ne.s32.totalorder %s9427_s9, %s7741_s14  ;;  %p7745_p1 = scmp.lt.u32.totalorder %s7741_s14, %s9427_s9 }
  0x88   :  { %p7747_p2 = pnand %p7745_p1, %p7742_p0 }
  0x8a   :  { %7750 = shalt.err (!%p7747_p2)
}
  0x8b   :  { %s7751_s3 = scalar_lea.vmem %s93_s23, 16  ;;  %s7755_s26 = scalar_lea.vmem %s93_s23, 32 }
  0x8c   :  { %p7752_p3 = scmp.ne.s32.totalorder %s93_s23, %s7751_s3  ;;  %p7756_p4 = scmp.lt.s32.totalorder %s93_s23, %s93_s23 }
  0x8d   :  { %p7757_p5 = scmp.lt.s32.totalorder %s7755_s26, %s7751_s3 }
  0x8f   :  { %p7758_p6 = por %p7757_p5, %p7756_p4 }
  0x91   :  { %p7759_p7 = pnand %p7758_p6, %p7752_p3 }
  0x93   :  { %7762 = shalt.err (!%p7759_p7)
}
  0x94   :  { %95 = dma.hbm_to_vmem [thread:$0]  %s9427_s9, 16, %s93_s23, [#allocation8]  }
  0x95   :  { %s7853_s25 = smov [#allocation12]   ;;  %s7854_s27 = smov [#allocation15]  }
  0x96   :  { %s117_s0 = sshll.u32 %s7853_s25, 4  ;;  %s139_s29 = sshll.u32 %s7854_s27, 4  ;;  %s118_s0 = int_to_ptr.vmem [resolvable:$true] %s117_s0  ;;  %s8080_s29 = int_to_ptr.vmem [resolvable:$true] %s139_s29 }
  0x97   :  { %s7763_s20 = scalar_lea.hbm %s9431_s13, 16384 }
  0x98   :  { %p7764_p8 = scmp.ne.s32.totalorder %s9431_s13, %s7763_s20  ;;  %p7767_p9 = scmp.lt.u32.totalorder %s7763_s20, %s9431_s13 }
  0x9a   :  { %p7769_p10 = pnand %p7767_p9, %p7764_p8 }
  0x9c   :  { %7772 = shalt.err (!%p7769_p10)
}
  0x9d   :  { %s7773_s9 = scalar_lea.vmem %s118_s0, 16384  ;;  %p7778_p12 = scmp.lt.s32.totalorder %s118_s0, %s118_s0 }
  0x9e   :  { %p7774_p11 = scmp.ne.s32.totalorder %s118_s0, %s7773_s9  ;;  %p7779_p13 = scmp.lt.s32.totalorder %s7773_s9, %s7773_s9 }
  0xa0   :  { %p7780_p0 = por %p7779_p13, %p7778_p12 }
  0xa2   :  { %p7781_p1 = pnand %p7780_p0, %p7774_p11 }
  0xa4   :  { %7784 = shalt.err (!%p7781_p1)
}
  0xa5   :  { %123 = dma.hbm_to_vmem [thread:$0]  %s9431_s13, 16384, %s118_s0, [#allocation11], %s7843_s5, %s7843_s5, %s7844_s30  }
  0xa6   :  { %s7785_s3 = scalar_lea.hbm %s9433_s15, 2048 }
  0xa7   :  { %p7786_p2 = scmp.ne.s32.totalorder %s9433_s15, %s7785_s3  ;;  %p7789_p3 = scmp.lt.u32.totalorder %s7785_s3, %s9433_s15 }
  0xa9   :  { %p7791_p4 = pnand %p7789_p3, %p7786_p2 }
  0xab   :  { %7794 = shalt.err (!%p7791_p4)
}
  0xac   :  { %s7795_s27 = scalar_lea.vmem %s8080_s29, 2048  ;;  %p7800_p6 = scmp.lt.s32.totalorder %s8080_s29, %s8080_s29 }
  0xad   :  { %p7796_p5 = scmp.ne.s32.totalorder %s8080_s29, %s7795_s27  ;;  %p7801_p7 = scmp.lt.s32.totalorder %s7795_s27, %s7795_s27 }
  0xaf   :  { %p7802_p8 = por %p7801_p7, %p7800_p6 }
  0xb1   :  { %p7803_p9 = pnand %p7802_p8, %p7796_p5 }
  0xb3   :  { %7806 = shalt.err (!%p7803_p9)
}
  0xb4   :  { %s7855_s13 = smov 64   ;;  %s7856_s5 = smov 4  }
  0xb5   :  { %145 = dma.hbm_to_vmem [thread:$0]  %s9433_s15, 2048, %s8080_s29, [#allocation14], %s7855_s13, %s7855_s13, %s7856_s5  }
  0xb6   :  { %s7857_s21 = smov [#allocation18]   ;;  %s7807_s22 = scalar_lea.hbm %s9436_s18, 16 }
  0xb7   :  { %s164_s24 = sshll.u32 %s7857_s21, 4  ;;  %p7808_p10 = scmp.ne.s32.totalorder %s9436_s18, %s7807_s22  ;;  %s165_s24 = int_to_ptr.vmem [resolvable:$true] %s164_s24 }
  0xb8   :  { %p7811_p11 = scmp.lt.u32.totalorder %s7807_s22, %s9436_s18 }
  0xba   :  { %p7813_p12 = pnand %p7811_p11, %p7808_p10 }
  0xbc   :  { %7816 = shalt.err (!%p7813_p12)
}
  0xbd   :  { %s7817_s10 = scalar_lea.vmem %s165_s24, 16  ;;  %s7821_s15 = scalar_lea.vmem %s165_s24, 32 }
  0xbe   :  { %p7818_p13 = scmp.ne.s32.totalorder %s165_s24, %s7817_s10  ;;  %p7822_p0 = scmp.lt.s32.totalorder %s165_s24, %s165_s24 }
  0xbf   :  { %p7823_p1 = scmp.lt.s32.totalorder %s7821_s15, %s7817_s10 }
  0xc1   :  { %p7824_p2 = por %p7823_p1, %p7822_p0 }
  0xc3   :  { %p7825_p3 = pnand %p7824_p2, %p7818_p13 }
  0xc5   :  { %7828 = shalt.err (!%p7825_p3)
}
  0xc6   :  { %167 = dma.hbm_to_vmem [thread:$0]  %s9436_s18, 16, %s165_s24, [#allocation17]  }
  0xc7   :  { %7829 = dma.done.wait [#allocation3], 17408  }
  0xc8   :  { %7830 = vsyncadd [#allocation3], 4294949888 }
  0xc9   :  { %7831 = dma.done.wait [#allocation5], 7184  }
  0xca   :  { %7832 = vsyncadd [#allocation5], 4294960112 }
  0xcb   :  { %7833 = dma.done.wait [#allocation8], 2064  }
  0xcc   :  { %7834 = vsyncadd [#allocation8], 4294965232 }
  0xcd   :  { %7835 = dma.done.wait [#allocation11], 16896  }
  0xce   :  { %7836 = vsyncadd [#allocation11], 4294950400 }
  0xcf   :  { %7837 = dma.done.wait [#allocation14], 2080  }
  0xd0   :  { %7838 = vsyncadd [#allocation14], 4294965216 }
  0xd1   :  { %7839 = dma.done.wait [#allocation17], 32  }
  0xd2   :  { %7840 = vsyncadd [#allocation17], 4294967264  ;;  %vm333_vm0 = vcmask 1041408   ;;  %vm236_vm1 = vcmask 80896   ;;  %vm7858_vm2 = vmmov 1   ;;  %s9446_s26 = sld [smem:[#allocation26_spill]] }
  0xd3   :  { %vm6925_vm3 = vmpackc.low %vm333_vm0, %vm7858_vm2  ;;  %s9447_s27 = sld [smem:[#allocation25_spill]]  ;;  %s7859_s15 = smov 120   ;;  %v7860_v37 = vmov 0.0|0.0   ;;  %vm7862_vm4 = vmmov 0   ;;  %vm1197_vm5 = vcmask 64512   ;;  %vm3036_vm6 = vcmask 457728  }
  0xd4   :  { %s9448_s28 = sld [smem:[#allocation27_spill]]  ;;  %vm3245_vm7 = vcmask 261120   ;;  %vm4412_vm8 = vcmask 523264  }
  0xd8   :  { %v234_v0 = vld [vmem:[%s9446_s26] sm:$0xff]  ;;  %v235_v1 = vld [vmem:[%s9446_s26 + $0x8] sm:$0x3] }
  0xd9   :  { %v202_v2 = vld [vmem:[%s9447_s27] sm:$0xff]  ;;  %v6924_v3 = vpack.c.bf16 %v235_v1, %v234_v0  ;;  %v203_v4 = vld [vmem:[%s9447_s27 + $0x8] sm:$0xff]  ;;  %v204_v5 = vld [vmem:[%s9447_s27 + $0x10] sm:$0xff] }
  0xda   :  { %6464 = vmatprep.mubr.msk.f32.mxu1 %vm236_vm1, %v202_v2  ;;  %v205_v6 = vld [vmem:[%s9447_s27 + $0x18] sm:$0xff]  ;;  %v206_v7 = vld [vmem:[%s9447_s27 + $0x20] sm:$0xff]  ;;  %v207_v8 = vld [vmem:[%s9447_s27 + $0x28] sm:$0xff] }
  0xdb   :  { %6926 = vmatprep.subr.msk.bf16.mxu1 %vm6925_vm3, %v6924_v3  ;;  %v208_v9 = vld [vmem:[%s9447_s27 + $0x30] sm:$0xff]  ;;  %v209_v10 = vld [vmem:[%s9447_s27 + $0x38] sm:$0xff]  ;;  %v210_v11 = vld [vmem:[%s9447_s27 + $0x40] sm:$0xff] }
  0xdc   :  { %6929 = vmatpush3.bf16.msk.msra.mxu1 %vm6925_vm3, %v6924_v3  ;;  %v211_v12 = vld [vmem:[%s9447_s27 + $0x48] sm:$0xff]  ;;  %v212_v13 = vld [vmem:[%s9447_s27 + $0x50] sm:$0xff]  ;;  %v213_v14 = vld [vmem:[%s9447_s27 + $0x58] sm:$0xff] }
  0xdd   :  { %v214_v15 = vld [vmem:[%s9447_s27 + $0x60] sm:$0xff]  ;;  %v215_v16 = vld [vmem:[%s9447_s27 + $0x68] sm:$0xff]  ;;  %v216_v17 = vld [vmem:[%s9447_s27 + $0x70] sm:$0xff]  ;;  %6930 = vmatprep.subr.bf16.mxu1 %v7860_v37 }
  0xde   :  { %v217_v18 = vld [vmem:[%s9447_s27 + $0x78] sm:$0xff]  ;;  %v218_v19 = vld [vmem:[%s9447_s27 + $0x80] sm:$0xff]  ;;  %v219_v20 = vld [vmem:[%s9447_s27 + $0x88] sm:$0xff] }
  0xdf   :  { %6465 = vmatmul.mubr.msk.f32.vlgmr.msra.gmra.mrb[0].mxu1 %vm236_vm1, %v203_v4  ;;  %v220_v21 = vld [vmem:[%s9447_s27 + $0x90] sm:$0xff]  ;;  %v221_v22 = vld [vmem:[%s9447_s27 + $0x98] sm:$0xff]  ;;  %v222_v23 = vld [vmem:[%s9447_s27 + $0xa0] sm:$0xff] }
  0xe0   :  { %6467 = vmatprep.mubr.msk.f32.mxu1 %vm236_vm1, %v204_v5  ;;  %v223_v24 = vld [vmem:[%s9447_s27 + $0xa8] sm:$0xff]  ;;  %v224_v25 = vld [vmem:[%s9447_s27 + $0xb0] sm:$0xff]  ;;  %v225_v26 = vld [vmem:[%s9447_s27 + $0xb8] sm:$0xff] }
  0xe1   :  { %v226_v27 = vld [vmem:[%s9447_s27 + $0xc0] sm:$0xff]  ;;  %v227_v28 = vld [vmem:[%s9447_s27 + $0xc8] sm:$0xff]  ;;  %v228_v29 = vld [vmem:[%s9447_s27 + $0xd0] sm:$0xff] }
  0xe2   :  { %v229_v30 = vld [vmem:[%s9447_s27 + $0xd8] sm:$0xff]  ;;  %v230_v31 = vld [vmem:[%s9447_s27 + $0xe0] sm:$0xff]  ;;  %v231_v32 = vld [vmem:[%s9447_s27 + $0xe8] sm:$0xff] }
  0xe3   :  { %6468 = vmatmul.mubr.msk.f32.gmra.mrb[2].mxu1 %vm236_vm1, %v205_v6  ;;  %v232_v33 = vld [vmem:[%s9447_s27 + $0xf0] sm:$0xff]  ;;  %v233_v34 = vld [vmem:[%s9447_s27 + $0xf8] sm:$0xff]  ;;  %v826_v4 = vld [vmem:[#allocation2 + $0x8] sm:$0xff] }
  0xe4   :  { %6470 = vmatprep.mubr.msk.f32.mxu1 %vm236_vm1, %v206_v7  ;;  %v8392_v5 = vld [vmem:[%s9448_s28] ss:$0 sm:$0xff] }
  0xe7   :  { %6471 = vmatmul.mubr.msk.f32.gmra.mrb[4].mxu1 %vm236_vm1, %v207_v8 }
  0xe8   :  { %6473 = vmatprep.mubr.msk.f32.mxu1 %vm236_vm1, %v208_v9 }
  0xeb   :  { %6474 = vmatmul.mubr.msk.f32.gmra.mrb[6].mxu1 %vm236_vm1, %v209_v10 }
  0xec   :  { %6476 = vmatprep.mubr.msk.f32.mxu1 %vm236_vm1, %v210_v11 }
  0xef   :  { %6477 = vmatmul.mubr.msk.f32.gmra.mrb[8].mxu1 %vm236_vm1, %v211_v12 }
  0xf0   :  { %6479 = vmatprep.mubr.msk.f32.mxu1 %vm236_vm1, %v212_v13 }
  0xf3   :  { %6480 = vmatmul.mubr.msk.f32.gmra.mrb[10].mxu1 %vm236_vm1, %v213_v14 }
  0xf4   :  { %6482 = vmatprep.mubr.msk.f32.mxu1 %vm236_vm1, %v214_v15 }
  0xf7   :  { %6483 = vmatmul.mubr.msk.f32.gmra.mrb[12].mxu1 %vm236_vm1, %v215_v16 }
  0xf8   :  { %6485 = vmatprep.mubr.msk.f32.mxu1 %vm236_vm1, %v216_v17 }
  0xfb   :  { %6486 = vmatmul.mubr.msk.f32.gmra.mrb[14].mxu1 %vm236_vm1, %v217_v18 }
  0xfc   :  { %6488 = vmatprep.mubr.msk.f32.mxu1 %vm236_vm1, %v218_v19 }
  0xff   :  { %6489 = vmatmul.mubr.msk.f32.gmra.mrb[16].mxu1 %vm236_vm1, %v219_v20 }
 0x100   :  { %6491 = vmatprep.mubr.msk.f32.mxu1 %vm236_vm1, %v220_v21 }
 0x103   :  { %6492 = vmatmul.mubr.msk.f32.gmra.mrb[18].mxu1 %vm236_vm1, %v221_v22 }
 0x104   :  { %6494 = vmatprep.mubr.msk.f32.mxu1 %vm236_vm1, %v222_v23 }
 0x107   :  { %6495 = vmatmul.mubr.msk.f32.gmra.mrb[20].mxu1 %vm236_vm1, %v223_v24 }
 0x108   :  { %6497 = vmatprep.mubr.msk.f32.mxu1 %vm236_vm1, %v224_v25 }
 0x10b   :  { %6498 = vmatmul.mubr.msk.f32.gmra.mrb[22].mxu1 %vm236_vm1, %v225_v26 }
 0x10c   :  { %6500 = vmatprep.mubr.msk.f32.mxu1 %vm236_vm1, %v226_v27 }
 0x10f   :  { %6501 = vmatmul.mubr.msk.f32.gmra.mrb[24].mxu1 %vm236_vm1, %v227_v28 }
 0x110   :  { %6503 = vmatprep.mubr.msk.f32.mxu1 %vm236_vm1, %v228_v29 }
 0x113   :  { %6504 = vmatmul.mubr.msk.f32.gmra.mrb[26].mxu1 %vm236_vm1, %v229_v30 }
 0x114   :  { %6506 = vmatprep.mubr.msk.f32.mxu1 %vm236_vm1, %v230_v31 }
 0x117   :  { %6507 = vmatmul.mubr.msk.f32.gmra.mrb[28].mxu1 %vm236_vm1, %v231_v32 }
 0x118   :  { %6509 = vmatprep.mubr.msk.f32.mxu1 %vm236_vm1, %v232_v33 }
 0x11b   :  { %6510 = vmatmul.mubr.msk.f32.gmra.mrb[30].mxu1 %vm236_vm1, %v233_v34 }
 0x11c   :  { %923 = vmatprep.mubr.f32.mxu1 %v826_v4 }
 0x1b2   :  { %v8260_v35 = vpop.f32.mrb[0].mxu1 }
 0x1b3   :  { %v8262_v36 = vpop.f32.mrb[1].mxu1 }
 0x1b4   :  { %594 = vrot.lane.b32.xlu0 %v8262_v36, %s7859_s15 }
 0x1b6   :  { %v8267_v38 = vpop.f32.mrb[2].mxu1 }
 0x1b7   :  { %600 = vrot.lane.b32.xlu1 %v8267_v38, %s7859_s15  ;;  %v8271_v39 = vpop.f32.mrb[3].mxu1 }
 0x1b8   :  { %596 = vrot.lane.b32.xlu0 %v8260_v35, %s7859_s15 }
 0x1ba   :  { %v8275_v40 = vpop.f32.mrb[4].mxu1 }
 0x1bb   :  { %598 = vrot.lane.b32.xlu1 %v8271_v39, %s7859_s15  ;;  %v8279_v41 = vpop.f32.mrb[5].mxu1 }
 0x1bc   :  { %602 = vrot.lane.b32.xlu0 %v8279_v41, %s7859_s15 }
 0x1be   :  { %v8283_v42 = vpop.f32.mrb[6].mxu1 }
 0x1bf   :  { %604 = vrot.lane.b32.xlu1 %v8275_v40, %s7859_s15  ;;  %v8287_v43 = vpop.f32.mrb[7].mxu1 }
 0x1c0   :  { %606 = vrot.lane.b32.xlu0 %v8287_v43, %s7859_s15 }
 0x1c2   :  { %v8291_v44 = vpop.f32.mrb[8].mxu1 }
 0x1c3   :  { %608 = vrot.lane.b32.xlu1 %v8283_v42, %s7859_s15  ;;  %v8295_v45 = vpop.f32.mrb[9].mxu1 }
 0x1c4   :  { %610 = vrot.lane.b32.xlu0 %v8295_v45, %s7859_s15 }
 0x1c6   :  { %v8299_v46 = vpop.f32.mrb[10].mxu1 }
 0x1c7   :  { %612 = vrot.lane.b32.xlu1 %v8291_v44, %s7859_s15  ;;  %v8303_v47 = vpop.f32.mrb[11].mxu1 }
 0x1c8   :  { %614 = vrot.lane.b32.xlu0 %v8303_v47, %s7859_s15 }
 0x1ca   :  { %v8307_v48 = vpop.f32.mrb[12].mxu1 }
 0x1cb   :  { %616 = vrot.lane.b32.xlu1 %v8299_v46, %s7859_s15  ;;  %v8311_v49 = vpop.f32.mrb[13].mxu1 }
 0x1cc   :  { %618 = vrot.lane.b32.xlu0 %v8311_v49, %s7859_s15 }
 0x1ce   :  { %v8315_v50 = vpop.f32.mrb[14].mxu1 }
 0x1cf   :  { %620 = vrot.lane.b32.xlu1 %v8307_v48, %s7859_s15  ;;  %v8319_v51 = vpop.f32.mrb[15].mxu1 }
 0x1d0   :  { %622 = vrot.lane.b32.xlu0 %v8319_v51, %s7859_s15 }
 0x1d2   :  { %v8323_v52 = vpop.f32.mrb[16].mxu1 }
 0x1d3   :  { %624 = vrot.lane.b32.xlu1 %v8315_v50, %s7859_s15  ;;  %v8327_v53 = vpop.f32.mrb[17].mxu1 }
 0x1d4   :  { %626 = vrot.lane.b32.xlu0 %v8327_v53, %s7859_s15 }
 0x1d6   :  { %v8331_v54 = vpop.f32.mrb[18].mxu1 }
 0x1d7   :  { %628 = vrot.lane.b32.xlu1 %v8323_v52, %s7859_s15  ;;  %v8335_v55 = vpop.f32.mrb[19].mxu1 }
 0x1d8   :  { %630 = vrot.lane.b32.xlu0 %v8335_v55, %s7859_s15 }
 0x1da   :  { %v8339_v56 = vpop.f32.mrb[20].mxu1 }
 0x1db   :  { %632 = vrot.lane.b32.xlu1 %v8331_v54, %s7859_s15  ;;  %v8343_v57 = vpop.f32.mrb[21].mxu1 }
 0x1dc   :  { %634 = vrot.lane.b32.xlu0 %v8343_v57, %s7859_s15 }
 0x1de   :  { %v8347_v58 = vpop.f32.mrb[22].mxu1 }
 0x1df   :  { %636 = vrot.lane.b32.xlu1 %v8339_v56, %s7859_s15  ;;  %v8351_v59 = vpop.f32.mrb[23].mxu1 }
 0x1e0   :  { %638 = vrot.lane.b32.xlu0 %v8351_v59, %s7859_s15 }
 0x1e2   :  { %v8355_v60 = vpop.f32.mrb[24].mxu1 }
 0x1e3   :  { %640 = vrot.lane.b32.xlu1 %v8347_v58, %s7859_s15  ;;  %v8359_v61 = vpop.f32.mrb[25].mxu1 }
 0x1e4   :  { %642 = vrot.lane.b32.xlu0 %v8359_v61, %s7859_s15 }
 0x1e6   :  { %v8363_v62 = vpop.f32.mrb[26].mxu1 }
 0x1e7   :  { %644 = vrot.lane.b32.xlu1 %v8355_v60, %s7859_s15  ;;  %v8367_v63 = vpop.f32.mrb[27].mxu1 }
 0x1e8   :  { %646 = vrot.lane.b32.xlu0 %v8367_v63, %s7859_s15 }
 0x1ea   :  { %v8371_v0 = vpop.f32.mrb[28].mxu1 }
 0x1eb   :  { %648 = vrot.lane.b32.xlu1 %v8363_v62, %s7859_s15  ;;  %v8375_v1 = vpop.f32.mrb[29].mxu1 }
 0x1ec   :  { %650 = vrot.lane.b32.xlu0 %v8375_v1, %s7859_s15 }
 0x1ee   :  { %v8379_v2 = vpop.f32.mrb[30].mxu1 }
 0x1ef   :  { %652 = vrot.lane.b32.xlu1 %v8371_v0, %s7859_s15  ;;  %v8383_v3 = vpop.f32.mrb[31].mxu1 }
 0x1f0   :  { %654 = vrot.lane.b32.xlu0 %v8383_v3, %s7859_s15 }
 0x1f3   :  { %656 = vrot.lane.b32.xlu1 %v8379_v2, %s7859_s15 }
 0x226   :  { %v595_v6 = vpop.permute.xlu0 %594 }
 0x227   :  { %v690_v7 = vmax.f32 %v8262_v36, %v595_v6 }
 0x229   :  { %v729_v8 = vadd.f32 %v8392_v5, %v690_v7  ;;  %v601_v9 = vpop.permute.xlu1 %600 }
 0x22a   :  { %v693_v10 = vmax.f32 %v8267_v38, %v601_v9  ;;  %v597_v11 = vpop.permute.xlu0 %596 }
 0x22b   :  { %v691_v12 = vmax.f32 %v8260_v35, %v597_v11  ;;  %v761_v14 = vmul.f32 0.01, %v729_v8 }
 0x22c   :  { %v732_v13 = vadd.f32 %v8392_v5, %v693_v10 }
 0x22d   :  { %v730_v15 = vadd.f32 %v8392_v5, %v691_v12  ;;  %v599_v16 = vpop.permute.xlu1 %598  ;;  %v793_v23 = vmax.f32 %v729_v8, %v761_v14 }
 0x22e   :  { %v692_v17 = vmax.f32 %v8271_v39, %v599_v16  ;;  %v603_v18 = vpop.permute.xlu0 %602  ;;  %v764_v21 = vmul.f32 0.01, %v732_v13 }
 0x22f   :  { %v762_v19 = vmul.f32 0.01, %v730_v15  ;;  %v694_v20 = vmax.f32 %v8279_v41, %v603_v18 }
 0x230   :  { %v731_v22 = vadd.f32 %v8392_v5, %v692_v17  ;;  %v796_v32 = vmax.f32 %v732_v13, %v764_v21 }
 0x231   :  { %v794_v24 = vmax.f32 %v730_v15, %v762_v19  ;;  %v733_v25 = vadd.f32 %v8392_v5, %v694_v20  ;;  %v605_v26 = vpop.permute.xlu1 %604 }
 0x232   :  { %v763_v27 = vmul.f32 0.01, %v731_v22  ;;  %v695_v28 = vmax.f32 %v8275_v40, %v605_v26  ;;  %v607_v29 = vpop.permute.xlu0 %606 }
 0x233   :  { %v8405_v30 = vpack.c.bf16 %v794_v24, %v793_v23  ;;  %v696_v31 = vmax.f32 %v8287_v43, %v607_v29  ;;  %v765_v34 = vmul.f32 0.01, %v733_v25 }
 0x234   :  { %v795_v33 = vmax.f32 %v731_v22, %v763_v27  ;;  %v734_v35 = vadd.f32 %v8392_v5, %v695_v28 }
 0x235   :  { %v735_v36 = vadd.f32 %v8392_v5, %v696_v31  ;;  %6932 = vmatpush1.bf16.msra.mxu1 %v8405_v30  ;;  %v609_v38 = vpop.permute.xlu1 %608  ;;  %v797_v6 = vmax.f32 %v733_v25, %v765_v34 }
 0x236   :  { %v8411_v39 = vpack.c.bf16 %v796_v32, %v795_v33  ;;  %v766_v41 = vmul.f32 0.01, %v734_v35  ;;  %v697_v40 = vmax.f32 %v8283_v42, %v609_v38  ;;  %v611_v4 = vpop.permute.xlu0 %610  ;;  %6933 = vmatprep.subr.bf16.mxu1 %v7860_v37 }
 0x237   :  { %v698_v43 = vmax.f32 %v8295_v45, %v611_v4  ;;  %v767_v8 = vmul.f32 0.01, %v735_v36 }
 0x238   :  { %v798_v7 = vmax.f32 %v734_v35, %v766_v41  ;;  %v736_v9 = vadd.f32 %v8392_v5, %v697_v40 }
 0x239   :  { %v737_v10 = vadd.f32 %v8392_v5, %v698_v43  ;;  %6935 = vmatpush1.bf16.msra.mxu1 %v8411_v39  ;;  %v613_v11 = vpop.permute.xlu1 %612  ;;  %v799_v15 = vmax.f32 %v735_v36, %v767_v8 }
 0x23a   :  { %v8419_v12 = vpack.c.bf16 %v798_v7, %v797_v6  ;;  %v768_v13 = vmul.f32 0.01, %v736_v9  ;;  %v699_v42 = vmax.f32 %v8291_v44, %v613_v11  ;;  %v615_v14 = vpop.permute.xlu0 %614  ;;  %6936 = vmatprep.subr.bf16.mxu1 %v7860_v37 }
 0x23b   :  { %v700_v45 = vmax.f32 %v8303_v47, %v615_v14  ;;  %v769_v17 = vmul.f32 0.01, %v737_v10 }
 0x23c   :  { %v800_v16 = vmax.f32 %v736_v9, %v768_v13  ;;  %v738_v18 = vadd.f32 %v8392_v5, %v699_v42 }
 0x23d   :  { %v739_v19 = vadd.f32 %v8392_v5, %v700_v45  ;;  %6938 = vmatpush1.bf16.msra.mxu1 %v8419_v12  ;;  %v617_v20 = vpop.permute.xlu1 %616  ;;  %v801_v24 = vmax.f32 %v737_v10, %v769_v17 }
 0x23e   :  { %v8427_v21 = vpack.c.bf16 %v800_v16, %v799_v15  ;;  %v770_v22 = vmul.f32 0.01, %v738_v18  ;;  %v701_v44 = vmax.f32 %v8299_v46, %v617_v20  ;;  %v619_v23 = vpop.permute.xlu0 %618  ;;  %6939 = vmatprep.subr.bf16.mxu1 %v7860_v37 }
 0x23f   :  { %v702_v47 = vmax.f32 %v8311_v49, %v619_v23  ;;  %v771_v26 = vmul.f32 0.01, %v739_v19 }
 0x240   :  { %v802_v25 = vmax.f32 %v738_v18, %v770_v22  ;;  %v740_v27 = vadd.f32 %v8392_v5, %v701_v44 }
 0x241   :  { %v741_v28 = vadd.f32 %v8392_v5, %v702_v47  ;;  %6941 = vmatpush1.bf16.msra.mxu1 %v8427_v21  ;;  %v621_v29 = vpop.permute.xlu1 %620  ;;  %v803_v34 = vmax.f32 %v739_v19, %v771_v26 }
 0x242   :  { %v8435_v31 = vpack.c.bf16 %v802_v25, %v801_v24  ;;  %v772_v32 = vmul.f32 0.01, %v740_v27  ;;  %v703_v46 = vmax.f32 %v8307_v48, %v621_v29  ;;  %v623_v33 = vpop.permute.xlu0 %622  ;;  %6942 = vmatprep.subr.bf16.mxu1 %v7860_v37 }
 0x243   :  { %v704_v49 = vmax.f32 %v8319_v51, %v623_v33  ;;  %v773_v36 = vmul.f32 0.01, %v741_v28 }
 0x244   :  { %v804_v35 = vmax.f32 %v740_v27, %v772_v32  ;;  %v742_v38 = vadd.f32 %v8392_v5, %v703_v46 }
 0x245   :  { %v743_v41 = vadd.f32 %v8392_v5, %v704_v49  ;;  %6944 = vmatpush1.bf16.msra.mxu1 %v8435_v31  ;;  %v625_v40 = vpop.permute.xlu1 %624  ;;  %v805_v7 = vmax.f32 %v741_v28, %v773_v36 }
 0x246   :  { %v8443_v4 = vpack.c.bf16 %v804_v35, %v803_v34  ;;  %v774_v43 = vmul.f32 0.01, %v742_v38  ;;  %v705_v48 = vmax.f32 %v8315_v50, %v625_v40  ;;  %v627_v6 = vpop.permute.xlu0 %626  ;;  %6945 = vmatprep.subr.bf16.mxu1 %v7860_v37 }
 0x247   :  { %v706_v51 = vmax.f32 %v8327_v53, %v627_v6  ;;  %v775_v9 = vmul.f32 0.01, %v743_v41 }
 0x248   :  { %v806_v8 = vmax.f32 %v742_v38, %v774_v43  ;;  %v744_v10 = vadd.f32 %v8392_v5, %v705_v48 }
 0x249   :  { %v745_v11 = vadd.f32 %v8392_v5, %v706_v51  ;;  %6947 = vmatpush1.bf16.msra.mxu1 %v8443_v4  ;;  %v629_v13 = vpop.permute.xlu1 %628  ;;  %v807_v15 = vmax.f32 %v743_v41, %v775_v9 }
 0x24a   :  { %v8451_v42 = vpack.c.bf16 %v806_v8, %v805_v7  ;;  %v776_v14 = vmul.f32 0.01, %v744_v10  ;;  %v707_v50 = vmax.f32 %v8323_v52, %v629_v13  ;;  %v631_v45 = vpop.permute.xlu0 %630  ;;  %6948 = vmatprep.subr.bf16.mxu1 %v7860_v37 }
 0x24b   :  { %v708_v53 = vmax.f32 %v8335_v55, %v631_v45  ;;  %v777_v17 = vmul.f32 0.01, %v745_v11 }
 0x24c   :  { %v808_v16 = vmax.f32 %v744_v10, %v776_v14  ;;  %v746_v18 = vadd.f32 %v8392_v5, %v707_v50 }
 0x24d   :  { %v747_v19 = vadd.f32 %v8392_v5, %v708_v53  ;;  %6950 = vmatpush1.bf16.msra.mxu1 %v8451_v42  ;;  %v633_v20 = vpop.permute.xlu1 %632  ;;  %v809_v47 = vmax.f32 %v745_v11, %v777_v17 }
 0x24e   :  { %v8459_v22 = vpack.c.bf16 %v808_v16, %v807_v15  ;;  %v778_v44 = vmul.f32 0.01, %v746_v18  ;;  %v709_v52 = vmax.f32 %v8331_v54, %v633_v20  ;;  %v635_v23 = vpop.permute.xlu0 %634  ;;  %6951 = vmatprep.subr.bf16.mxu1 %v7860_v37 }
 0x24f   :  { %v710_v55 = vmax.f32 %v8343_v57, %v635_v23  ;;  %v779_v25 = vmul.f32 0.01, %v747_v19 }
 0x250   :  { %v810_v24 = vmax.f32 %v746_v18, %v778_v44  ;;  %v748_v26 = vadd.f32 %v8392_v5, %v709_v52 }
 0x251   :  { %v749_v27 = vadd.f32 %v8392_v5, %v710_v55  ;;  %6953 = vmatpush1.bf16.msra.mxu1 %v8459_v22  ;;  %v637_v28 = vpop.permute.xlu1 %636  ;;  %v811_v33 = vmax.f32 %v747_v19, %v779_v25 }
 0x252   :  { %v8467_v29 = vpack.c.bf16 %v810_v24, %v809_v47  ;;  %v780_v32 = vmul.f32 0.01, %v748_v26  ;;  %v711_v54 = vmax.f32 %v8339_v56, %v637_v28  ;;  %v639_v46 = vpop.permute.xlu0 %638  ;;  %6954 = vmatprep.subr.bf16.mxu1 %v7860_v37 }
 0x253   :  { %v712_v57 = vmax.f32 %v8351_v59, %v639_v46  ;;  %v781_v34 = vmul.f32 0.01, %v749_v27 }
 0x254   :  { %v812_v49 = vmax.f32 %v748_v26, %v780_v32  ;;  %v750_v35 = vadd.f32 %v8392_v5, %v711_v54 }
 0x255   :  { %v751_v36 = vadd.f32 %v8392_v5, %v712_v57  ;;  %6956 = vmatpush1.bf16.msra.mxu1 %v8467_v29  ;;  %v641_v38 = vpop.permute.xlu1 %640  ;;  %v813_v48 = vmax.f32 %v749_v27, %v781_v34 }
 0x256   :  { %v8475_v41 = vpack.c.bf16 %v812_v49, %v811_v33  ;;  %v782_v40 = vmul.f32 0.01, %v750_v35  ;;  %v713_v56 = vmax.f32 %v8347_v58, %v641_v38  ;;  %v643_v43 = vpop.permute.xlu0 %642  ;;  %6957 = vmatprep.subr.bf16.mxu1 %v7860_v37 }
 0x257   :  { %v714_v59 = vmax.f32 %v8359_v61, %v643_v43  ;;  %v783_v51 = vmul.f32 0.01, %v751_v36 }
 0x258   :  { %v814_v6 = vmax.f32 %v750_v35, %v782_v40  ;;  %v752_v7 = vadd.f32 %v8392_v5, %v713_v56 }
 0x259   :  { %v753_v8 = vadd.f32 %v8392_v5, %v714_v59  ;;  %6959 = vmatpush1.bf16.msra.mxu1 %v8475_v41  ;;  %v645_v9 = vpop.permute.xlu1 %644  ;;  %v815_v14 = vmax.f32 %v751_v36, %v783_v51  ;;  %v829_v51 = vld [vmem:[#allocation2 + $0x20] sm:$0xff] }
 0x25a   :  { %v8483_v10 = vpack.c.bf16 %v814_v6, %v813_v48  ;;  %v784_v11 = vmul.f32 0.01, %v752_v7  ;;  %v715_v58 = vmax.f32 %v8355_v60, %v645_v9  ;;  %v647_v13 = vpop.permute.xlu0 %646  ;;  %6960 = vmatprep.subr.bf16.mxu1 %v7860_v37  ;;  %v827_v48 = vld [vmem:[#allocation2 + $0x10] sm:$0xff]  ;;  %v830_v6 = vld [vmem:[#allocation2 + $0x28] sm:$0xff] }
 0x25b   :  { %v716_v61 = vmax.f32 %v8367_v63, %v647_v13  ;;  %v785_v45 = vmul.f32 0.01, %v753_v8  ;;  %v831_v9 = vld [vmem:[#allocation2 + $0x30] sm:$0xff]  ;;  %v836_v13 = vld [vmem:[#allocation2 + $0x58] sm:$0xff] }
 0x25c   :  { %v816_v50 = vmax.f32 %v752_v7, %v784_v11  ;;  %v754_v53 = vadd.f32 %v8392_v5, %v715_v58  ;;  %v832_v7 = vld [vmem:[#allocation2 + $0x38] sm:$0xff]  ;;  %v834_v11 = vld [vmem:[#allocation2 + $0x48] sm:$0xff]  ;;  %v833_v58 = vld [vmem:[#allocation2 + $0x40] sm:$0xff] }
 0x25d   :  { %v755_v15 = vadd.f32 %v8392_v5, %v716_v61  ;;  %6962 = vmatpush1.bf16.msra.mxu1 %v8483_v10  ;;  %v649_v16 = vpop.permute.xlu1 %648  ;;  %v817_v20 = vmax.f32 %v753_v8, %v785_v45  ;;  %v7861_v8 = vmov 0.0   ;;  %v835_v61 = vld [vmem:[#allocation2 + $0x50] sm:$0xff]  ;;  %v840_v45 = vld [vmem:[#allocation2 + $0x78] sm:$0xff] }
 0x25e   :  { %v8491_v17 = vpack.c.bf16 %v816_v50, %v815_v14  ;;  %v786_v18 = vmul.f32 0.01, %v754_v53  ;;  %v717_v60 = vmax.f32 %v8363_v62, %v649_v16  ;;  %v651_v19 = vpop.permute.xlu0 %650  ;;  %6963 = vmatprep.subr.bf16.mxu1 %v7860_v37  ;;  %6565 = vmatprep.subr.mxu0 %v7861_v8  ;;  %v838_v14 = vld [vmem:[#allocation2 + $0x68] sm:$0xff]  ;;  %v837_v50 = vld [vmem:[#allocation2 + $0x60] sm:$0xff] }
 0x25f   :  { %v718_v63 = vmax.f32 %v8375_v1, %v651_v19  ;;  %v787_v52 = vmul.f32 0.01, %v755_v15  ;;  %v841_v16 = vld [vmem:[#allocation2 + $0x80] sm:$0xff]  ;;  %v846_v19 = vld [vmem:[#allocation2 + $0xa8] sm:$0xff]  ;;  %6567 = vmatprep.mubr.msk.f32.mxu0 %vm7862_vm4, %v7861_v8 }
 0x260   :  { %v818_v44 = vmax.f32 %v754_v53, %v786_v18  ;;  %v756_v23 = vadd.f32 %v8392_v5, %v717_v60  ;;  %v839_v53 = vld [vmem:[#allocation2 + $0x70] sm:$0xff]  ;;  %v844_v18 = vld [vmem:[#allocation2 + $0x98] sm:$0xff] }
 0x261   :  { %v757_v55 = vadd.f32 %v8392_v5, %v718_v63  ;;  %6965 = vmatpush1.bf16.msra.mxu1 %v8491_v17  ;;  %v653_v47 = vpop.permute.xlu1 %652  ;;  %v819_v27 = vmax.f32 %v755_v15, %v787_v52  ;;  %v842_v15 = vld [vmem:[#allocation2 + $0x88] sm:$0xff]  ;;  %v843_v60 = vld [vmem:[#allocation2 + $0x90] sm:$0xff]  ;;  %v845_v63 = vld [vmem:[#allocation2 + $0xa0] sm:$0xff] }
 0x262   :  { %v8499_v24 = vpack.c.bf16 %v818_v44, %v817_v20  ;;  %v788_v25 = vmul.f32 0.01, %v756_v23  ;;  %v719_v62 = vmax.f32 %v8371_v0, %v653_v47  ;;  %v655_v26 = vpop.permute.xlu0 %654  ;;  %6966 = vmatprep.subr.bf16.mxu1 %v7860_v37  ;;  %v848_v20 = vld [vmem:[#allocation2 + $0xb8] sm:$0xff]  ;;  %v847_v44 = vld [vmem:[#allocation2 + $0xb0] sm:$0xff]  ;;  %v850_v52 = vld [vmem:[#allocation2 + $0xc8] sm:$0xff] }
 0x263   :  { %v720_v1 = vmax.f32 %v8383_v3, %v655_v26  ;;  %v789_v32 = vmul.f32 0.01, %v757_v55  ;;  %v851_v47 = vld [vmem:[#allocation2 + $0xd0] sm:$0xff]  ;;  %v856_v26 = vld [vmem:[#allocation2 + $0xf8] sm:$0xff] }
 0x264   :  { %v820_v28 = vmax.f32 %v756_v23, %v788_v25  ;;  %v758_v54 = vadd.f32 %v8392_v5, %v719_v62  ;;  %v849_v23 = vld [vmem:[#allocation2 + $0xc0] sm:$0xff]  ;;  %v854_v25 = vld [vmem:[#allocation2 + $0xe8] sm:$0xff] }
 0x265   :  { %v759_v46 = vadd.f32 %v8392_v5, %v720_v1  ;;  %6968 = vmatpush1.bf16.msra.mxu1 %v8499_v24  ;;  %v657_v57 = vpop.permute.xlu1 %656  ;;  %v821_v34 = vmax.f32 %v757_v55, %v789_v32  ;;  %v852_v55 = vld [vmem:[#allocation2 + $0xd8] sm:$0xff]  ;;  %v853_v62 = vld [vmem:[#allocation2 + $0xe0] sm:$0xff]  ;;  %v855_v1 = vld [vmem:[#allocation2 + $0xf0] sm:$0xff] }
 0x266   :  { %v8507_v33 = vpack.c.bf16 %v820_v28, %v819_v27  ;;  %v790_v49 = vmul.f32 0.01, %v758_v54  ;;  %v721_v0 = vmax.f32 %v8379_v2, %v657_v57  ;;  %6969 = vmatprep.subr.bf16.mxu1 %v7860_v37  ;;  %v825_v2 = vld [vmem:[#allocation2] sm:$0xff]  ;;  %v858_v27 = vld [vmem:[#allocation2 + $0x108] sm:$0xff]  ;;  %v1012_v32 = vld [vmem:[#allocation2 + $0x118] sm:$0xff] }
 0x267   :  { %v791_v3 = vmul.f32 0.01, %v759_v46  ;;  %v857_v28 = vld [vmem:[#allocation2 + $0x100] sm:$0xff] }
 0x268   :  { %v822_v35 = vmax.f32 %v758_v54, %v790_v49  ;;  %v760_v36 = vadd.f32 %v8392_v5, %v721_v0  ;;  %v828_v5 = vld [vmem:[#allocation2 + $0x18] sm:$0xff]  ;;  %v1011_v54 = vld [vmem:[#allocation2 + $0x110] sm:$0xff]  ;;  %v1013_v57 = vld [vmem:[#allocation2 + $0x120] sm:$0xff] }
 0x269   :  { %6971 = vmatpush1.bf16.msra.mxu1 %v8507_v33  ;;  %v823_v56 = vmax.f32 %v759_v46, %v791_v3  ;;  %v1014_v46 = vld [vmem:[#allocation2 + $0x128] sm:$0xff]  ;;  %v1016_v49 = vld [vmem:[#allocation2 + $0x138] sm:$0xff]  ;;  %v1015_v0 = vld [vmem:[#allocation2 + $0x130] sm:$0xff] }
 0x26a   :  { %v8513_v38 = vpack.c.bf16 %v822_v35, %v821_v34  ;;  %v792_v40 = vmul.f32 0.01, %v760_v36  ;;  %6972 = vmatprep.subr.bf16.mxu1 %v7860_v37  ;;  %v1018_v34 = vld [vmem:[#allocation2 + $0x148] sm:$0xff]  ;;  %v1017_v35 = vld [vmem:[#allocation2 + $0x140] sm:$0xff]  ;;  %v1020_v3 = vld [vmem:[#allocation2 + $0x158] sm:$0xff] }
 0x26c   :  { %v824_v43 = vmax.f32 %v760_v36, %v792_v40  ;;  %v1019_v36 = vld [vmem:[#allocation2 + $0x150] sm:$0xff]  ;;  %v1022_v40 = vld [vmem:[#allocation2 + $0x168] sm:$0xff] }
 0x26d   :  { %6974 = vmatpush1.bf16.msra.mxu1 %v8513_v38 }
 0x26e   :  { %v8517_v59 = vpack.c.bf16 %v824_v43, %v823_v56  ;;  %6975 = vmatprep.subr.bf16.mxu1 %v7860_v37  ;;  %v1009_v56 = vld [vmem:[%s9422_s4] sm:$0xff] }
 0x26f   :  { %6566 = vmatpush3.msra.mxu0 %v1009_v56  ;;  %v1021_v43 = vld [vmem:[#allocation2 + $0x160] sm:$0xff] }
 0x270   :  { %6618 = vmatprep.subr.mxu0 %v7861_v8 }
 0x271   :  { %6977 = vmatpush1.bf16.msra.mxu1 %v8517_v59 }
 0x272   :  { %6978 = vmatprep.subr.bf16.mxu1 %v7860_v37 }
 0x274   :  { %924 = vmatmul.mubr.f32.vlgmr.msra.gmra.mrb[32].mxu1 %v825_v2  ;;  %v1024_v2 = vld [vmem:[#allocation2 + $0x178] sm:$0xff] }
 0x275   :  { %6980 = vmatpush1.bf16.msra.mxu1 %v8405_v30  ;;  %928 = vmatprep.mubr.f32.mxu1 %v828_v5  ;;  %v1023_v5 = vld [vmem:[#allocation2 + $0x170] sm:$0xff] }
 0x276   :  { %6981 = vmatprep.subr.bf16.mxu1 %v7860_v37 }
 0x278   :  { %929 = vmatmul.mubr.f32.gmra.mrb[34].mxu1 %v827_v48  ;;  %v1026_v48 = vld [vmem:[#allocation2 + $0x188] sm:$0xff] }
 0x279   :  { %6983 = vmatpush1.bf16.msra.mxu1 %v8411_v39  ;;  %933 = vmatprep.mubr.f32.mxu1 %v830_v6  ;;  %v5888_v6 = vld [vmem:[%s9422_s4 + $0x8] sm:$0xff] }
 0x27a   :  { %6984 = vmatprep.subr.bf16.mxu1 %v7860_v37 }
 0x27c   :  { %934 = vmatmul.mubr.f32.gmra.mrb[36].mxu1 %v829_v51  ;;  %v1025_v51 = vld [vmem:[#allocation2 + $0x180] sm:$0xff] }
 0x27d   :  { %6986 = vmatpush1.bf16.msra.mxu1 %v8419_v12  ;;  %938 = vmatprep.mubr.f32.mxu1 %v832_v7  ;;  %v1028_v7 = vld [vmem:[#allocation2 + $0x198] sm:$0xff] }
 0x27e   :  { %6987 = vmatprep.subr.bf16.mxu1 %v7860_v37 }
 0x280   :  { %939 = vmatmul.mubr.f32.gmra.mrb[38].mxu1 %v831_v9  ;;  %v1027_v9 = vld [vmem:[#allocation2 + $0x190] sm:$0xff] }
 0x281   :  { %6989 = vmatpush1.bf16.msra.mxu1 %v8427_v21  ;;  %943 = vmatprep.mubr.f32.mxu1 %v834_v11  ;;  %v1030_v11 = vld [vmem:[#allocation2 + $0x1a8] sm:$0xff] }
 0x282   :  { %6990 = vmatprep.subr.bf16.mxu1 %v7860_v37 }
 0x284   :  { %944 = vmatmul.mubr.f32.gmra.mrb[40].mxu1 %v833_v58  ;;  %v1029_v58 = vld [vmem:[#allocation2 + $0x1a0] sm:$0xff] }
 0x285   :  { %6992 = vmatpush1.bf16.msra.mxu1 %v8435_v31  ;;  %948 = vmatprep.mubr.f32.mxu1 %v836_v13  ;;  %v1032_v13 = vld [vmem:[#allocation2 + $0x1b8] sm:$0xff] }
 0x286   :  { %6993 = vmatprep.subr.bf16.mxu1 %v7860_v37 }
 0x288   :  { %949 = vmatmul.mubr.f32.gmra.mrb[42].mxu1 %v835_v61  ;;  %v1031_v61 = vld [vmem:[#allocation2 + $0x1b0] sm:$0xff] }
 0x289   :  { %6995 = vmatpush1.bf16.msra.mxu1 %v8443_v4  ;;  %953 = vmatprep.mubr.f32.mxu1 %v838_v14  ;;  %v1034_v14 = vld [vmem:[#allocation2 + $0x1c8] sm:$0xff] }
 0x28a   :  { %6996 = vmatprep.subr.bf16.mxu1 %v7860_v37 }
 0x28c   :  { %954 = vmatmul.mubr.f32.gmra.mrb[44].mxu1 %v837_v50  ;;  %v1033_v50 = vld [vmem:[#allocation2 + $0x1c0] sm:$0xff] }
 0x28d   :  { %6998 = vmatpush1.bf16.msra.mxu1 %v8451_v42  ;;  %958 = vmatprep.mubr.f32.mxu1 %v840_v45  ;;  %v1036_v45 = vld [vmem:[#allocation2 + $0x1d8] sm:$0xff] }
 0x28e   :  { %6999 = vmatprep.subr.bf16.mxu1 %v7860_v37 }
 0x290   :  { %959 = vmatmul.mubr.f32.gmra.mrb[46].mxu1 %v839_v53  ;;  %v1035_v53 = vld [vmem:[#allocation2 + $0x1d0] sm:$0xff] }
 0x291   :  { %7001 = vmatpush1.bf16.msra.mxu1 %v8459_v22  ;;  %963 = vmatprep.mubr.f32.mxu1 %v842_v15  ;;  %v1038_v15 = vld [vmem:[#allocation2 + $0x1e8] sm:$0xff] }
 0x292   :  { %7002 = vmatprep.subr.bf16.mxu1 %v7860_v37 }
 0x294   :  { %964 = vmatmul.mubr.f32.gmra.mrb[48].mxu1 %v841_v16  ;;  %v1037_v16 = vld [vmem:[#allocation2 + $0x1e0] sm:$0xff] }
 0x295   :  { %7004 = vmatpush1.bf16.msra.mxu1 %v8467_v29  ;;  %968 = vmatprep.mubr.f32.mxu1 %v844_v18  ;;  %v1040_v18 = vld [vmem:[#allocation2 + $0x1f8] sm:$0xff] }
 0x296   :  { %7005 = vmatprep.subr.bf16.mxu1 %v7860_v37 }
 0x298   :  { %969 = vmatmul.mubr.f32.gmra.mrb[50].mxu1 %v843_v60  ;;  %v1039_v60 = vld [vmem:[#allocation2 + $0x1f0] sm:$0xff] }
 0x299   :  { %7007 = vmatpush1.bf16.msra.mxu1 %v8475_v41  ;;  %973 = vmatprep.mubr.f32.mxu1 %v846_v19  ;;  %v1042_v19 = vld [vmem:[#allocation2 + $0x208] sm:$0xff] }
 0x29a   :  { %7008 = vmatprep.subr.bf16.mxu1 %v7860_v37 }
 0x29c   :  { %974 = vmatmul.mubr.f32.gmra.mrb[52].mxu1 %v845_v63  ;;  %v1041_v63 = vld [vmem:[#allocation2 + $0x200] sm:$0xff] }
 0x29d   :  { %7010 = vmatpush1.bf16.msra.mxu1 %v8483_v10  ;;  %978 = vmatprep.mubr.f32.mxu1 %v848_v20  ;;  %v1044_v20 = vld [vmem:[#allocation2 + $0x218] sm:$0xff] }
 0x29e   :  { %7011 = vmatprep.subr.bf16.mxu1 %v7860_v37 }
 0x2a0   :  { %979 = vmatmul.mubr.f32.gmra.mrb[54].mxu1 %v847_v44  ;;  %v1043_v44 = vld [vmem:[#allocation2 + $0x210] sm:$0xff] }
 0x2a1   :  { %7013 = vmatpush1.bf16.msra.mxu1 %v8491_v17  ;;  %983 = vmatprep.mubr.f32.mxu1 %v850_v52 }
 0x2a2   :  { %7014 = vmatprep.subr.bf16.mxu1 %v7860_v37 }
 0x2a4   :  { %984 = vmatmul.mubr.f32.gmra.mrb[56].mxu1 %v849_v23 }
 0x2a5   :  { %7016 = vmatpush1.bf16.msra.mxu1 %v8499_v24  ;;  %988 = vmatprep.mubr.f32.mxu1 %v852_v55 }
 0x2a6   :  { %7017 = vmatprep.subr.bf16.mxu1 %v7860_v37 }
 0x2a8   :  { %989 = vmatmul.mubr.f32.gmra.mrb[58].mxu1 %v851_v47 }
 0x2a9   :  { %7019 = vmatpush1.bf16.msra.mxu1 %v8507_v33  ;;  %993 = vmatprep.mubr.f32.mxu1 %v854_v25 }
 0x2aa   :  { %7020 = vmatprep.subr.bf16.mxu1 %v7860_v37 }
 0x2ac   :  { %994 = vmatmul.mubr.f32.gmra.mrb[60].mxu1 %v853_v62 }
 0x2ad   :  { %7022 = vmatpush1.bf16.msra.mxu1 %v8513_v38  ;;  %998 = vmatprep.mubr.f32.mxu1 %v856_v26 }
 0x2ae   :  { %7023 = vmatprep.subr.bf16.mxu1 %v7860_v37 }
 0x2b0   :  { %999 = vmatmul.mubr.f32.gmra.mrb[62].mxu1 %v855_v1 }
 0x2b1   :  { %7025 = vmatpush1.bf16.msra.mxu1 %v8517_v59  ;;  %1003 = vmatprep.mubr.f32.mxu1 %v858_v27 }
 0x2b2   :  { %6512 = vmatprep.subr.mxu1 %v7861_v8 }
 0x2b4   :  { %1004 = vmatmul.mubr.f32.gmra.mrb[64].mxu1 %v857_v28 }
 0x2b5   :  { %1109 = vmatprep.mubr.f32.mxu1 %v1012_v32 }
 0x2b8   :  { %1110 = vmatmul.mubr.f32.vlgmr.msra.gmra.mrb[66].mxu1 %v1011_v54 }
 0x2b9   :  { %1114 = vmatprep.mubr.f32.mxu1 %v1014_v46  ;;  %6513 = vmatpush3.msra.mxu1 %v5888_v6 }
 0x2ba   :  { %7026 = vmatprep.subr.bf16.mxu1 %v7860_v37 }
 0x2bc   :  { %1115 = vmatmul.mubr.f32.gmra.mrb[68].mxu1 %v1013_v57 }
 0x2bd   :  { %1119 = vmatprep.mubr.f32.mxu1 %v1016_v49 }
 0x2c0   :  { %1120 = vmatmul.mubr.f32.gmra.mrb[70].mxu1 %v1015_v0 }
 0x2c1   :  { %1124 = vmatprep.mubr.f32.mxu1 %v1018_v34 }
 0x2c4   :  { %1125 = vmatmul.mubr.f32.gmra.mrb[72].mxu1 %v1017_v35 }
 0x2c5   :  { %1129 = vmatprep.mubr.f32.mxu1 %v1020_v3 }
 0x2c8   :  { %1130 = vmatmul.mubr.f32.gmra.mrb[74].mxu1 %v1019_v36 }
 0x2c9   :  { %1134 = vmatprep.mubr.f32.mxu1 %v1022_v40 }
 0x2cc   :  { %1135 = vmatmul.mubr.f32.gmra.mrb[76].mxu1 %v1021_v43 }
 0x2cd   :  { %1139 = vmatprep.mubr.f32.mxu1 %v1024_v2 }
 0x2d0   :  { %1140 = vmatmul.mubr.f32.gmra.mrb[78].mxu1 %v1023_v5 }
 0x2d1   :  { %1144 = vmatprep.mubr.f32.mxu1 %v1026_v48 }
 0x2d4   :  { %1145 = vmatmul.mubr.f32.gmra.mrb[80].mxu1 %v1025_v51 }
 0x2d5   :  { %1149 = vmatprep.mubr.f32.mxu1 %v1028_v7 }
 0x2d8   :  { %1150 = vmatmul.mubr.f32.gmra.mrb[82].mxu1 %v1027_v9 }
 0x2d9   :  { %1154 = vmatprep.mubr.f32.mxu1 %v1030_v11 }
 0x2dc   :  { %1155 = vmatmul.mubr.f32.gmra.mrb[84].mxu1 %v1029_v58 }
 0x2dd   :  { %1159 = vmatprep.mubr.f32.mxu1 %v1032_v13 }
 0x2e0   :  { %1160 = vmatmul.mubr.f32.gmra.mrb[86].mxu1 %v1031_v61 }
 0x2e1   :  { %1164 = vmatprep.mubr.f32.mxu1 %v1034_v14 }
 0x2e4   :  { %1165 = vmatmul.mubr.f32.gmra.mrb[88].mxu1 %v1033_v50 }
 0x2e5   :  { %1169 = vmatprep.mubr.f32.mxu1 %v1036_v45 }
 0x2e8   :  { %1170 = vmatmul.mubr.f32.gmra.mrb[90].mxu1 %v1035_v53 }
 0x2e9   :  { %1174 = vmatprep.mubr.f32.mxu1 %v1038_v15 }
 0x2ec   :  { %1175 = vmatmul.mubr.f32.gmra.mrb[92].mxu1 %v1037_v16 }
 0x2ed   :  { %1179 = vmatprep.mubr.f32.mxu1 %v1040_v18 }
 0x2f0   :  { %1180 = vmatmul.mubr.f32.gmra.mrb[94].mxu1 %v1039_v60 }
 0x2f1   :  { %1184 = vmatprep.mubr.f32.mxu1 %v1042_v19 }
 0x2f4   :  { %1185 = vmatmul.mubr.f32.gmra.mrb[96].mxu1 %v1041_v63 }
 0x2f5   :  { %1189 = vmatprep.mubr.f32.mxu1 %v1044_v20 }
 0x2f8   :  { %1190 = vmatmul.mubr.f32.gmra.mrb[98].mxu1 %v1043_v44 }
 0x2f9   :  { %6514 = vmatprep.mubr.msk.f32.mxu1 %vm7862_vm4, %v7861_v8 }
 0x347   :  { %v925_v52 = vpop.f32.mrb[32].mxu1 }
 0x348   :  { %v927_v23 = vpop.f32.mrb[33].mxu1  ;;  %6568 = vmatmul.mubr.msk.f32.vlgmr.msra.gmra.mrb[0].mxu0 %vm1197_vm5, %v925_v52 }
 0x349   :  { %6570 = vmatprep.mubr.msk.f32.mxu0 %vm7862_vm4, %v7861_v8 }
 0x34b   :  { %v930_v55 = vpop.f32.mrb[34].mxu1 }
 0x34c   :  { %v932_v47 = vpop.f32.mrb[35].mxu1  ;;  %6571 = vmatmul.mubr.msk.f32.gmra.mrb[2].mxu0 %vm1197_vm5, %v930_v55 }
 0x34d   :  { %6573 = vmatprep.mubr.msk.f32.mxu0 %vm7862_vm4, %v7861_v8 }
 0x34f   :  { %v935_v25 = vpop.f32.mrb[36].mxu1 }
 0x350   :  { %v937_v62 = vpop.f32.mrb[37].mxu1  ;;  %6574 = vmatmul.mubr.msk.f32.gmra.mrb[4].mxu0 %vm1197_vm5, %v935_v25 }
 0x351   :  { %6576 = vmatprep.mubr.msk.f32.mxu0 %vm7862_vm4, %v7861_v8 }
 0x353   :  { %v940_v26 = vpop.f32.mrb[38].mxu1 }
 0x354   :  { %v942_v1 = vpop.f32.mrb[39].mxu1  ;;  %6577 = vmatmul.mubr.msk.f32.gmra.mrb[6].mxu0 %vm1197_vm5, %v940_v26 }
 0x355   :  { %6579 = vmatprep.mubr.msk.f32.mxu0 %vm7862_vm4, %v7861_v8 }
 0x357   :  { %v945_v27 = vpop.f32.mrb[40].mxu1 }
 0x358   :  { %v947_v28 = vpop.f32.mrb[41].mxu1  ;;  %6580 = vmatmul.mubr.msk.f32.gmra.mrb[8].mxu0 %vm1197_vm5, %v945_v27 }
 0x359   :  { %6582 = vmatprep.mubr.msk.f32.mxu0 %vm7862_vm4, %v7861_v8 }
 0x35b   :  { %v950_v32 = vpop.f32.mrb[42].mxu1 }
 0x35c   :  { %v952_v54 = vpop.f32.mrb[43].mxu1  ;;  %6583 = vmatmul.mubr.msk.f32.gmra.mrb[10].mxu0 %vm1197_vm5, %v950_v32 }
 0x35d   :  { %6585 = vmatprep.mubr.msk.f32.mxu0 %vm7862_vm4, %v7861_v8 }
 0x35f   :  { %v955_v46 = vpop.f32.mrb[44].mxu1 }
 0x360   :  { %v957_v57 = vpop.f32.mrb[45].mxu1  ;;  %6586 = vmatmul.mubr.msk.f32.gmra.mrb[12].mxu0 %vm1197_vm5, %v955_v46 }
 0x361   :  { %6588 = vmatprep.mubr.msk.f32.mxu0 %vm7862_vm4, %v7861_v8 }
 0x363   :  { %v960_v49 = vpop.f32.mrb[46].mxu1 }
 0x364   :  { %v962_v0 = vpop.f32.mrb[47].mxu1  ;;  %6589 = vmatmul.mubr.msk.f32.gmra.mrb[14].mxu0 %vm1197_vm5, %v960_v49 }
 0x365   :  { %6591 = vmatprep.mubr.msk.f32.mxu0 %vm7862_vm4, %v7861_v8 }
 0x367   :  { %v965_v34 = vpop.f32.mrb[48].mxu1 }
 0x368   :  { %v967_v35 = vpop.f32.mrb[49].mxu1  ;;  %6592 = vmatmul.mubr.msk.f32.gmra.mrb[16].mxu0 %vm1197_vm5, %v965_v34 }
 0x369   :  { %6594 = vmatprep.mubr.msk.f32.mxu0 %vm7862_vm4, %v7861_v8 }
 0x36b   :  { %v970_v3 = vpop.f32.mrb[50].mxu1 }
 0x36c   :  { %v972_v36 = vpop.f32.mrb[51].mxu1  ;;  %6595 = vmatmul.mubr.msk.f32.gmra.mrb[18].mxu0 %vm1197_vm5, %v970_v3 }
 0x36d   :  { %6597 = vmatprep.mubr.msk.f32.mxu0 %vm7862_vm4, %v7861_v8 }
 0x36f   :  { %v975_v40 = vpop.f32.mrb[52].mxu1 }
 0x370   :  { %v977_v56 = vpop.f32.mrb[53].mxu1  ;;  %6598 = vmatmul.mubr.msk.f32.gmra.mrb[20].mxu0 %vm1197_vm5, %v975_v40  ;;  %v1602_v40 = vld [vmem:[#allocation2 + $0x228] sm:$0xff] }
 0x371   :  { %6600 = vmatprep.mubr.msk.f32.mxu0 %vm7862_vm4, %v7861_v8 }
 0x373   :  { %v980_v43 = vpop.f32.mrb[54].mxu1 }
 0x374   :  { %v982_v2 = vpop.f32.mrb[55].mxu1  ;;  %6601 = vmatmul.mubr.msk.f32.gmra.mrb[22].mxu0 %vm1197_vm5, %v980_v43 }
 0x375   :  { %6603 = vmatprep.mubr.msk.f32.mxu0 %vm7862_vm4, %v7861_v8  ;;  %v1601_v2 = vld [vmem:[#allocation2 + $0x220] sm:$0xff] }
 0x377   :  { %v985_v5 = vpop.f32.mrb[56].mxu1 }
 0x378   :  { %v987_v48 = vpop.f32.mrb[57].mxu1  ;;  %6604 = vmatmul.mubr.msk.f32.gmra.mrb[24].mxu0 %vm1197_vm5, %v985_v5  ;;  %v1604_v5 = vld [vmem:[#allocation2 + $0x238] sm:$0xff] }
 0x379   :  { %6606 = vmatprep.mubr.msk.f32.mxu0 %vm7862_vm4, %v7861_v8  ;;  %v1603_v48 = vld [vmem:[#allocation2 + $0x230] sm:$0xff] }
 0x37b   :  { %v990_v6 = vpop.f32.mrb[58].mxu1 }
 0x37c   :  { %v992_v51 = vpop.f32.mrb[59].mxu1  ;;  %6607 = vmatmul.mubr.msk.f32.gmra.mrb[26].mxu0 %vm1197_vm5, %v990_v6  ;;  %v1606_v6 = vld [vmem:[#allocation2 + $0x248] sm:$0xff] }
 0x37d   :  { %6609 = vmatprep.mubr.msk.f32.mxu0 %vm7862_vm4, %v7861_v8  ;;  %v1605_v51 = vld [vmem:[#allocation2 + $0x240] sm:$0xff] }
 0x37f   :  { %v995_v7 = vpop.f32.mrb[60].mxu1 }
 0x380   :  { %v997_v9 = vpop.f32.mrb[61].mxu1  ;;  %6610 = vmatmul.mubr.msk.f32.gmra.mrb[28].mxu0 %vm1197_vm5, %v995_v7  ;;  %v1608_v7 = vld [vmem:[#allocation2 + $0x258] sm:$0xff] }
 0x381   :  { %6612 = vmatprep.mubr.msk.f32.mxu0 %vm7862_vm4, %v7861_v8  ;;  %v1607_v9 = vld [vmem:[#allocation2 + $0x250] sm:$0xff] }
 0x383   :  { %v1000_v11 = vpop.f32.mrb[62].mxu1 }
 0x384   :  { %v1002_v58 = vpop.f32.mrb[63].mxu1  ;;  %6613 = vmatmul.mubr.msk.f32.gmra.mrb[30].mxu0 %vm1197_vm5, %v1000_v11  ;;  %v1609_v11 = vld [vmem:[#allocation2 + $0x260] sm:$0xff] }
 0x385   :  { %6615 = vmatprep.mubr.msk.f32.mxu0 %vm7862_vm4, %v7861_v8  ;;  %v1611_v58 = vld [vmem:[#allocation2 + $0x270] sm:$0xff] }
 0x387   :  { %v1005_v13 = vpop.f32.mrb[64].mxu1 }
 0x388   :  { %v1007_v61 = vpop.f32.mrb[65].mxu1  ;;  %6616 = vmatmul.mubr.msk.f32.gmra.mrb[32].mxu0 %vm1197_vm5, %v1005_v13  ;;  %v1613_v13 = vld [vmem:[#allocation2 + $0x280] sm:$0xff] }
 0x389   :  { %6620 = vmatprep.mubr.msk.f32.mxu0 %vm7862_vm4, %v7861_v8  ;;  %v5923_v61 = vld [vmem:[%s9422_s4 + $0x10] sm:$0xff] }
 0x38a   :  { %6619 = vmatpush3.msra.mxu0 %v5923_v61  ;;  %v2031_v61 = vld [vmem:[#allocation2 + $0x3f8] sm:$0xff] }
 0x38b   :  { %v1111_v14 = vpop.f32.mrb[66].mxu1  ;;  %6671 = vmatprep.subr.mxu0 %v7861_v8 }
 0x38c   :  { %v1113_v50 = vpop.f32.mrb[67].mxu1  ;;  %6515 = vmatmul.mubr.msk.f32.vlgmr.msra.gmra.mrb[100].mxu1 %vm1197_vm5, %v1111_v14  ;;  %v1618_v14 = vld [vmem:[#allocation2 + $0x2a8] sm:$0xff] }
 0x38d   :  { %7028 = vmatpush1.bf16.msra.mxu1 %v8405_v30  ;;  %6517 = vmatprep.mubr.msk.f32.mxu1 %vm7862_vm4, %v7861_v8  ;;  %v1620_v50 = vld [vmem:[#allocation2 + $0x2b8] sm:$0xff] }
 0x38e   :  { %7029 = vmatprep.subr.bf16.mxu1 %v7860_v37 }
 0x38f   :  { %v1116_v45 = vpop.f32.mrb[68].mxu1 }
 0x390   :  { %v1118_v53 = vpop.f32.mrb[69].mxu1  ;;  %6518 = vmatmul.mubr.msk.f32.gmra.mrb[102].mxu1 %vm1197_vm5, %v1116_v45  ;;  %v1622_v45 = vld [vmem:[#allocation2 + $0x2c8] sm:$0xff] }
 0x391   :  { %7031 = vmatpush1.bf16.msra.mxu1 %v8411_v39  ;;  %6520 = vmatprep.mubr.msk.f32.mxu1 %vm7862_vm4, %v7861_v8  ;;  %v1621_v53 = vld [vmem:[#allocation2 + $0x2c0] sm:$0xff] }
 0x392   :  { %7032 = vmatprep.subr.bf16.mxu1 %v7860_v37 }
 0x393   :  { %v1121_v15 = vpop.f32.mrb[70].mxu1 }
 0x394   :  { %v1123_v16 = vpop.f32.mrb[71].mxu1  ;;  %6521 = vmatmul.mubr.msk.f32.gmra.mrb[104].mxu1 %vm1197_vm5, %v1121_v15  ;;  %v1623_v15 = vld [vmem:[#allocation2 + $0x2d0] sm:$0xff] }
 0x395   :  { %7034 = vmatpush1.bf16.msra.mxu1 %v8419_v12  ;;  %6523 = vmatprep.mubr.msk.f32.mxu1 %vm7862_vm4, %v7861_v8  ;;  %v1625_v16 = vld [vmem:[#allocation2 + $0x2e0] sm:$0xff] }
 0x396   :  { %7035 = vmatprep.subr.bf16.mxu1 %v7860_v37 }
 0x397   :  { %v1126_v18 = vpop.f32.mrb[72].mxu1 }
 0x398   :  { %v1128_v60 = vpop.f32.mrb[73].mxu1  ;;  %6524 = vmatmul.mubr.msk.f32.gmra.mrb[106].mxu1 %vm1197_vm5, %v1126_v18  ;;  %v1627_v18 = vld [vmem:[#allocation2 + $0x2f0] sm:$0xff] }
 0x399   :  { %7037 = vmatpush1.bf16.msra.mxu1 %v8427_v21  ;;  %6526 = vmatprep.mubr.msk.f32.mxu1 %vm7862_vm4, %v7861_v8  ;;  %v1629_v60 = vld [vmem:[#allocation2 + $0x300] sm:$0xff] }
 0x39a   :  { %7038 = vmatprep.subr.bf16.mxu1 %v7860_v37 }
 0x39b   :  { %v1131_v19 = vpop.f32.mrb[74].mxu1 }
 0x39c   :  { %v1133_v63 = vpop.f32.mrb[75].mxu1  ;;  %6527 = vmatmul.mubr.msk.f32.gmra.mrb[108].mxu1 %vm1197_vm5, %v1131_v19  ;;  %v1631_v19 = vld [vmem:[#allocation2 + $0x310] sm:$0xff] }
 0x39d   :  { %7040 = vmatpush1.bf16.msra.mxu1 %v8435_v31  ;;  %6529 = vmatprep.mubr.msk.f32.mxu1 %vm7862_vm4, %v7861_v8  ;;  %v1633_v63 = vld [vmem:[#allocation2 + $0x320] sm:$0xff] }
 0x39e   :  { %7041 = vmatprep.subr.bf16.mxu1 %v7860_v37 }
 0x39f   :  { %v1136_v20 = vpop.f32.mrb[76].mxu1 }
 0x3a0   :  { %v1138_v44 = vpop.f32.mrb[77].mxu1  ;;  %6530 = vmatmul.mubr.msk.f32.gmra.mrb[110].mxu1 %vm1197_vm5, %v1136_v20  ;;  %v2007_v20 = vld [vmem:[#allocation2 + $0x338] sm:$0xff] }
 0x3a1   :  { %7043 = vmatpush1.bf16.msra.mxu1 %v8443_v4  ;;  %6532 = vmatprep.mubr.msk.f32.mxu1 %vm7862_vm4, %v7861_v8  ;;  %v2009_v44 = vld [vmem:[#allocation2 + $0x348] sm:$0xff] }
 0x3a2   :  { %7044 = vmatprep.subr.bf16.mxu1 %v7860_v37 }
 0x3a3   :  { %v1141_v52 = vpop.f32.mrb[78].mxu1 }
 0x3a4   :  { %v1143_v23 = vpop.f32.mrb[79].mxu1  ;;  %6533 = vmatmul.mubr.msk.f32.gmra.mrb[112].mxu1 %vm1197_vm5, %v1141_v52  ;;  %v2011_v52 = vld [vmem:[#allocation2 + $0x358] sm:$0xff] }
 0x3a5   :  { %7046 = vmatpush1.bf16.msra.mxu1 %v8451_v42  ;;  %6535 = vmatprep.mubr.msk.f32.mxu1 %vm7862_vm4, %v7861_v8  ;;  %v2010_v23 = vld [vmem:[#allocation2 + $0x350] sm:$0xff] }
 0x3a6   :  { %7047 = vmatprep.subr.bf16.mxu1 %v7860_v37 }
 0x3a7   :  { %v1146_v55 = vpop.f32.mrb[80].mxu1 }
 0x3a8   :  { %v1148_v47 = vpop.f32.mrb[81].mxu1  ;;  %6536 = vmatmul.mubr.msk.f32.gmra.mrb[114].mxu1 %vm1197_vm5, %v1146_v55  ;;  %v2013_v55 = vld [vmem:[#allocation2 + $0x368] sm:$0xff] }
 0x3a9   :  { %7049 = vmatpush1.bf16.msra.mxu1 %v8459_v22  ;;  %6538 = vmatprep.mubr.msk.f32.mxu1 %vm7862_vm4, %v7861_v8 }
 0x3aa   :  { %7050 = vmatprep.subr.bf16.mxu1 %v7860_v37 }
 0x3ab   :  { %v1151_v25 = vpop.f32.mrb[82].mxu1 }
 0x3ac   :  { %v1153_v62 = vpop.f32.mrb[83].mxu1  ;;  %6539 = vmatmul.mubr.msk.f32.gmra.mrb[116].mxu1 %vm1197_vm5, %v1151_v25  ;;  %v2012_v25 = vld [vmem:[#allocation2 + $0x360] sm:$0xff] }
 0x3ad   :  { %7052 = vmatpush1.bf16.msra.mxu1 %v8467_v29  ;;  %6541 = vmatprep.mubr.msk.f32.mxu1 %vm7862_vm4, %v7861_v8  ;;  %v2015_v62 = vld [vmem:[#allocation2 + $0x378] sm:$0xff] }
 0x3ae   :  { %7053 = vmatprep.subr.bf16.mxu1 %v7860_v37 }
 0x3af   :  { %v1156_v26 = vpop.f32.mrb[84].mxu1 }
 0x3b0   :  { %v1158_v1 = vpop.f32.mrb[85].mxu1  ;;  %6542 = vmatmul.mubr.msk.f32.gmra.mrb[118].mxu1 %vm1197_vm5, %v1156_v26 }
 0x3b1   :  { %7055 = vmatpush1.bf16.msra.mxu1 %v8475_v41  ;;  %6544 = vmatprep.mubr.msk.f32.mxu1 %vm7862_vm4, %v7861_v8 }
 0x3b2   :  { %7056 = vmatprep.subr.bf16.mxu1 %v7860_v37 }
 0x3b3   :  { %v1161_v27 = vpop.f32.mrb[86].mxu1 }
 0x3b4   :  { %v1163_v28 = vpop.f32.mrb[87].mxu1  ;;  %6545 = vmatmul.mubr.msk.f32.gmra.mrb[120].mxu1 %vm1197_vm5, %v1161_v27  ;;  %v2014_v27 = vld [vmem:[#allocation2 + $0x370] sm:$0xff] }
 0x3b5   :  { %7058 = vmatpush1.bf16.msra.mxu1 %v8483_v10  ;;  %6547 = vmatprep.mubr.msk.f32.mxu1 %vm7862_vm4, %v7861_v8  ;;  %v2017_v28 = vld [vmem:[#allocation2 + $0x388] sm:$0xff] }
 0x3b6   :  { %7059 = vmatprep.subr.bf16.mxu1 %v7860_v37 }
 0x3b7   :  { %v1166_v32 = vpop.f32.mrb[88].mxu1 }
 0x3b8   :  { %v1168_v54 = vpop.f32.mrb[89].mxu1  ;;  %6548 = vmatmul.mubr.msk.f32.gmra.mrb[122].mxu1 %vm1197_vm5, %v1166_v32 }
 0x3b9   :  { %7061 = vmatpush1.bf16.msra.mxu1 %v8491_v17  ;;  %6550 = vmatprep.mubr.msk.f32.mxu1 %vm7862_vm4, %v7861_v8 }
 0x3ba   :  { %7062 = vmatprep.subr.bf16.mxu1 %v7860_v37 }
 0x3bb   :  { %v1171_v46 = vpop.f32.mrb[90].mxu1 }
 0x3bc   :  { %v1173_v57 = vpop.f32.mrb[91].mxu1  ;;  %6551 = vmatmul.mubr.msk.f32.gmra.mrb[124].mxu1 %vm1197_vm5, %v1171_v46  ;;  %v2016_v46 = vld [vmem:[#allocation2 + $0x380] sm:$0xff] }
 0x3bd   :  { %7064 = vmatpush1.bf16.msra.mxu1 %v8499_v24  ;;  %6553 = vmatprep.mubr.msk.f32.mxu1 %vm7862_vm4, %v7861_v8  ;;  %v2019_v57 = vld [vmem:[#allocation2 + $0x398] sm:$0xff] }
 0x3be   :  { %7065 = vmatprep.subr.bf16.mxu1 %v7860_v37 }
 0x3bf   :  { %v1176_v49 = vpop.f32.mrb[92].mxu1 }
 0x3c0   :  { %v1178_v0 = vpop.f32.mrb[93].mxu1  ;;  %6554 = vmatmul.mubr.msk.f32.gmra.mrb[126].mxu1 %vm1197_vm5, %v1176_v49 }
 0x3c1   :  { %7067 = vmatpush1.bf16.msra.mxu1 %v8507_v33  ;;  %6556 = vmatprep.mubr.msk.f32.mxu1 %vm7862_vm4, %v7861_v8 }
 0x3c2   :  { %7068 = vmatprep.subr.bf16.mxu1 %v7860_v37 }
 0x3c3   :  { %v1181_v34 = vpop.f32.mrb[94].mxu1 }
 0x3c4   :  { %v1183_v35 = vpop.f32.mrb[95].mxu1  ;;  %6557 = vmatmul.mubr.msk.f32.gmra.mrb[128].mxu1 %vm1197_vm5, %v1181_v34  ;;  %v2018_v34 = vld [vmem:[#allocation2 + $0x390] sm:$0xff] }
 0x3c5   :  { %7070 = vmatpush1.bf16.msra.mxu1 %v8513_v38  ;;  %6559 = vmatprep.mubr.msk.f32.mxu1 %vm7862_vm4, %v7861_v8  ;;  %v2021_v35 = vld [vmem:[#allocation2 + $0x3a8] sm:$0xff] }
 0x3c6   :  { %7071 = vmatprep.subr.bf16.mxu1 %v7860_v37 }
 0x3c7   :  { %v1186_v3 = vpop.f32.mrb[96].mxu1 }
 0x3c8   :  { %v1188_v36 = vpop.f32.mrb[97].mxu1  ;;  %6560 = vmatmul.mubr.msk.f32.gmra.mrb[130].mxu1 %vm1197_vm5, %v1186_v3 }
 0x3c9   :  { %7073 = vmatpush1.bf16.msra.mxu1 %v8517_v59  ;;  %6562 = vmatprep.mubr.msk.f32.mxu1 %vm7862_vm4, %v7861_v8 }
 0x3ca   :  { %7074 = vmatprep.subr.bf16.mxu1 %v7860_v37 }
 0x3cb   :  { %v1191_v56 = vpop.f32.mrb[98].mxu1 }
 0x3cc   :  { %v1193_v43 = vpop.f32.mrb[99].mxu1  ;;  %6563 = vmatmul.mubr.msk.f32.gmra.mrb[132].mxu1 %vm1197_vm5, %v1191_v56  ;;  %v2023_v56 = vld [vmem:[#allocation2 + $0x3b8] sm:$0xff] }
 0x3cd   :  { %1699 = vmatprep.mubr.f32.mxu1 %v1602_v40  ;;  %v2020_v40 = vld [vmem:[#allocation2 + $0x3a0] sm:$0xff] }
 0x3d0   :  { %1700 = vmatmul.mubr.f32.vlgmr.msra.gmra.mrb[134].mxu1 %v1601_v2 }
 0x3d1   :  { %7076 = vmatpush1.bf16.msra.mxu1 %v8405_v30  ;;  %1704 = vmatprep.mubr.f32.mxu1 %v1604_v5  ;;  %v1610_v30 = vld [vmem:[#allocation2 + $0x268] sm:$0xff]  ;;  %v2022_v5 = vld [vmem:[#allocation2 + $0x3b0] sm:$0xff] }
 0x3d2   :  { %7077 = vmatprep.subr.bf16.mxu1 %v7860_v37 }
 0x3d4   :  { %1705 = vmatmul.mubr.f32.gmra.mrb[136].mxu1 %v1603_v48  ;;  %v2025_v48 = vld [vmem:[#allocation2 + $0x3c8] sm:$0xff] }
 0x3d5   :  { %7079 = vmatpush1.bf16.msra.mxu1 %v8411_v39  ;;  %1709 = vmatprep.mubr.f32.mxu1 %v1606_v6  ;;  %v1612_v39 = vld [vmem:[#allocation2 + $0x278] sm:$0xff] }
 0x3d6   :  { %7080 = vmatprep.subr.bf16.mxu1 %v7860_v37 }
 0x3d8   :  { %1710 = vmatmul.mubr.f32.gmra.mrb[138].mxu1 %v1605_v51 }
 0x3d9   :  { %7082 = vmatpush1.bf16.msra.mxu1 %v8419_v12  ;;  %1714 = vmatprep.mubr.f32.mxu1 %v1608_v7  ;;  %v1614_v12 = vld [vmem:[#allocation2 + $0x288] sm:$0xff]  ;;  %v2024_v7 = vld [vmem:[#allocation2 + $0x3c0] sm:$0xff] }
 0x3da   :  { %7083 = vmatprep.subr.bf16.mxu1 %v7860_v37 }
 0x3dc   :  { %1715 = vmatmul.mubr.f32.gmra.mrb[140].mxu1 %v1607_v9  ;;  %v2027_v9 = vld [vmem:[#allocation2 + $0x3d8] sm:$0xff] }
 0x3dd   :  { %7085 = vmatpush1.bf16.msra.mxu1 %v8427_v21  ;;  %1719 = vmatprep.mubr.f32.mxu1 %v1610_v30  ;;  %v1616_v21 = vld [vmem:[#allocation2 + $0x298] sm:$0xff] }
 0x3de   :  { %7086 = vmatprep.subr.bf16.mxu1 %v7860_v37 }
 0x3e0   :  { %1720 = vmatmul.mubr.f32.gmra.mrb[142].mxu1 %v1609_v11 }
 0x3e1   :  { %7088 = vmatpush1.bf16.msra.mxu1 %v8435_v31  ;;  %1724 = vmatprep.mubr.f32.mxu1 %v1612_v39  ;;  %v1615_v31 = vld [vmem:[#allocation2 + $0x290] sm:$0xff] }
 0x3e2   :  { %7089 = vmatprep.subr.bf16.mxu1 %v7860_v37  ;;  %v2026_v39 = vld [vmem:[#allocation2 + $0x3d0] sm:$0xff] }
 0x3e4   :  { %1725 = vmatmul.mubr.f32.gmra.mrb[144].mxu1 %v1611_v58  ;;  %v2029_v58 = vld [vmem:[#allocation2 + $0x3e8] sm:$0xff] }
 0x3e5   :  { %7091 = vmatpush1.bf16.msra.mxu1 %v8443_v4  ;;  %1729 = vmatprep.mubr.f32.mxu1 %v1614_v12  ;;  %v1617_v4 = vld [vmem:[#allocation2 + $0x2a0] sm:$0xff] }
 0x3e6   :  { %7092 = vmatprep.subr.bf16.mxu1 %v7860_v37 }
 0x3e8   :  { %1730 = vmatmul.mubr.f32.gmra.mrb[146].mxu1 %v1613_v13 }
 0x3e9   :  { %7094 = vmatpush1.bf16.msra.mxu1 %v8451_v42  ;;  %1734 = vmatprep.mubr.f32.mxu1 %v1616_v21  ;;  %v1619_v42 = vld [vmem:[#allocation2 + $0x2b0] sm:$0xff]  ;;  %v2028_v21 = vld [vmem:[#allocation2 + $0x3e0] sm:$0xff] }
 0x3ea   :  { %7095 = vmatprep.subr.bf16.mxu1 %v7860_v37 }
 0x3ec   :  { %1735 = vmatmul.mubr.f32.gmra.mrb[148].mxu1 %v1615_v31 }
 0x3ed   :  { %7097 = vmatpush1.bf16.msra.mxu1 %v8459_v22  ;;  %1739 = vmatprep.mubr.f32.mxu1 %v1618_v14  ;;  %v1624_v22 = vld [vmem:[#allocation2 + $0x2d8] sm:$0xff] }
 0x3ee   :  { %7098 = vmatprep.subr.bf16.mxu1 %v7860_v37 }
 0x3f0   :  { %1740 = vmatmul.mubr.f32.gmra.mrb[150].mxu1 %v1617_v4  ;;  %v2030_v4 = vld [vmem:[#allocation2 + $0x3f0] sm:$0xff] }
 0x3f1   :  { %7100 = vmatpush1.bf16.msra.mxu1 %v8467_v29  ;;  %1744 = vmatprep.mubr.f32.mxu1 %v1620_v50  ;;  %v1626_v29 = vld [vmem:[#allocation2 + $0x2e8] sm:$0xff] }
 0x3f2   :  { %7101 = vmatprep.subr.bf16.mxu1 %v7860_v37  ;;  %v2033_v50 = vld [vmem:[#allocation2 + $0x408] sm:$0xff] }
 0x3f4   :  { %1745 = vmatmul.mubr.f32.gmra.mrb[152].mxu1 %v1619_v42 }
 0x3f5   :  { %7103 = vmatpush1.bf16.msra.mxu1 %v8475_v41  ;;  %1749 = vmatprep.mubr.f32.mxu1 %v1622_v45  ;;  %v1628_v41 = vld [vmem:[#allocation2 + $0x2f8] sm:$0xff] }
 0x3f6   :  { %7104 = vmatprep.subr.bf16.mxu1 %v7860_v37 }
 0x3f8   :  { %1750 = vmatmul.mubr.f32.gmra.mrb[154].mxu1 %v1621_v53  ;;  %v2032_v53 = vld [vmem:[#allocation2 + $0x400] sm:$0xff] }
 0x3f9   :  { %7106 = vmatpush1.bf16.msra.mxu1 %v8483_v10  ;;  %1754 = vmatprep.mubr.f32.mxu1 %v1624_v22  ;;  %v1630_v10 = vld [vmem:[#allocation2 + $0x308] sm:$0xff]  ;;  %v2035_v22 = vld [vmem:[#allocation2 + $0x418] sm:$0xff] }
 0x3fa   :  { %7107 = vmatprep.subr.bf16.mxu1 %v7860_v37 }
 0x3fc   :  { %1755 = vmatmul.mubr.f32.gmra.mrb[156].mxu1 %v1623_v15 }
 0x3fd   :  { %7109 = vmatpush1.bf16.msra.mxu1 %v8491_v17  ;;  %1759 = vmatprep.mubr.f32.mxu1 %v1626_v29  ;;  %v1632_v17 = vld [vmem:[#allocation2 + $0x318] sm:$0xff] }
 0x3fe   :  { %7110 = vmatprep.subr.bf16.mxu1 %v7860_v37 }
 0x400   :  { %1760 = vmatmul.mubr.f32.gmra.mrb[158].mxu1 %v1625_v16  ;;  %v2034_v16 = vld [vmem:[#allocation2 + $0x410] sm:$0xff] }
 0x401   :  { %7112 = vmatpush1.bf16.msra.mxu1 %v8499_v24  ;;  %1764 = vmatprep.mubr.f32.mxu1 %v1628_v41  ;;  %v1634_v24 = vld [vmem:[#allocation2 + $0x328] sm:$0xff] }
 0x402   :  { %7113 = vmatprep.subr.bf16.mxu1 %v7860_v37  ;;  %v2037_v41 = vld [vmem:[#allocation2 + $0x428] sm:$0xff] }
 0x404   :  { %1765 = vmatmul.mubr.f32.gmra.mrb[160].mxu1 %v1627_v18 }
 0x405   :  { %7115 = vmatpush1.bf16.msra.mxu1 %v8507_v33  ;;  %1769 = vmatprep.mubr.f32.mxu1 %v1630_v10  ;;  %v2006_v33 = vld [vmem:[#allocation2 + $0x330] sm:$0xff] }
 0x406   :  { %7116 = vmatprep.subr.bf16.mxu1 %v7860_v37 }
 0x408   :  { %1770 = vmatmul.mubr.f32.gmra.mrb[162].mxu1 %v1629_v60  ;;  %v2036_v60 = vld [vmem:[#allocation2 + $0x420] sm:$0xff] }
 0x409   :  { %7118 = vmatpush1.bf16.msra.mxu1 %v8513_v38  ;;  %1774 = vmatprep.mubr.f32.mxu1 %v1632_v17  ;;  %v2008_v38 = vld [vmem:[#allocation2 + $0x340] sm:$0xff]  ;;  %v2039_v17 = vld [vmem:[#allocation2 + $0x438] sm:$0xff] }
 0x40a   :  { %7119 = vmatprep.subr.bf16.mxu1 %v7860_v37 }
 0x40c   :  { %1775 = vmatmul.mubr.f32.gmra.mrb[164].mxu1 %v1631_v19 }
 0x40d   :  { %7121 = vmatpush1.bf16.msra.mxu1 %v8517_v59  ;;  %1779 = vmatprep.mubr.f32.mxu1 %v1634_v24 }
 0x40e   :  { %7122 = vmatprep.subr.bf16.mxu1 %v7860_v37 }
 0x410   :  { %1780 = vmatmul.mubr.f32.gmra.mrb[166].mxu1 %v1633_v63  ;;  %v2038_v63 = vld [vmem:[#allocation2 + $0x430] sm:$0xff] }
 0x411   :  { %2104 = vmatprep.mubr.f32.mxu1 %v2007_v20 }
 0x414   :  { %2105 = vmatmul.mubr.f32.vlgmr.msra.gmra.mrb[168].mxu1 %v2006_v33 }
 0x415   :  { %2109 = vmatprep.mubr.f32.mxu1 %v2009_v44 }
 0x418   :  { %2110 = vmatmul.mubr.f32.gmra.mrb[170].mxu1 %v2008_v38 }
 0x419   :  { %2114 = vmatprep.mubr.f32.mxu1 %v2011_v52 }
 0x41b   :  { %v8735_v47 = vpop.f32.mrb[0].mxu0 }
 0x41c   :  { %v6569_v59 = vpop.f32.mrb[1].mxu0  ;;  %2115 = vmatmul.mubr.f32.gmra.mrb[172].mxu1 %v2010_v23 }
 0x41d   :  { %2119 = vmatprep.mubr.f32.mxu1 %v2013_v55 }
 0x41f   :  { %v8737_v26 = vpop.f32.mrb[2].mxu0 }
 0x420   :  { %v6572_v1 = vpop.f32.mrb[3].mxu0  ;;  %2120 = vmatmul.mubr.f32.gmra.mrb[174].mxu1 %v2012_v25 }
 0x421   :  { %2124 = vmatprep.mubr.f32.mxu1 %v2015_v62 }
 0x423   :  { %v8739_v32 = vpop.f32.mrb[4].mxu0 }
 0x424   :  { %v6575_v54 = vpop.f32.mrb[5].mxu0  ;;  %2125 = vmatmul.mubr.f32.gmra.mrb[176].mxu1 %v2014_v27 }
 0x425   :  { %2129 = vmatprep.mubr.f32.mxu1 %v2017_v28 }
 0x427   :  { %v8741_v49 = vpop.f32.mrb[6].mxu0 }
 0x428   :  { %v6578_v0 = vpop.f32.mrb[7].mxu0  ;;  %2130 = vmatmul.mubr.f32.gmra.mrb[178].mxu1 %v2016_v46 }
 0x429   :  { %2134 = vmatprep.mubr.f32.mxu1 %v2019_v57 }
 0x42b   :  { %v8743_v3 = vpop.f32.mrb[8].mxu0 }
 0x42c   :  { %v6581_v36 = vpop.f32.mrb[9].mxu0  ;;  %2135 = vmatmul.mubr.f32.gmra.mrb[180].mxu1 %v2018_v34 }
 0x42d   :  { %2139 = vmatprep.mubr.f32.mxu1 %v2021_v35 }
 0x42f   :  { %v8745_v43 = vpop.f32.mrb[10].mxu0 }
 0x430   :  { %v6584_v2 = vpop.f32.mrb[11].mxu0  ;;  %2140 = vmatmul.mubr.f32.gmra.mrb[182].mxu1 %v2020_v40 }
 0x431   :  { %2144 = vmatprep.mubr.f32.mxu1 %v2023_v56 }
 0x433   :  { %v8747_v6 = vpop.f32.mrb[12].mxu0 }
 0x434   :  { %v6587_v51 = vpop.f32.mrb[13].mxu0  ;;  %2145 = vmatmul.mubr.f32.gmra.mrb[184].mxu1 %v2022_v5 }
 0x435   :  { %2149 = vmatprep.mubr.f32.mxu1 %v2025_v48 }
 0x437   :  { %v8749_v30 = vpop.f32.mrb[14].mxu0 }
 0x438   :  { %v6590_v11 = vpop.f32.mrb[15].mxu0  ;;  %2150 = vmatmul.mubr.f32.gmra.mrb[186].mxu1 %v2024_v7 }
 0x439   :  { %2154 = vmatprep.mubr.f32.mxu1 %v2027_v9 }
 0x43b   :  { %v8751_v12 = vpop.f32.mrb[16].mxu0 }
 0x43c   :  { %v6593_v13 = vpop.f32.mrb[17].mxu0  ;;  %2155 = vmatmul.mubr.f32.gmra.mrb[188].mxu1 %v2026_v39 }
 0x43d   :  { %2159 = vmatprep.mubr.f32.mxu1 %v2029_v58 }
 0x43f   :  { %v8753_v31 = vpop.f32.mrb[18].mxu0 }
 0x440   :  { %v6596_v14 = vpop.f32.mrb[19].mxu0  ;;  %2160 = vmatmul.mubr.f32.gmra.mrb[190].mxu1 %v2028_v21 }
 0x441   :  { %2164 = vmatprep.mubr.f32.mxu1 %v2031_v61 }
 0x443   :  { %v1566_v42 = vpop.f32.mrb[20].mxu0 }
 0x444   :  { %v6599_v45 = vpop.f32.mrb[21].mxu0  ;;  %2165 = vmatmul.mubr.f32.gmra.mrb[192].mxu1 %v2030_v4 }
 0x445   :  { %2169 = vmatprep.mubr.f32.mxu1 %v2033_v50 }
 0x447   :  { %v1571_v15 = vpop.f32.mrb[22].mxu0 }
 0x448   :  { %v6602_v29 = vpop.f32.mrb[23].mxu0  ;;  %2170 = vmatmul.mubr.f32.gmra.mrb[194].mxu1 %v2032_v53 }
 0x449   :  { %2174 = vmatprep.mubr.f32.mxu1 %v2035_v22 }
 0x44b   :  { %v1576_v18 = vpop.f32.mrb[24].mxu0 }
 0x44c   :  { %v6605_v10 = vpop.f32.mrb[25].mxu0  ;;  %2175 = vmatmul.mubr.f32.gmra.mrb[196].mxu1 %v2034_v16 }
 0x44d   :  { %2179 = vmatprep.mubr.f32.mxu1 %v2037_v41 }
 0x44f   :  { %v1581_v19 = vpop.f32.mrb[26].mxu0 }
 0x450   :  { %v6608_v24 = vpop.f32.mrb[27].mxu0  ;;  %2180 = vmatmul.mubr.f32.gmra.mrb[198].mxu1 %v2036_v60 }
 0x451   :  { %2184 = vmatprep.mubr.f32.mxu1 %v2039_v17 }
 0x453   :  { %v1586_v20 = vpop.f32.mrb[28].mxu0 }
 0x454   :  { %v6611_v33 = vpop.f32.mrb[29].mxu0  ;;  %2185 = vmatmul.mubr.f32.gmra.mrb[200].mxu1 %v2038_v63 }
 0x457   :  { %v1591_v44 = vpop.f32.mrb[30].mxu0 }
 0x458   :  { %v6614_v38 = vpop.f32.mrb[31].mxu0 }
 0x45b   :  { %v1596_v52 = vpop.f32.mrb[32].mxu0 }
 0x45c   :  { %v6617_v23 = vpop.f32.mrb[33].mxu0 }
 0x45f   :  { %v1315_v55 = vpop.f32.mrb[100].mxu1 }
 0x460   :  { %v8756_v59 = vadd.f32 %v8735_v47, %v1315_v55  ;;  %v6516_v25 = vpop.f32.mrb[101].mxu1 }
 0x463   :  { %v1320_v62 = vpop.f32.mrb[102].mxu1 }
 0x464   :  { %v8759_v1 = vadd.f32 %v8737_v26, %v1320_v62  ;;  %v6519_v27 = vpop.f32.mrb[103].mxu1 }
 0x467   :  { %v1325_v28 = vpop.f32.mrb[104].mxu1 }
 0x468   :  { %v8762_v54 = vadd.f32 %v8739_v32, %v1325_v28  ;;  %v6522_v46 = vpop.f32.mrb[105].mxu1 }
 0x46b   :  { %v1330_v57 = vpop.f32.mrb[106].mxu1 }
 0x46c   :  { %v8765_v0 = vadd.f32 %v8741_v49, %v1330_v57  ;;  %v6525_v34 = vpop.f32.mrb[107].mxu1 }
 0x46f   :  { %v1335_v35 = vpop.f32.mrb[108].mxu1 }
 0x470   :  { %v8768_v47 = vadd.f32 %v8743_v3, %v1335_v35  ;;  %v6528_v36 = vpop.f32.mrb[109].mxu1 }
 0x473   :  { %v1340_v40 = vpop.f32.mrb[110].mxu1 }
 0x474   :  { %v8771_v26 = vadd.f32 %v8745_v43, %v1340_v40  ;;  %v6531_v56 = vpop.f32.mrb[111].mxu1 }
 0x477   :  { %v1345_v2 = vpop.f32.mrb[112].mxu1 }
 0x478   :  { %v8774_v32 = vadd.f32 %v8747_v6, %v1345_v2  ;;  %v6534_v5 = vpop.f32.mrb[113].mxu1 }
 0x47b   :  { %v1350_v48 = vpop.f32.mrb[114].mxu1 }
 0x47c   :  { %v8777_v49 = vadd.f32 %v8749_v30, %v1350_v48  ;;  %v6537_v51 = vpop.f32.mrb[115].mxu1 }
 0x47f   :  { %v1355_v7 = vpop.f32.mrb[116].mxu1 }
 0x480   :  { %v8780_v3 = vadd.f32 %v8751_v12, %v1355_v7  ;;  %v6540_v9 = vpop.f32.mrb[117].mxu1 }
 0x483   :  { %v1360_v11 = vpop.f32.mrb[118].mxu1 }
 0x484   :  { %v8783_v43 = vadd.f32 %v8753_v31, %v1360_v11  ;;  %v6543_v39 = vpop.f32.mrb[119].mxu1 }
 0x487   :  { %v1365_v58 = vpop.f32.mrb[120].mxu1 }
 0x488   :  { %v8785_v13 = vadd.f32 %v1566_v42, %v1365_v58  ;;  %v6546_v6 = vpop.f32.mrb[121].mxu1 }
 0x48b   :  { %v1370_v21 = vpop.f32.mrb[122].mxu1 }
 0x48c   :  { %v8787_v61 = vadd.f32 %v1571_v15, %v1370_v21  ;;  %v6549_v30 = vpop.f32.mrb[123].mxu1 }
 0x48f   :  { %v1375_v14 = vpop.f32.mrb[124].mxu1 }
 0x490   :  { %v8789_v4 = vadd.f32 %v1576_v18, %v1375_v14  ;;  %v6552_v50 = vpop.f32.mrb[125].mxu1  ;;  %v5941_v18 = vld [vmem:[%s9422_s4 + $0x18] sm:$0xff] }
 0x493   :  { %v1380_v12 = vpop.f32.mrb[126].mxu1 }
 0x494   :  { %v8791_v45 = vadd.f32 %v1581_v19, %v1380_v12  ;;  %v6555_v53 = vpop.f32.mrb[127].mxu1 }
 0x497   :  { %v1385_v22 = vpop.f32.mrb[128].mxu1 }
 0x498   :  { %v8793_v31 = vadd.f32 %v1586_v20, %v1385_v22  ;;  %v6558_v29 = vpop.f32.mrb[129].mxu1 }
 0x49b   :  { %v1390_v16 = vpop.f32.mrb[130].mxu1 }
 0x49c   :  { %v8795_v42 = vadd.f32 %v1591_v44, %v1390_v16  ;;  %v6561_v41 = vpop.f32.mrb[131].mxu1 }
 0x49f   :  { %v1395_v10 = vpop.f32.mrb[132].mxu1 }
 0x4a0   :  { %v8797_v15 = vadd.f32 %v1596_v52, %v1395_v10  ;;  %v6564_v60 = vpop.f32.mrb[133].mxu1 }
 0x4a3   :  { %v1701_v17 = vpop.f32.mrb[134].mxu1 }
 0x4a4   :  { %v1703_v19 = vpop.f32.mrb[135].mxu1  ;;  %6621 = vmatmul.mubr.msk.f32.vlgmr.msra.gmra.mrb[34].mxu0 %vm1197_vm5, %v1701_v17 }
 0x4a5   :  { %6623 = vmatprep.mubr.msk.f32.mxu0 %vm7862_vm4, %v7861_v8  ;;  %6672 = vmatpush3.msra.mxu0 %v5941_v18 }
 0x4a6   :  { %7146 = vmatprep.subr.bf16.mxu0 %v7860_v37 }
 0x4a7   :  { %v1706_v24 = vpop.f32.mrb[136].mxu1 }
 0x4a8   :  { %v1708_v63 = vpop.f32.mrb[137].mxu1  ;;  %6624 = vmatmul.mubr.msk.f32.gmra.mrb[36].mxu0 %vm1197_vm5, %v1706_v24 }
 0x4a9   :  { %6626 = vmatprep.mubr.msk.f32.mxu0 %vm7862_vm4, %v7861_v8 }
 0x4ab   :  { %v1711_v20 = vpop.f32.mrb[138].mxu1 }
 0x4ac   :  { %v1713_v33 = vpop.f32.mrb[139].mxu1  ;;  %6627 = vmatmul.mubr.msk.f32.gmra.mrb[38].mxu0 %vm1197_vm5, %v1711_v20 }
 0x4ad   :  { %6629 = vmatprep.mubr.msk.f32.mxu0 %vm7862_vm4, %v7861_v8 }
 0x4af   :  { %v1716_v44 = vpop.f32.mrb[140].mxu1 }
 0x4b0   :  { %v1718_v38 = vpop.f32.mrb[141].mxu1  ;;  %6630 = vmatmul.mubr.msk.f32.gmra.mrb[40].mxu0 %vm1197_vm5, %v1716_v44 }
 0x4b1   :  { %6632 = vmatprep.mubr.msk.f32.mxu0 %vm7862_vm4, %v7861_v8 }
 0x4b3   :  { %v1721_v52 = vpop.f32.mrb[142].mxu1 }
 0x4b4   :  { %v1723_v23 = vpop.f32.mrb[143].mxu1  ;;  %6633 = vmatmul.mubr.msk.f32.gmra.mrb[42].mxu0 %vm1197_vm5, %v1721_v52 }
 0x4b5   :  { %6635 = vmatprep.mubr.msk.f32.mxu0 %vm7862_vm4, %v7861_v8 }
 0x4b7   :  { %v1726_v55 = vpop.f32.mrb[144].mxu1 }
 0x4b8   :  { %v1728_v25 = vpop.f32.mrb[145].mxu1  ;;  %6636 = vmatmul.mubr.msk.f32.gmra.mrb[44].mxu0 %vm1197_vm5, %v1726_v55 }
 0x4b9   :  { %6638 = vmatprep.mubr.msk.f32.mxu0 %vm7862_vm4, %v7861_v8 }
 0x4bb   :  { %v1731_v62 = vpop.f32.mrb[146].mxu1 }
 0x4bc   :  { %v1733_v27 = vpop.f32.mrb[147].mxu1  ;;  %6639 = vmatmul.mubr.msk.f32.gmra.mrb[46].mxu0 %vm1197_vm5, %v1731_v62 }
 0x4bd   :  { %6641 = vmatprep.mubr.msk.f32.mxu0 %vm7862_vm4, %v7861_v8 }
 0x4bf   :  { %v1736_v28 = vpop.f32.mrb[148].mxu1 }
 0x4c0   :  { %v1738_v46 = vpop.f32.mrb[149].mxu1  ;;  %6642 = vmatmul.mubr.msk.f32.gmra.mrb[48].mxu0 %vm1197_vm5, %v1736_v28 }
 0x4c1   :  { %6644 = vmatprep.mubr.msk.f32.mxu0 %vm7862_vm4, %v7861_v8 }
 0x4c3   :  { %v1741_v57 = vpop.f32.mrb[150].mxu1 }
 0x4c4   :  { %v1743_v34 = vpop.f32.mrb[151].mxu1  ;;  %6645 = vmatmul.mubr.msk.f32.gmra.mrb[50].mxu0 %vm1197_vm5, %v1741_v57 }
 0x4c5   :  { %6647 = vmatprep.mubr.msk.f32.mxu0 %vm7862_vm4, %v7861_v8 }
 0x4c7   :  { %v1746_v35 = vpop.f32.mrb[152].mxu1 }
 0x4c8   :  { %v1748_v36 = vpop.f32.mrb[153].mxu1  ;;  %6648 = vmatmul.mubr.msk.f32.gmra.mrb[52].mxu0 %vm1197_vm5, %v1746_v35 }
 0x4c9   :  { %6650 = vmatprep.mubr.msk.f32.mxu0 %vm7862_vm4, %v7861_v8 }
 0x4cb   :  { %v1751_v40 = vpop.f32.mrb[154].mxu1 }
 0x4cc   :  { %v1753_v56 = vpop.f32.mrb[155].mxu1  ;;  %6651 = vmatmul.mubr.msk.f32.gmra.mrb[54].mxu0 %vm1197_vm5, %v1751_v40 }
 0x4cd   :  { %6653 = vmatprep.mubr.msk.f32.mxu0 %vm7862_vm4, %v7861_v8 }
 0x4cf   :  { %v1756_v2 = vpop.f32.mrb[156].mxu1 }
 0x4d0   :  { %v1758_v5 = vpop.f32.mrb[157].mxu1  ;;  %6654 = vmatmul.mubr.msk.f32.gmra.mrb[56].mxu0 %vm1197_vm5, %v1756_v2 }
 0x4d1   :  { %6656 = vmatprep.mubr.msk.f32.mxu0 %vm7862_vm4, %v7861_v8 }
 0x4d3   :  { %v1761_v48 = vpop.f32.mrb[158].mxu1 }
 0x4d4   :  { %v1763_v51 = vpop.f32.mrb[159].mxu1  ;;  %6657 = vmatmul.mubr.msk.f32.gmra.mrb[58].mxu0 %vm1197_vm5, %v1761_v48 }
 0x4d5   :  { %6659 = vmatprep.mubr.msk.f32.mxu0 %vm7862_vm4, %v7861_v8 }
 0x4d7   :  { %v1766_v7 = vpop.f32.mrb[160].mxu1 }
 0x4d8   :  { %v1768_v9 = vpop.f32.mrb[161].mxu1  ;;  %6660 = vmatmul.mubr.msk.f32.gmra.mrb[60].mxu0 %vm1197_vm5, %v1766_v7 }
 0x4d9   :  { %6662 = vmatprep.mubr.msk.f32.mxu0 %vm7862_vm4, %v7861_v8 }
 0x4db   :  { %v1771_v11 = vpop.f32.mrb[162].mxu1 }
 0x4dc   :  { %v1773_v39 = vpop.f32.mrb[163].mxu1  ;;  %6663 = vmatmul.mubr.msk.f32.gmra.mrb[62].mxu0 %vm1197_vm5, %v1771_v11 }
 0x4dd   :  { %6665 = vmatprep.mubr.msk.f32.mxu0 %vm7862_vm4, %v7861_v8 }
 0x4df   :  { %v1776_v58 = vpop.f32.mrb[164].mxu1 }
 0x4e0   :  { %v1778_v6 = vpop.f32.mrb[165].mxu1  ;;  %6666 = vmatmul.mubr.msk.f32.gmra.mrb[64].mxu0 %vm1197_vm5, %v1776_v58 }
 0x4e1   :  { %6668 = vmatprep.mubr.msk.f32.mxu0 %vm7862_vm4, %v7861_v8 }
 0x4e3   :  { %v1781_v21 = vpop.f32.mrb[166].mxu1 }
 0x4e4   :  { %v1783_v30 = vpop.f32.mrb[167].mxu1  ;;  %6669 = vmatmul.mubr.msk.f32.gmra.mrb[66].mxu0 %vm1197_vm5, %v1781_v21 }
 0x4e5   :  { %6673 = vmatprep.mubr.msk.f32.mxu0 %vm7862_vm4, %v7861_v8 }
 0x4e7   :  { %v2106_v14 = vpop.f32.mrb[168].mxu1 }
 0x4e8   :  { %v2108_v50 = vpop.f32.mrb[169].mxu1  ;;  %6674 = vmatmul.mubr.msk.f32.vlgmr.msra.gmra.mrb[68].mxu0 %vm1197_vm5, %v2106_v14 }
 0x4e9   :  { %6676 = vmatprep.mubr.msk.f32.mxu0 %vm7862_vm4, %v7861_v8  ;;  %v2469_v50 = vld [vmem:[#allocation6 + $0x8] sm:$0xff] }
 0x4ea   :  { %5960 = vmatprep.mubr.msk.f32.mxu1 %vm1197_vm5, %v2469_v50 }
 0x4eb   :  { %v2111_v12 = vpop.f32.mrb[170].mxu1 }
 0x4ec   :  { %v2113_v53 = vpop.f32.mrb[171].mxu1  ;;  %6677 = vmatmul.mubr.msk.f32.gmra.mrb[70].mxu0 %vm1197_vm5, %v2111_v12 }
 0x4ed   :  { %6679 = vmatprep.mubr.msk.f32.mxu0 %vm7862_vm4, %v7861_v8  ;;  %v2605_v53 = vld [vmem:[#allocation6 + $0x78] sm:$0xff] }
 0x4ef   :  { %v2116_v22 = vpop.f32.mrb[172].mxu1 }
 0x4f0   :  { %v2118_v29 = vpop.f32.mrb[173].mxu1  ;;  %6680 = vmatmul.mubr.msk.f32.gmra.mrb[72].mxu0 %vm1197_vm5, %v2116_v22 }
 0x4f1   :  { %6682 = vmatprep.mubr.msk.f32.mxu0 %vm7862_vm4, %v7861_v8 }
 0x4f3   :  { %v2121_v16 = vpop.f32.mrb[174].mxu1 }
 0x4f4   :  { %v2123_v41 = vpop.f32.mrb[175].mxu1  ;;  %6683 = vmatmul.mubr.msk.f32.gmra.mrb[74].mxu0 %vm1197_vm5, %v2121_v16 }
 0x4f5   :  { %6685 = vmatprep.mubr.msk.f32.mxu0 %vm7862_vm4, %v7861_v8 }
 0x4f7   :  { %v2126_v10 = vpop.f32.mrb[176].mxu1 }
 0x4f8   :  { %v2128_v60 = vpop.f32.mrb[177].mxu1  ;;  %6686 = vmatmul.mubr.msk.f32.gmra.mrb[76].mxu0 %vm1197_vm5, %v2126_v10 }
 0x4f9   :  { %6688 = vmatprep.mubr.msk.f32.mxu0 %vm7862_vm4, %v7861_v8 }
 0x4fb   :  { %v2131_v18 = vpop.f32.mrb[178].mxu1 }
 0x4fc   :  { %v2133_v17 = vpop.f32.mrb[179].mxu1  ;;  %6689 = vmatmul.mubr.msk.f32.gmra.mrb[78].mxu0 %vm1197_vm5, %v2131_v18 }
 0x4fd   :  { %6691 = vmatprep.mubr.msk.f32.mxu0 %vm7862_vm4, %v7861_v8 }
 0x4ff   :  { %v2136_v19 = vpop.f32.mrb[180].mxu1 }
 0x500   :  { %v2138_v24 = vpop.f32.mrb[181].mxu1  ;;  %6692 = vmatmul.mubr.msk.f32.gmra.mrb[80].mxu0 %vm1197_vm5, %v2136_v19 }
 0x501   :  { %6694 = vmatprep.mubr.msk.f32.mxu0 %vm7862_vm4, %v7861_v8 }
 0x503   :  { %v2141_v63 = vpop.f32.mrb[182].mxu1 }
 0x504   :  { %v2143_v20 = vpop.f32.mrb[183].mxu1  ;;  %6695 = vmatmul.mubr.msk.f32.gmra.mrb[82].mxu0 %vm1197_vm5, %v2141_v63 }
 0x505   :  { %6697 = vmatprep.mubr.msk.f32.mxu0 %vm7862_vm4, %v7861_v8 }
 0x507   :  { %v2146_v33 = vpop.f32.mrb[184].mxu1 }
 0x508   :  { %v2148_v44 = vpop.f32.mrb[185].mxu1  ;;  %6698 = vmatmul.mubr.msk.f32.gmra.mrb[84].mxu0 %vm1197_vm5, %v2146_v33 }
 0x509   :  { %6700 = vmatprep.mubr.msk.f32.mxu0 %vm7862_vm4, %v7861_v8 }
 0x50b   :  { %v2151_v38 = vpop.f32.mrb[186].mxu1 }
 0x50c   :  { %v2153_v52 = vpop.f32.mrb[187].mxu1  ;;  %6701 = vmatmul.mubr.msk.f32.gmra.mrb[86].mxu0 %vm1197_vm5, %v2151_v38 }
 0x50d   :  { %6703 = vmatprep.mubr.msk.f32.mxu0 %vm7862_vm4, %v7861_v8 }
 0x50f   :  { %v2156_v23 = vpop.f32.mrb[188].mxu1 }
 0x510   :  { %v2158_v55 = vpop.f32.mrb[189].mxu1  ;;  %6704 = vmatmul.mubr.msk.f32.gmra.mrb[88].mxu0 %vm1197_vm5, %v2156_v23 }
 0x511   :  { %6706 = vmatprep.mubr.msk.f32.mxu0 %vm7862_vm4, %v7861_v8 }
 0x513   :  { %v2161_v25 = vpop.f32.mrb[190].mxu1 }
 0x514   :  { %v2163_v62 = vpop.f32.mrb[191].mxu1  ;;  %6707 = vmatmul.mubr.msk.f32.gmra.mrb[90].mxu0 %vm1197_vm5, %v2161_v25 }
 0x515   :  { %6709 = vmatprep.mubr.msk.f32.mxu0 %vm7862_vm4, %v7861_v8 }
 0x517   :  { %v2166_v27 = vpop.f32.mrb[192].mxu1 }
 0x518   :  { %v2168_v28 = vpop.f32.mrb[193].mxu1  ;;  %6710 = vmatmul.mubr.msk.f32.gmra.mrb[92].mxu0 %vm1197_vm5, %v2166_v27 }
 0x519   :  { %6712 = vmatprep.mubr.msk.f32.mxu0 %vm7862_vm4, %v7861_v8 }
 0x51b   :  { %v2171_v46 = vpop.f32.mrb[194].mxu1 }
 0x51c   :  { %v2173_v57 = vpop.f32.mrb[195].mxu1  ;;  %6713 = vmatmul.mubr.msk.f32.gmra.mrb[94].mxu0 %vm1197_vm5, %v2171_v46 }
 0x51d   :  { %6715 = vmatprep.mubr.msk.f32.mxu0 %vm7862_vm4, %v7861_v8 }
 0x51f   :  { %v2176_v34 = vpop.f32.mrb[196].mxu1 }
 0x520   :  { %v2178_v35 = vpop.f32.mrb[197].mxu1  ;;  %6716 = vmatmul.mubr.msk.f32.gmra.mrb[96].mxu0 %vm1197_vm5, %v2176_v34 }
 0x521   :  { %6718 = vmatprep.mubr.msk.f32.mxu0 %vm7862_vm4, %v7861_v8 }
 0x523   :  { %v2181_v36 = vpop.f32.mrb[198].mxu1 }
 0x524   :  { %v2183_v40 = vpop.f32.mrb[199].mxu1  ;;  %6719 = vmatmul.mubr.msk.f32.gmra.mrb[98].mxu0 %vm1197_vm5, %v2181_v36  ;;  %v8950_v36 = vld [vmem:[#allocation4] ss:$0 sm:$0xff] }
 0x525   :  { %6721 = vmatprep.mubr.msk.f32.mxu0 %vm7862_vm4, %v7861_v8 }
 0x527   :  { %v2186_v56 = vpop.f32.mrb[200].mxu1 }
 0x528   :  { %6722 = vmatmul.mubr.msk.f32.gmra.mrb[100].mxu0 %vm1197_vm5, %v2186_v56  ;;  %v2188_v2 = vpop.f32.mrb[201].mxu1 }
 0x529   :  { %5967 = vmatprep.mubr.msk.f32.mxu0 %vm1197_vm5, %v2605_v53 }
 0x577   :  { %v1904_v5 = vpop.f32.mrb[34].mxu0 }
 0x578   :  { %v1988_v48 = vadd.f32 %v1904_v5, %v8756_v59  ;;  %v6622_v51 = vpop.f32.mrb[35].mxu0 }
 0x57b   :  { %v1909_v7 = vpop.f32.mrb[36].mxu0 }
 0x57c   :  { %v1989_v9 = vadd.f32 %v1909_v7, %v8759_v1  ;;  %v6625_v11 = vpop.f32.mrb[37].mxu0 }
 0x57f   :  { %v1914_v39 = vpop.f32.mrb[38].mxu0 }
 0x580   :  { %v1990_v58 = vadd.f32 %v1914_v39, %v8762_v54  ;;  %v6628_v6 = vpop.f32.mrb[39].mxu0 }
 0x583   :  { %v1919_v21 = vpop.f32.mrb[40].mxu0 }
 0x584   :  { %v8907_v30 = vadd.f32 %v1919_v21, %v8765_v0  ;;  %v6631_v14 = vpop.f32.mrb[41].mxu0 }
 0x587   :  { %v1924_v12 = vpop.f32.mrb[42].mxu0 }
 0x588   :  { %v8911_v59 = vadd.f32 %v1924_v12, %v8768_v47  ;;  %v6634_v22 = vpop.f32.mrb[43].mxu0 }
 0x58b   :  { %v1929_v1 = vpop.f32.mrb[44].mxu0 }
 0x58c   :  { %v8915_v54 = vadd.f32 %v1929_v1, %v8771_v26  ;;  %v6637_v29 = vpop.f32.mrb[45].mxu0 }
 0x58f   :  { %v1934_v16 = vpop.f32.mrb[46].mxu0 }
 0x590   :  { %v8918_v0 = vadd.f32 %v1934_v16, %v8774_v32  ;;  %v6640_v41 = vpop.f32.mrb[47].mxu0 }
 0x593   :  { %v1939_v10 = vpop.f32.mrb[48].mxu0 }
 0x594   :  { %v8921_v60 = vadd.f32 %v1939_v10, %v8777_v49  ;;  %v6643_v18 = vpop.f32.mrb[49].mxu0 }
 0x597   :  { %v1944_v47 = vpop.f32.mrb[50].mxu0 }
 0x598   :  { %v8924_v17 = vadd.f32 %v1944_v47, %v8780_v3  ;;  %v6646_v19 = vpop.f32.mrb[51].mxu0 }
 0x59b   :  { %v1949_v24 = vpop.f32.mrb[52].mxu0 }
 0x59c   :  { %v8927_v26 = vadd.f32 %v1949_v24, %v8783_v43  ;;  %v6649_v63 = vpop.f32.mrb[53].mxu0 }
 0x59f   :  { %v1954_v20 = vpop.f32.mrb[54].mxu0 }
 0x5a0   :  { %v8930_v32 = vadd.f32 %v1954_v20, %v8785_v13  ;;  %v6652_v33 = vpop.f32.mrb[55].mxu0 }
 0x5a3   :  { %v1959_v44 = vpop.f32.mrb[56].mxu0 }
 0x5a4   :  { %v8933_v49 = vadd.f32 %v1959_v44, %v8787_v61  ;;  %v6655_v38 = vpop.f32.mrb[57].mxu0 }
 0x5a7   :  { %v1964_v52 = vpop.f32.mrb[58].mxu0 }
 0x5a8   :  { %v8936_v3 = vadd.f32 %v1964_v52, %v8789_v4  ;;  %v6658_v23 = vpop.f32.mrb[59].mxu0 }
 0x5ab   :  { %v1969_v55 = vpop.f32.mrb[60].mxu0 }
 0x5ac   :  { %v8939_v43 = vadd.f32 %v1969_v55, %v8791_v45  ;;  %v6661_v25 = vpop.f32.mrb[61].mxu0 }
 0x5af   :  { %v1974_v62 = vpop.f32.mrb[62].mxu0 }
 0x5b0   :  { %v8942_v13 = vadd.f32 %v1974_v62, %v8793_v31  ;;  %v6664_v27 = vpop.f32.mrb[63].mxu0 }
 0x5b3   :  { %v1979_v28 = vpop.f32.mrb[64].mxu0 }
 0x5b4   :  { %v8945_v61 = vadd.f32 %v1979_v28, %v8795_v42  ;;  %v6667_v46 = vpop.f32.mrb[65].mxu0 }
 0x5b7   :  { %v1984_v57 = vpop.f32.mrb[66].mxu0 }
 0x5b8   :  { %v8948_v4 = vadd.f32 %v1984_v57, %v8797_v15  ;;  %v6670_v34 = vpop.f32.mrb[67].mxu0 }
 0x5bb   :  { %v2309_v35 = vpop.f32.mrb[68].mxu0 }
 0x5bc   :  { %v2393_v45 = vadd.f32 %v2309_v35, %v1988_v48  ;;  %v6675_v40 = vpop.f32.mrb[69].mxu0 }
 0x5be   :  { %v2417_v56 = vadd.f32 %v8950_v36, %v2393_v45 }
 0x5bf   :  { %v2314_v31 = vpop.f32.mrb[70].mxu0 }
 0x5c0   :  { %v2394_v2 = vadd.f32 %v2314_v31, %v1989_v9  ;;  %v6678_v5 = vpop.f32.mrb[71].mxu0  ;;  %v2434_v51 = vmul.f32 0.01, %v2417_v56 }
 0x5c2   :  { %v2418_v42 = vadd.f32 %v8950_v36, %v2394_v2  ;;  %v2451_v15 = vmax.f32 %v2417_v56, %v2434_v51 }
 0x5c3   :  { %v2319_v7 = vpop.f32.mrb[72].mxu0 }
 0x5c4   :  { %v2435_v11 = vmul.f32 0.01, %v2418_v42  ;;  %v2395_v39 = vadd.f32 %v2319_v7, %v1990_v58  ;;  %v6681_v6 = vpop.f32.mrb[73].mxu0 }
 0x5c6   :  { %v2452_v21 = vmax.f32 %v2418_v42, %v2435_v11  ;;  %v2419_v14 = vadd.f32 %v8950_v36, %v2395_v39 }
 0x5c7   :  { %v2324_v50 = vpop.f32.mrb[74].mxu0 }
 0x5c8   :  { %v8955_v12 = vpack.c.bf16 %v2452_v21, %v2451_v15  ;;  %v2396_v48 = vadd.f32 %v2324_v50, %v8907_v30  ;;  %v6684_v53 = vpop.f32.mrb[75].mxu0  ;;  %v2436_v22 = vmul.f32 0.01, %v2419_v14 }
 0x5ca   :  { %v2420_v9 = vadd.f32 %v8950_v36, %v2396_v48  ;;  %7124 = vmatpush1.bf16.msra.mxu1 %v8955_v12  ;;  %7148 = vmatpush1.bf16.msra.mxu0 %v8955_v12  ;;  %v2453_v41 = vmax.f32 %v2419_v14, %v2436_v22 }
 0x5cb   :  { %v2329_v1 = vpop.f32.mrb[76].mxu0  ;;  %7125 = vmatprep.subr.bf16.mxu1 %v7860_v37  ;;  %7149 = vmatprep.subr.bf16.mxu0 %v7860_v37 }
 0x5cc   :  { %v2437_v58 = vmul.f32 0.01, %v2420_v9  ;;  %v2397_v29 = vadd.f32 %v2329_v1, %v8911_v59  ;;  %v6687_v16 = vpop.f32.mrb[77].mxu0 }
 0x5ce   :  { %v2454_v10 = vmax.f32 %v2420_v9, %v2437_v58  ;;  %v2421_v30 = vadd.f32 %v8950_v36, %v2397_v29 }
 0x5cf   :  { %v2334_v18 = vpop.f32.mrb[78].mxu0 }
 0x5d0   :  { %v8965_v47 = vpack.c.bf16 %v2454_v10, %v2453_v41  ;;  %v2398_v19 = vadd.f32 %v2334_v18, %v8915_v54  ;;  %v6690_v24 = vpop.f32.mrb[79].mxu0  ;;  %v2438_v63 = vmul.f32 0.01, %v2421_v30 }
 0x5d2   :  { %v2422_v20 = vadd.f32 %v8950_v36, %v2398_v19  ;;  %7127 = vmatpush1.bf16.msra.mxu1 %v8965_v47  ;;  %7151 = vmatpush1.bf16.msra.mxu0 %v8965_v47  ;;  %v2455_v52 = vmax.f32 %v2421_v30, %v2438_v63 }
 0x5d3   :  { %v2339_v33 = vpop.f32.mrb[80].mxu0  ;;  %7128 = vmatprep.subr.bf16.mxu1 %v7860_v37  ;;  %7152 = vmatprep.subr.bf16.mxu0 %v7860_v37 }
 0x5d4   :  { %v2439_v59 = vmul.f32 0.01, %v2422_v20  ;;  %v2399_v44 = vadd.f32 %v2339_v33, %v8918_v0  ;;  %v6693_v38 = vpop.f32.mrb[81].mxu0 }
 0x5d6   :  { %v2456_v23 = vmax.f32 %v2422_v20, %v2439_v59  ;;  %v2423_v54 = vadd.f32 %v8950_v36, %v2399_v44 }
 0x5d7   :  { %v2344_v55 = vpop.f32.mrb[82].mxu0 }
 0x5d8   :  { %v8975_v25 = vpack.c.bf16 %v2456_v23, %v2455_v52  ;;  %v2400_v62 = vadd.f32 %v2344_v55, %v8921_v60  ;;  %v6696_v27 = vpop.f32.mrb[83].mxu0  ;;  %v2440_v28 = vmul.f32 0.01, %v2423_v54 }
 0x5da   :  { %v2424_v46 = vadd.f32 %v8950_v36, %v2400_v62  ;;  %7130 = vmatpush1.bf16.msra.mxu1 %v8975_v25  ;;  %7154 = vmatpush1.bf16.msra.mxu0 %v8975_v25  ;;  %v2457_v45 = vmax.f32 %v2423_v54, %v2440_v28 }
 0x5db   :  { %v2349_v57 = vpop.f32.mrb[84].mxu0  ;;  %7131 = vmatprep.subr.bf16.mxu1 %v7860_v37  ;;  %7155 = vmatprep.subr.bf16.mxu0 %v7860_v37 }
 0x5dc   :  { %v2441_v0 = vmul.f32 0.01, %v2424_v46  ;;  %v2401_v34 = vadd.f32 %v2349_v57, %v8924_v17  ;;  %v6699_v35 = vpop.f32.mrb[85].mxu0 }
 0x5de   :  { %v2458_v40 = vmax.f32 %v2424_v46, %v2441_v0  ;;  %v2425_v60 = vadd.f32 %v8950_v36, %v2401_v34 }
 0x5df   :  { %v2354_v56 = vpop.f32.mrb[86].mxu0 }
 0x5e0   :  { %v8985_v31 = vpack.c.bf16 %v2458_v40, %v2457_v45  ;;  %v2402_v2 = vadd.f32 %v2354_v56, %v8927_v26  ;;  %v6702_v5 = vpop.f32.mrb[87].mxu0  ;;  %v2442_v51 = vmul.f32 0.01, %v2425_v60  ;;  %v2468_v40 = vld [vmem:[#allocation6] sm:$0xff]  ;;  %v2470_v56 = vld [vmem:[#allocation6 + $0x10] sm:$0xff] }
 0x5e1   :  { %v2473_v5 = vld [vmem:[#allocation6 + $0x28] sm:$0xff] }
 0x5e2   :  { %v2426_v42 = vadd.f32 %v8950_v36, %v2402_v2  ;;  %7133 = vmatpush1.bf16.msra.mxu1 %v8985_v31  ;;  %7157 = vmatpush1.bf16.msra.mxu0 %v8985_v31  ;;  %v2459_v6 = vmax.f32 %v2425_v60, %v2442_v51  ;;  %v2607_v60 = vld [vmem:[#allocation6 + $0x88] sm:$0xff]  ;;  %v2606_v2 = vld [vmem:[#allocation6 + $0x80] sm:$0xff]  ;;  %v2609_v51 = vld [vmem:[#allocation6 + $0x98] sm:$0xff] }
 0x5e3   :  { %v2359_v7 = vpop.f32.mrb[88].mxu0  ;;  %7134 = vmatprep.subr.bf16.mxu1 %v7860_v37  ;;  %7158 = vmatprep.subr.bf16.mxu0 %v7860_v37 }
 0x5e4   :  { %v2443_v17 = vmul.f32 0.01, %v2426_v42  ;;  %v2403_v11 = vadd.f32 %v2359_v7, %v8930_v32  ;;  %v6705_v39 = vpop.f32.mrb[89].mxu0  ;;  %v2475_v7 = vld [vmem:[#allocation6 + $0x38] sm:$0xff] }
 0x5e5   :  { %v2477_v39 = vld [vmem:[#allocation6 + $0x48] sm:$0xff] }
 0x5e6   :  { %v2460_v15 = vmax.f32 %v2426_v42, %v2443_v17  ;;  %v2427_v26 = vadd.f32 %v8950_v36, %v2403_v11  ;;  %v2472_v42 = vld [vmem:[#allocation6 + $0x20] sm:$0xff]  ;;  %v2611_v17 = vld [vmem:[#allocation6 + $0xa8] sm:$0xff]  ;;  %v2474_v11 = vld [vmem:[#allocation6 + $0x30] sm:$0xff] }
 0x5e7   :  { %v2364_v21 = vpop.f32.mrb[90].mxu0 }
 0x5e8   :  { %v8995_v14 = vpack.c.bf16 %v2460_v15, %v2459_v6  ;;  %v2404_v50 = vadd.f32 %v2364_v21, %v8933_v49  ;;  %v6708_v48 = vpop.f32.mrb[91].mxu0  ;;  %v2444_v53 = vmul.f32 0.01, %v2427_v26  ;;  %v2613_v6 = vld [vmem:[#allocation6 + $0xb8] sm:$0xff]  ;;  %v2476_v15 = vld [vmem:[#allocation6 + $0x40] sm:$0xff]  ;;  %v2615_v21 = vld [vmem:[#allocation6 + $0xc8] sm:$0xff] }
 0x5e9   :  { %v2481_v48 = vld [vmem:[#allocation6 + $0x68] sm:$0xff] }
 0x5ea   :  { %v2428_v22 = vadd.f32 %v8950_v36, %v2404_v50  ;;  %7136 = vmatpush1.bf16.msra.mxu1 %v8995_v14  ;;  %7160 = vmatpush1.bf16.msra.mxu0 %v8995_v14  ;;  %v2461_v29 = vmax.f32 %v2427_v26, %v2444_v53  ;;  %v2479_v26 = vld [vmem:[#allocation6 + $0x58] sm:$0xff]  ;;  %v2478_v50 = vld [vmem:[#allocation6 + $0x50] sm:$0xff] }
 0x5eb   :  { %v2369_v9 = vpop.f32.mrb[92].mxu0  ;;  %7137 = vmatprep.subr.bf16.mxu1 %v7860_v37  ;;  %7161 = vmatprep.subr.bf16.mxu0 %v7860_v37  ;;  %v2617_v53 = vld [vmem:[#allocation6 + $0xd8] sm:$0xff] }
 0x5ec   :  { %v2445_v32 = vmul.f32 0.01, %v2428_v22  ;;  %v2405_v1 = vadd.f32 %v2369_v9, %v8936_v3  ;;  %v6711_v58 = vpop.f32.mrb[93].mxu0  ;;  %v2748_v9 = vld [vmem:[#allocation6 + $0xe8] sm:$0xff] }
 0x5ed   :  { %v2890_v58 = vld [vmem:[#allocation6 + $0x150] sm:$0xff] }
 0x5ee   :  { %v2462_v16 = vmax.f32 %v2428_v22, %v2445_v32  ;;  %v2429_v49 = vadd.f32 %v8950_v36, %v2405_v1  ;;  %v2480_v22 = vld [vmem:[#allocation6 + $0x60] sm:$0xff]  ;;  %v2891_v32 = vld [vmem:[#allocation6 + $0x158] sm:$0xff] }
 0x5ef   :  { %v2374_v41 = vpop.f32.mrb[94].mxu0  ;;  %v2747_v1 = vld [vmem:[#allocation6 + $0xe0] sm:$0xff] }
 0x5f0   :  { %v9005_v10 = vpack.c.bf16 %v2462_v16, %v2461_v29  ;;  %v2406_v30 = vadd.f32 %v2374_v41, %v8939_v43  ;;  %v6714_v18 = vpop.f32.mrb[95].mxu0  ;;  %v2446_v19 = vmul.f32 0.01, %v2429_v49  ;;  %v2750_v29 = vld [vmem:[#allocation6 + $0xf8] sm:$0xff]  ;;  %v2893_v16 = vld [vmem:[#allocation6 + $0x168] sm:$0xff]  ;;  %v2892_v41 = vld [vmem:[#allocation6 + $0x160] sm:$0xff] }
 0x5f1   :  { %v2751_v18 = vld [vmem:[#allocation6 + $0x100] sm:$0xff] }
 0x5f2   :  { %v2430_v24 = vadd.f32 %v8950_v36, %v2406_v30  ;;  %7139 = vmatpush1.bf16.msra.mxu1 %v9005_v10  ;;  %7163 = vmatpush1.bf16.msra.mxu0 %v9005_v10  ;;  %v2463_v59 = vmax.f32 %v2429_v49, %v2446_v19  ;;  %v2749_v49 = vld [vmem:[#allocation6 + $0xf0] sm:$0xff]  ;;  %v2895_v30 = vld [vmem:[#allocation6 + $0x178] sm:$0xff] }
 0x5f3   :  { %v2379_v63 = vpop.f32.mrb[96].mxu0  ;;  %7140 = vmatprep.subr.bf16.mxu1 %v7860_v37  ;;  %7164 = vmatprep.subr.bf16.mxu0 %v7860_v37  ;;  %v2894_v19 = vld [vmem:[#allocation6 + $0x170] sm:$0xff] }
 0x5f4   :  { %v2447_v3 = vmul.f32 0.01, %v2430_v24  ;;  %v2407_v20 = vadd.f32 %v2379_v63, %v8942_v13  ;;  %v6717_v33 = vpop.f32.mrb[97].mxu0  ;;  %v2897_v63 = vld [vmem:[#allocation6 + $0x188] sm:$0xff] }
 0x5f5   :  { %v2756_v33 = vld [vmem:[#allocation6 + $0x128] sm:$0xff] }
 0x5f6   :  { %v2464_v44 = vmax.f32 %v2430_v24, %v2447_v3  ;;  %v2431_v43 = vadd.f32 %v8950_v36, %v2407_v20  ;;  %v2754_v24 = vld [vmem:[#allocation6 + $0x118] sm:$0xff]  ;;  %v2753_v3 = vld [vmem:[#allocation6 + $0x110] sm:$0xff]  ;;  %v2896_v20 = vld [vmem:[#allocation6 + $0x180] sm:$0xff] }
 0x5f7   :  { %v2384_v38 = vpop.f32.mrb[98].mxu0 }
 0x5f8   :  { %v9015_v52 = vpack.c.bf16 %v2464_v44, %v2463_v59  ;;  %v2408_v23 = vadd.f32 %v2384_v38, %v8945_v61  ;;  %v6720_v54 = vpop.f32.mrb[99].mxu0  ;;  %v2448_v55 = vmul.f32 0.01, %v2431_v43  ;;  %v2899_v59 = vld [vmem:[#allocation6 + $0x198] sm:$0xff]  ;;  %v2755_v44 = vld [vmem:[#allocation6 + $0x120] sm:$0xff] }
 0x5f9   :  { %v2758_v38 = vld [vmem:[#allocation6 + $0x138] sm:$0xff]  ;;  %v2900_v54 = vld [vmem:[#allocation6 + $0x1a0] sm:$0xff] }
 0x5fa   :  { %v2432_v62 = vadd.f32 %v8950_v36, %v2408_v23  ;;  %7142 = vmatpush1.bf16.msra.mxu1 %v9015_v52  ;;  %7166 = vmatpush1.bf16.msra.mxu0 %v9015_v52  ;;  %v2465_v57 = vmax.f32 %v2431_v43, %v2448_v55  ;;  %v2898_v43 = vld [vmem:[#allocation6 + $0x190] sm:$0xff]  ;;  %v2760_v55 = vld [vmem:[#allocation6 + $0x148] sm:$0xff] }
 0x5fb   :  { %v2389_v27 = vpop.f32.mrb[100].mxu0  ;;  %7143 = vmatprep.subr.bf16.mxu1 %v7860_v37  ;;  %7167 = vmatprep.subr.bf16.mxu0 %v7860_v37  ;;  %v2757_v23 = vld [vmem:[#allocation6 + $0x130] sm:$0xff] }
 0x5fc   :  { %v2449_v13 = vmul.f32 0.01, %v2432_v62  ;;  %v2409_v28 = vadd.f32 %v2389_v27, %v8948_v4  ;;  %v6723_v46 = vpop.f32.mrb[101].mxu0  ;;  %v2604_v4 = vld [vmem:[#allocation6 + $0x70] sm:$0xff]  ;;  %v2759_v27 = vld [vmem:[#allocation6 + $0x140] sm:$0xff] }
 0x5fe   :  { %v2466_v0 = vmax.f32 %v2432_v62, %v2449_v13  ;;  %v2433_v61 = vadd.f32 %v8950_v36, %v2409_v28  ;;  %v2471_v36 = vld [vmem:[#allocation6 + $0x18] sm:$0xff]  ;;  %v2902_v13 = vld [vmem:[#allocation6 + $0x1b0] sm:$0xff] }
 0x5ff   :  { %v2903_v62 = vld [vmem:[#allocation6 + $0x1b8] sm:$0xff] }
 0x600   :  { %v9025_v34 = vpack.c.bf16 %v2466_v0, %v2465_v57  ;;  %v2450_v35 = vmul.f32 0.01, %v2433_v61  ;;  %v5992_v28 = vld [vmem:[%s9425_s7 + $0x20] sm:$0xff] }
 0x602   :  { %7145 = vmatpush1.bf16.msra.mxu1 %v9025_v34  ;;  %7169 = vmatpush1.bf16.msra.mxu0 %v9025_v34  ;;  %v9031_v45 = vmax.f32 %v2433_v61, %v2450_v35 }
 0x603   :  { %2535 = vmatprep.subr.mxu1 %v7861_v8  ;;  %2671 = vmatprep.subr.mxu0 %v7861_v8 }
 0x606   :  { %2536 = vmatpush1.msra.mxu1 %v9031_v45  ;;  %2672 = vmatpush1.msra.mxu0 %v9031_v45 }
 0x607   :  { %2568 = vmatmul.mubr.f32.vlgmr.msra.gmra.mrb[202].mxu1 %v2468_v40  ;;  %7170 = vmatprep.subr.bf16.mxu1 %v7860_v37 }
 0x608   :  { %7194 = vmatprep.subr.bf16.mxu0 %v7860_v37  ;;  %2704 = vmatmul.mubr.f32.vlgmr.msra.gmra.mrb[102].mxu0 %v2604_v4 }
 0x609   :  { %7172 = vmatpush1.bf16.msra.mxu1 %v8955_v12  ;;  %7196 = vmatpush1.bf16.msra.mxu0 %v8955_v12  ;;  %v2608_v12 = vld [vmem:[#allocation6 + $0x90] sm:$0xff] }
 0x60a   :  { %7173 = vmatprep.subr.bf16.mxu1 %v7860_v37  ;;  %7197 = vmatprep.subr.bf16.mxu0 %v7860_v37 }
 0x60b   :  { %5961 = vmatprep.mubr.msk.f32.mxu1 %vm1197_vm5, %v2471_v36  ;;  %5968 = vmatprep.mubr.msk.f32.mxu0 %vm1197_vm5, %v2607_v60 }
 0x60c   :  { %2573 = vmatmul.mubr.f32.gmra.mrb[204].mxu1 %v2470_v56  ;;  %2709 = vmatmul.mubr.f32.gmra.mrb[104].mxu0 %v2606_v2 }
 0x60d   :  { %7175 = vmatpush1.bf16.msra.mxu1 %v8965_v47  ;;  %7199 = vmatpush1.bf16.msra.mxu0 %v8965_v47  ;;  %v2610_v47 = vld [vmem:[#allocation6 + $0xa0] sm:$0xff] }
 0x60e   :  { %7176 = vmatprep.subr.bf16.mxu1 %v7860_v37  ;;  %7200 = vmatprep.subr.bf16.mxu0 %v7860_v37 }
 0x60f   :  { %5962 = vmatprep.mubr.msk.f32.mxu1 %vm1197_vm5, %v2473_v5  ;;  %5969 = vmatprep.mubr.msk.f32.mxu0 %vm1197_vm5, %v2609_v51 }
 0x610   :  { %2578 = vmatmul.mubr.f32.gmra.mrb[206].mxu1 %v2472_v42  ;;  %2714 = vmatmul.mubr.f32.gmra.mrb[106].mxu0 %v2608_v12 }
 0x611   :  { %7178 = vmatpush1.bf16.msra.mxu1 %v8975_v25  ;;  %7202 = vmatpush1.bf16.msra.mxu0 %v8975_v25  ;;  %v2612_v25 = vld [vmem:[#allocation6 + $0xb0] sm:$0xff] }
 0x612   :  { %7179 = vmatprep.subr.bf16.mxu1 %v7860_v37  ;;  %7203 = vmatprep.subr.bf16.mxu0 %v7860_v37 }
 0x613   :  { %5963 = vmatprep.mubr.msk.f32.mxu1 %vm1197_vm5, %v2475_v7  ;;  %5970 = vmatprep.mubr.msk.f32.mxu0 %vm1197_vm5, %v2611_v17 }
 0x614   :  { %2583 = vmatmul.mubr.f32.gmra.mrb[208].mxu1 %v2474_v11  ;;  %2719 = vmatmul.mubr.f32.gmra.mrb[108].mxu0 %v2610_v47 }
 0x615   :  { %7181 = vmatpush1.bf16.msra.mxu1 %v8985_v31  ;;  %7205 = vmatpush1.bf16.msra.mxu0 %v8985_v31  ;;  %v2614_v31 = vld [vmem:[#allocation6 + $0xc0] sm:$0xff] }
 0x616   :  { %7182 = vmatprep.subr.bf16.mxu1 %v7860_v37  ;;  %7206 = vmatprep.subr.bf16.mxu0 %v7860_v37 }
 0x617   :  { %5964 = vmatprep.mubr.msk.f32.mxu1 %vm1197_vm5, %v2477_v39  ;;  %5971 = vmatprep.mubr.msk.f32.mxu0 %vm1197_vm5, %v2613_v6 }
 0x618   :  { %2588 = vmatmul.mubr.f32.gmra.mrb[210].mxu1 %v2476_v15  ;;  %2724 = vmatmul.mubr.f32.gmra.mrb[110].mxu0 %v2612_v25 }
 0x619   :  { %7184 = vmatpush1.bf16.msra.mxu1 %v8995_v14  ;;  %7208 = vmatpush1.bf16.msra.mxu0 %v8995_v14  ;;  %v2616_v14 = vld [vmem:[#allocation6 + $0xd0] sm:$0xff] }
 0x61a   :  { %7185 = vmatprep.subr.bf16.mxu1 %v7860_v37  ;;  %7209 = vmatprep.subr.bf16.mxu0 %v7860_v37 }
 0x61b   :  { %5965 = vmatprep.mubr.msk.f32.mxu1 %vm1197_vm5, %v2479_v26  ;;  %5972 = vmatprep.mubr.msk.f32.mxu0 %vm1197_vm5, %v2615_v21 }
 0x61c   :  { %2593 = vmatmul.mubr.f32.gmra.mrb[212].mxu1 %v2478_v50  ;;  %2729 = vmatmul.mubr.f32.gmra.mrb[112].mxu0 %v2614_v31 }
 0x61d   :  { %7187 = vmatpush1.bf16.msra.mxu1 %v9005_v10  ;;  %7211 = vmatpush1.bf16.msra.mxu0 %v9005_v10  ;;  %v2752_v10 = vld [vmem:[#allocation6 + $0x108] sm:$0xff] }
 0x61e   :  { %7188 = vmatprep.subr.bf16.mxu1 %v7860_v37  ;;  %7212 = vmatprep.subr.bf16.mxu0 %v7860_v37 }
 0x61f   :  { %5966 = vmatprep.mubr.msk.f32.mxu1 %vm1197_vm5, %v2481_v48  ;;  %5973 = vmatprep.mubr.msk.f32.mxu0 %vm1197_vm5, %v2617_v53 }
 0x620   :  { %2598 = vmatmul.mubr.f32.gmra.mrb[214].mxu1 %v2480_v22  ;;  %2734 = vmatmul.mubr.f32.gmra.mrb[114].mxu0 %v2616_v14 }
 0x621   :  { %7190 = vmatpush1.bf16.msra.mxu1 %v9015_v52  ;;  %7214 = vmatpush1.bf16.msra.mxu0 %v9015_v52  ;;  %v2901_v52 = vld [vmem:[#allocation6 + $0x1a8] sm:$0xff] }
 0x622   :  { %7191 = vmatprep.subr.bf16.mxu1 %v7860_v37  ;;  %7215 = vmatprep.subr.bf16.mxu0 %v7860_v37 }
 0x623   :  { %5974 = vmatprep.mubr.msk.f32.mxu1 %vm1197_vm5, %v2748_v9  ;;  %5981 = vmatprep.mubr.msk.f32.mxu0 %vm1197_vm5, %v2891_v32 }
 0x625   :  { %7193 = vmatpush1.bf16.msra.mxu1 %v9025_v34  ;;  %7217 = vmatpush1.bf16.msra.mxu0 %v9025_v34 }
 0x626   :  { %2814 = vmatprep.subr.mxu1 %v7861_v8  ;;  %2957 = vmatprep.subr.mxu0 %v7861_v8 }
 0x629   :  { %2815 = vmatpush1.msra.mxu1 %v9031_v45  ;;  %2958 = vmatpush1.msra.mxu0 %v9031_v45 }
 0x62a   :  { %2847 = vmatmul.mubr.f32.vlgmr.msra.gmra.mrb[216].mxu1 %v2747_v1  ;;  %2990 = vmatmul.mubr.f32.vlgmr.msra.gmra.mrb[116].mxu0 %v2890_v58 }
 0x62b   :  { %5975 = vmatprep.mubr.msk.f32.mxu1 %vm1197_vm5, %v2750_v29  ;;  %5982 = vmatprep.mubr.msk.f32.mxu0 %vm1197_vm5, %v2893_v16 }
 0x62e   :  { %2852 = vmatmul.mubr.f32.gmra.mrb[218].mxu1 %v2749_v49  ;;  %2995 = vmatmul.mubr.f32.gmra.mrb[118].mxu0 %v2892_v41 }
 0x62f   :  { %5976 = vmatprep.mubr.msk.f32.mxu1 %vm1197_vm5, %v2752_v10  ;;  %5983 = vmatprep.mubr.msk.f32.mxu0 %vm1197_vm5, %v2895_v30 }
 0x632   :  { %2857 = vmatmul.mubr.f32.gmra.mrb[220].mxu1 %v2751_v18  ;;  %3000 = vmatmul.mubr.f32.gmra.mrb[120].mxu0 %v2894_v19 }
 0x633   :  { %5977 = vmatprep.mubr.msk.f32.mxu1 %vm1197_vm5, %v2754_v24  ;;  %5984 = vmatprep.mubr.msk.f32.mxu0 %vm1197_vm5, %v2897_v63 }
 0x636   :  { %2862 = vmatmul.mubr.f32.gmra.mrb[222].mxu1 %v2753_v3  ;;  %3005 = vmatmul.mubr.f32.gmra.mrb[122].mxu0 %v2896_v20 }
 0x637   :  { %5978 = vmatprep.mubr.msk.f32.mxu1 %vm1197_vm5, %v2756_v33  ;;  %5985 = vmatprep.mubr.msk.f32.mxu0 %vm1197_vm5, %v2899_v59 }
 0x63a   :  { %2867 = vmatmul.mubr.f32.gmra.mrb[224].mxu1 %v2755_v44  ;;  %3010 = vmatmul.mubr.f32.gmra.mrb[124].mxu0 %v2898_v43 }
 0x63b   :  { %5979 = vmatprep.mubr.msk.f32.mxu1 %vm1197_vm5, %v2758_v38  ;;  %5986 = vmatprep.mubr.msk.f32.mxu0 %vm1197_vm5, %v2901_v52 }
 0x63e   :  { %2872 = vmatmul.mubr.f32.gmra.mrb[226].mxu1 %v2757_v23  ;;  %3015 = vmatmul.mubr.f32.gmra.mrb[126].mxu0 %v2900_v54 }
 0x63f   :  { %5980 = vmatprep.mubr.msk.f32.mxu1 %vm1197_vm5, %v2760_v55  ;;  %5987 = vmatprep.mubr.msk.f32.mxu0 %vm1197_vm5, %v2903_v62 }
 0x642   :  { %2877 = vmatmul.mubr.f32.gmra.mrb[228].mxu1 %v2759_v27  ;;  %3020 = vmatmul.mubr.f32.gmra.mrb[128].mxu0 %v2902_v13 }
 0x643   :  { %6758 = vmatprep.mubr.msk.f32.mxu0 %vm3036_vm6, %v5992_v28 }
 0x6da   :  { %v2569_v46 = vpop.f32.mrb[202].mxu1 }
 0x6db   :  { %v2571_v57 = vpop.f32.mrb[203].mxu1  ;;  %v2705_v0 = vpop.f32.mrb[102].mxu0 }
 0x6dc   :  { %v2739_v61 = vmax.f32 %v2569_v46, %v2705_v0  ;;  %v2707_v34 = vpop.f32.mrb[103].mxu0 }
 0x6df   :  { %v2574_v35 = vpop.f32.mrb[204].mxu1  ;;  %v2710_v45 = vpop.f32.mrb[104].mxu0 }
 0x6e0   :  { %v2576_v40 = vpop.f32.mrb[205].mxu1  ;;  %v2740_v4 = vmax.f32 %v2574_v35, %v2710_v45  ;;  %v2712_v36 = vpop.f32.mrb[105].mxu0 }
 0x6e3   :  { %v2579_v60 = vpop.f32.mrb[206].mxu1  ;;  %v2715_v56 = vpop.f32.mrb[106].mxu0 }
 0x6e4   :  { %v2581_v2 = vpop.f32.mrb[207].mxu1  ;;  %v2741_v5 = vmax.f32 %v2579_v60, %v2715_v56  ;;  %v2717_v51 = vpop.f32.mrb[107].mxu0 }
 0x6e7   :  { %v2584_v42 = vpop.f32.mrb[208].mxu1  ;;  %v2720_v12 = vpop.f32.mrb[108].mxu0 }
 0x6e8   :  { %v2586_v7 = vpop.f32.mrb[209].mxu1  ;;  %v2742_v17 = vmax.f32 %v2584_v42, %v2720_v12  ;;  %v2722_v11 = vpop.f32.mrb[109].mxu0 }
 0x6e9   :  { %v3241_v7 = vld [vmem:[#allocation7 + $0x20] sm:$0xff] }
 0x6eb   :  { %v2589_v47 = vpop.f32.mrb[210].mxu1  ;;  %v2725_v39 = vpop.f32.mrb[110].mxu0 }
 0x6ec   :  { %v2591_v6 = vpop.f32.mrb[211].mxu1  ;;  %v2743_v15 = vmax.f32 %v2589_v47, %v2725_v39  ;;  %v2727_v25 = vpop.f32.mrb[111].mxu0  ;;  %v3243_v47 = vld [vmem:[#allocation7 + $0x30] sm:$0xff]  ;;  %v3244_v39 = vld [vmem:[#allocation7 + $0x38] sm:$0xff] }
 0x6ed   :  { %v7246_v25 = vpack.c.bf16 %v3244_v39, %v3243_v47 }
 0x6ef   :  { %v2594_v26 = vpop.f32.mrb[212].mxu1  ;;  %v2730_v21 = vpop.f32.mrb[112].mxu0 }
 0x6f0   :  { %v2596_v50 = vpop.f32.mrb[213].mxu1  ;;  %v2744_v31 = vmax.f32 %v2594_v26, %v2730_v21  ;;  %v2732_v48 = vpop.f32.mrb[113].mxu0  ;;  %v5994_v26 = vld [vmem:[%s9425_s7 + $0x30] sm:$0xff]  ;;  %v5995_v21 = vld [vmem:[%s9425_s7 + $0x38] sm:$0xff] }
 0x6f1   :  { %v3032_v50 = vld [vmem:[%s9425_s7] sm:$0xff]  ;;  %v3034_v48 = vld [vmem:[%s9425_s7 + $0x10] sm:$0xff] }
 0x6f2   :  { %6738 = vmatprep.mubr.msk.f32.mxu1 %vm3036_vm6, %v3032_v50 }
 0x6f3   :  { %v2599_v53 = vpop.f32.mrb[214].mxu1  ;;  %v2735_v22 = vpop.f32.mrb[114].mxu0 }
 0x6f4   :  { %v2601_v14 = vpop.f32.mrb[215].mxu1  ;;  %v2745_v9 = vmax.f32 %v2599_v53, %v2735_v22  ;;  %v2737_v32 = vpop.f32.mrb[115].mxu0  ;;  %v3035_v53 = vld [vmem:[%s9425_s7 + $0x18] sm:$0xff] }
 0x6fd   :  { %v2848_v1 = vpop.f32.mrb[216].mxu1  ;;  %v2991_v58 = vpop.f32.mrb[116].mxu0 }
 0x6fe   :  { %v2882_v29 = vmax.f32 %v2739_v61, %v2848_v1  ;;  %v2850_v16 = vpop.f32.mrb[217].mxu1  ;;  %v2993_v49 = vpop.f32.mrb[117].mxu0  ;;  %v6008_v1 = vld [vmem:[%s9425_s7 + $0x40] sm:$0xff] }
 0x6ff   :  { %v6011_v16 = vld [vmem:[%s9425_s7 + $0x58] sm:$0xff]  ;;  %v6020_v49 = vld [vmem:[%s9425_s7 + $0x60] sm:$0xff] }
 0x700   :  { %v3025_v41 = vmax.f32 %v2882_v29, %v2991_v58  ;;  %v6009_v58 = vld [vmem:[%s9425_s7 + $0x48] sm:$0xff]  ;;  %v6010_v29 = vld [vmem:[%s9425_s7 + $0x50] sm:$0xff] }
 0x701   :  { %v2853_v10 = vpop.f32.mrb[218].mxu1  ;;  %v2996_v30 = vpop.f32.mrb[118].mxu0 }
 0x702   :  { %v2883_v18 = vmax.f32 %v2740_v4, %v2853_v10  ;;  %v2855_v19 = vpop.f32.mrb[219].mxu1  ;;  %v2998_v24 = vpop.f32.mrb[119].mxu0  ;;  %v6022_v10 = vld [vmem:[%s9425_s7 + $0x70] sm:$0xff] }
 0x703   :  { %v3135_v19 = vld [vmem:[#allocation7 + $0x8] sm:$0xff] }
 0x704   :  { %v3026_v63 = vmax.f32 %v2883_v18, %v2996_v30  ;;  %v6023_v30 = vld [vmem:[%s9425_s7 + $0x78] sm:$0xff]  ;;  %v3134_v18 = vld [vmem:[#allocation7] sm:$0xff] }
 0x705   :  { %v2858_v3 = vpop.f32.mrb[220].mxu1  ;;  %v3001_v20 = vpop.f32.mrb[120].mxu0  ;;  %v7250_v24 = vpack.c.bf16 %v3135_v19, %v3134_v18  ;;  %v4183_v18 = vld [vmem:[%s9429_s11 + $0x28] sm:$0xff] }
 0x706   :  { %v9101_v33 = vpack.c.bf16 %v3026_v63, %v3025_v41  ;;  %v2884_v59 = vmax.f32 %v2741_v5, %v2858_v3  ;;  %v2860_v44 = vpop.f32.mrb[221].mxu1  ;;  %v3003_v43 = vpop.f32.mrb[121].mxu0  ;;  %v6021_v41 = vld [vmem:[%s9425_s7 + $0x68] sm:$0xff]  ;;  %v3136_v63 = vld [vmem:[#allocation7 + $0x10] sm:$0xff]  ;;  %v3137_v3 = vld [vmem:[#allocation7 + $0x18] sm:$0xff] }
 0x707   :  { %v3545_v43 = vld [vmem:[#allocation7 + $0x50] sm:$0xff] }
 0x708   :  { %v3027_v38 = vmax.f32 %v2884_v59, %v3001_v20  ;;  %7219 = vmatprep.subr.bf16.mxu1 %v9101_v33  ;;  %7231 = vmatprep.subr.bf16.mxu0 %v9101_v33  ;;  %v3543_v20 = vld [vmem:[#allocation7 + $0x40] sm:$0xff]  ;;  %v3544_v59 = vld [vmem:[#allocation7 + $0x48] sm:$0xff] }
 0x709   :  { %v2863_v52 = vpop.f32.mrb[222].mxu1  ;;  %7221 = vmatpush3.bf16.msra.mxu1 %v9101_v33  ;;  %7233 = vmatpush3.bf16.msra.mxu0 %v9101_v33  ;;  %v3006_v23 = vpop.f32.mrb[122].mxu0  ;;  %v7270_v44 = vpack.c.bf16 %v3544_v59, %v3543_v20  ;;  %v4191_v20 = vld [vmem:[%s9429_s11 + $0x68] sm:$0xff]  ;;  %v4102_v59 = vld [vmem:[#allocation10 + $0x18] sm:$0xff] }
 0x70a   :  { %v2885_v54 = vmax.f32 %v2742_v17, %v2863_v52  ;;  %v2865_v55 = vpop.f32.mrb[223].mxu1  ;;  %v3008_v62 = vpop.f32.mrb[123].mxu0  ;;  %v3242_v17 = vld [vmem:[#allocation7 + $0x28] sm:$0xff] }
 0x70b   :  { %v7242_v6 = vpack.c.bf16 %v3242_v17, %v3241_v7 }
 0x70c   :  { %v3028_v27 = vmax.f32 %v2885_v54, %v3006_v23 }
 0x70d   :  { %v2868_v13 = vpop.f32.mrb[224].mxu1  ;;  %v3011_v28 = vpop.f32.mrb[124].mxu0 }
 0x70e   :  { %v9107_v46 = vpack.c.bf16 %v3028_v27, %v3027_v38  ;;  %v2886_v57 = vmax.f32 %v2743_v15, %v2868_v13  ;;  %v2870_v0 = vpop.f32.mrb[225].mxu1  ;;  %v3013_v61 = vpop.f32.mrb[125].mxu0  ;;  %v5993_v15 = vld [vmem:[%s9425_s7 + $0x28] sm:$0xff]  ;;  %v3546_v38 = vld [vmem:[#allocation7 + $0x58] sm:$0xff] }
 0x70f   :  { %v7274_v54 = vpack.c.bf16 %v3546_v38, %v3545_v43  ;;  %v3751_v27 = vld [vmem:[#allocation7 + $0x60] sm:$0xff]  ;;  %v3752_v13 = vld [vmem:[#allocation7 + $0x68] sm:$0xff] }
 0x710   :  { %v3029_v34 = vmax.f32 %v2886_v57, %v3011_v28  ;;  %7223 = vmatprep.subr.bf16.mxu1 %v9107_v46  ;;  %7235 = vmatprep.subr.bf16.mxu0 %v9107_v46  ;;  %v7290_v28 = vpack.c.bf16 %v3752_v13, %v3751_v27  ;;  %v4195_v27 = vld [vmem:[%s9429_s11 + $0x88] sm:$0xff] }
 0x711   :  { %v2873_v35 = vpop.f32.mrb[226].mxu1  ;;  %7225 = vmatpush3.bf16.msra.mxu1 %v9107_v46  ;;  %7237 = vmatpush3.bf16.msra.mxu0 %v9107_v46  ;;  %v3016_v45 = vpop.f32.mrb[126].mxu0 }
 0x712   :  { %v2887_v40 = vmax.f32 %v2744_v31, %v2873_v35  ;;  %v2875_v4 = vpop.f32.mrb[227].mxu1  ;;  %v3018_v36 = vpop.f32.mrb[127].mxu0  ;;  %v3033_v31 = vld [vmem:[%s9425_s7 + $0x8] sm:$0xff]  ;;  %v3754_v35 = vld [vmem:[#allocation7 + $0x78] sm:$0xff] }
 0x714   :  { %v3030_v60 = vmax.f32 %v2887_v40, %v3016_v45 }
 0x715   :  { %v2878_v56 = vpop.f32.mrb[228].mxu1  ;;  %v3021_v2 = vpop.f32.mrb[128].mxu0 }
 0x716   :  { %v9113_v5 = vpack.c.bf16 %v3030_v60, %v3029_v34  ;;  %v2888_v51 = vmax.f32 %v2745_v9, %v2878_v56  ;;  %v2880_v42 = vpop.f32.mrb[229].mxu1  ;;  %v3023_v12 = vpop.f32.mrb[129].mxu0  ;;  %v3753_v34 = vld [vmem:[#allocation7 + $0x70] sm:$0xff] }
 0x717   :  { %v7294_v4 = vpack.c.bf16 %v3754_v35, %v3753_v34  ;;  %v6032_v12 = vld [vmem:[#allocation9] ss:$0 sm:$0xff]  ;;  %v4203_v35 = vld [vmem:[%s9429_s11 + $0xc8] sm:$0xff] }
 0x718   :  { %v9115_v11 = vmax.f32 %v2888_v51, %v3021_v2  ;;  %7227 = vmatprep.subr.bf16.mxu1 %v9113_v5  ;;  %7239 = vmatprep.subr.bf16.mxu0 %v9113_v5  ;;  %v4206_v34 = vld [vmem:[%s9429_s11 + $0xe0] sm:$0xff] }
 0x719   :  { %7229 = vmatpush3.bf16.msra.mxu1 %v9113_v5  ;;  %7241 = vmatpush3.bf16.msra.mxu0 %v9113_v5 }
 0x71a   :  { %6736 = vmatprep.subr.mxu1 %v9115_v11  ;;  %6756 = vmatprep.subr.mxu0 %v9115_v11 }
 0x71d   :  { %6737 = vmatpush3.msra.mxu1 %v9115_v11  ;;  %6757 = vmatpush3.msra.mxu0 %v9115_v11 }
 0x71e   :  { %6759 = vmatmul.mubr.msk.f32.vlgmr.msra.gmra.mrb[130].mxu0 %vm3036_vm6, %v5993_v15  ;;  %7243 = vmatprep.subr.bf16.mxu0 %v7242_v6 }
 0x71f   :  { %7245 = vmatpush3.bf16.msra.mxu0 %v7242_v6  ;;  %6761 = vmatprep.mubr.msk.f32.mxu0 %vm3036_vm6, %v5994_v26 }
 0x720   :  { %7247 = vmatprep.subr.bf16.mxu0 %v7246_v25  ;;  %6739 = vmatmul.mubr.msk.f32.vlgmr.msra.gmra.mrb[230].mxu1 %vm3036_vm6, %v3033_v31 }
 0x721   :  { %6741 = vmatprep.mubr.msk.f32.mxu1 %vm3036_vm6, %v3034_v48  ;;  %7251 = vmatprep.subr.bf16.mxu1 %v7250_v24 }
 0x722   :  { %6762 = vmatmul.mubr.msk.f32.gmra.mrb[132].mxu0 %vm3036_vm6, %v5995_v21  ;;  %7253 = vmatpush3.bf16.msra.mxu1 %v7250_v24 }
 0x723   :  { %7249 = vmatpush3.bf16.msra.mxu0 %v7246_v25 }
 0x724   :  { %7259 = vmatprep.subr.bf16.mxu0 %v9101_v33  ;;  %6742 = vmatmul.mubr.msk.f32.gmra.mrb[232].mxu1 %vm3036_vm6, %v3035_v53 }
 0x7f1   :  { %v6760_v22 = vpop.f32.mrb[130].mxu0 }
 0x7f2   :  { %v3221_v14 = vpop.f32.mrb[131].mxu0 }
 0x7f3   :  { %6772 = vmatprep.mubr.msk.f32.mxu0 %vm3245_vm7, %v3221_v14  ;;  %v6740_v52 = vpop.f32.mrb[230].mxu1 }
 0x7f4   :  { %6773 = vmatmul.mubr.msk.f32.vlgmr.msra.gmra.mrb[134].mxu0 %vm3245_vm7, %v6760_v22  ;;  %v3115_v23 = vpop.f32.mrb[231].mxu1 }
 0x7f5   :  { %7261 = vmatpush3.bf16.msra.mxu0 %v9101_v33  ;;  %v6763_v9 = vpop.f32.mrb[132].mxu0  ;;  %6786 = vmatprep.mubr.msk.f32.mxu1 %vm3245_vm7, %v3115_v23 }
 0x7f6   :  { %7263 = vmatprep.subr.bf16.mxu0 %v9107_v46  ;;  %v3231_v32 = vpop.f32.mrb[133].mxu0 }
 0x7f7   :  { %6775 = vmatprep.mubr.msk.f32.mxu0 %vm3245_vm7, %v3231_v32  ;;  %v6743_v55 = vpop.f32.mrb[232].mxu1 }
 0x7f8   :  { %6776 = vmatmul.mubr.msk.f32.gmra.mrb[136].mxu0 %vm3245_vm7, %v6763_v9  ;;  %v3125_v62 = vpop.f32.mrb[233].mxu1 }
 0x7f9   :  { %7265 = vmatpush3.bf16.msra.mxu0 %v9107_v46  ;;  %6806 = vmatprep.mubr.msk.f32.mxu0 %vm3036_vm6, %v6008_v1 }
 0x7fa   :  { %7267 = vmatprep.subr.bf16.mxu0 %v9113_v5 }
 0x7fd   :  { %7269 = vmatpush3.bf16.msra.mxu0 %v9113_v5 }
 0x7fe   :  { %6804 = vmatprep.subr.mxu0 %v9115_v11 }
 0x801   :  { %6805 = vmatpush3.msra.mxu0 %v9115_v11 }
 0x802   :  { %7279 = vmatprep.subr.bf16.mxu0 %v9101_v33  ;;  %6807 = vmatmul.mubr.msk.f32.vlgmr.msra.gmra.mrb[138].mxu0 %vm3036_vm6, %v6009_v58 }
 0x803   :  { %7281 = vmatpush3.bf16.msra.mxu0 %v9101_v33  ;;  %6809 = vmatprep.mubr.msk.f32.mxu0 %vm3036_vm6, %v6010_v29  ;;  %v7254_v33 = vpack.c.bf16 %v3137_v3, %v3136_v63  ;;  %v4186_v63 = vld [vmem:[%s9429_s11 + $0x40] sm:$0xff] }
 0x804   :  { %7283 = vmatprep.subr.bf16.mxu0 %v9107_v46  ;;  %v4190_v3 = vld [vmem:[%s9429_s11 + $0x60] sm:$0xff] }
 0x805   :  { %7255 = vmatprep.subr.bf16.mxu1 %v7254_v33  ;;  %v6046_v38 = vcombine.high %v4186_v63, %v4190_v3  ;;  %v6045_v23 = vcombine.low %v4186_v63, %v4190_v3  ;;  %v4204_v63 = vld [vmem:[%s9429_s11 + $0xd0] sm:$0xff] }
 0x806   :  { %6810 = vmatmul.mubr.msk.f32.gmra.mrb[140].mxu0 %vm3036_vm6, %v6011_v16  ;;  %7257 = vmatpush3.bf16.msra.mxu1 %v7254_v33  ;;  %v3875_v16 = vld [vmem:[#allocation10] sm:$0xff]  ;;  %v4026_v33 = vld [vmem:[#allocation10 + $0x10] sm:$0xff] }
 0x807   :  { %7285 = vmatpush3.bf16.msra.mxu0 %v9107_v46  ;;  %6840 = vmatprep.mubr.msk.f32.mxu0 %vm3036_vm6, %v6020_v49  ;;  %v3950_v49 = vld [vmem:[#allocation10 + $0x8] sm:$0xff] }
 0x808   :  { %7287 = vmatprep.subr.bf16.mxu0 %v9113_v5  ;;  %7271 = vmatprep.subr.bf16.mxu1 %v7270_v44  ;;  %v4208_v3 = vld [vmem:[%s9429_s11 + $0xf0] sm:$0xff] }
 0x809   :  { %6787 = vmatmul.mubr.msk.f32.vlgmr.msra.gmra.mrb[234].mxu1 %vm3245_vm7, %v6740_v52 }
 0x80a   :  { %7273 = vmatpush3.bf16.msra.mxu1 %v7270_v44  ;;  %6789 = vmatprep.mubr.msk.f32.mxu1 %vm3245_vm7, %v3125_v62  ;;  %v4198_v62 = vld [vmem:[%s9429_s11 + $0xa0] sm:$0xff] }
 0x80b   :  { %7289 = vmatpush3.bf16.msra.mxu0 %v9113_v5  ;;  %7275 = vmatprep.subr.bf16.mxu1 %v7274_v54 }
 0x80c   :  { %6838 = vmatprep.subr.mxu0 %v9115_v11 }
 0x80d   :  { %6790 = vmatmul.mubr.msk.f32.gmra.mrb[236].mxu1 %vm3245_vm7, %v6743_v55  ;;  %v4194_v55 = vld [vmem:[%s9429_s11 + $0x80] sm:$0xff] }
 0x80e   :  { %7277 = vmatpush3.bf16.msra.mxu1 %v7274_v54  ;;  %v6053_v13 = vcombine.low %v4194_v55, %v4198_v62 }
 0x80f   :  { %6839 = vmatpush3.msra.mxu0 %v9115_v11  ;;  %7291 = vmatprep.subr.bf16.mxu1 %v7290_v28 }
 0x810   :  { %6841 = vmatmul.mubr.msk.f32.vlgmr.msra.gmra.mrb[142].mxu0 %vm3036_vm6, %v6021_v41  ;;  %7298 = vmatprep.subr.bf16.mxu0 %v7860_v37  ;;  %v4178_v41 = vld [vmem:[%s9429_s11] sm:$0xff] }
 0x811   :  { %6843 = vmatprep.mubr.msk.f32.mxu0 %vm3036_vm6, %v6022_v10  ;;  %v4182_v10 = vld [vmem:[%s9429_s11 + $0x20] sm:$0xff] }
 0x812   :  { %v6038_v19 = vcombine.high %v4178_v41, %v4182_v10  ;;  %v6037_v44 = vcombine.low %v4178_v41, %v4182_v10  ;;  %v4197_v41 = vld [vmem:[%s9429_s11 + $0x98] sm:$0xff] }
 0x813   :  { %v4201_v10 = vld [vmem:[%s9429_s11 + $0xb8] sm:$0xff] }
 0x814   :  { %6844 = vmatmul.mubr.msk.f32.gmra.mrb[144].mxu0 %vm3036_vm6, %v6023_v30  ;;  %v4179_v30 = vld [vmem:[%s9429_s11 + $0x8] sm:$0xff] }
 0x815   :  { %6868 = vmatprep.mubr.msk.f32.mxu0 %vm7862_vm4, %v7861_v8  ;;  %v6040_v24 = vcombine.high %v4179_v30, %v4183_v18  ;;  %v6039_v43 = vcombine.low %v4179_v30, %v4183_v18 }
 0x8c7   :  { %v6774_v46 = vpop.f32.mrb[134].mxu0 }
 0x8c8   :  { %v3324_v57 = vpop.f32.mrb[135].mxu0 }
 0x8cb   :  { %v6777_v0 = vpop.f32.mrb[136].mxu0 }
 0x8cc   :  { %v3334_v61 = vpop.f32.mrb[137].mxu0 }
 0x8d5   :  { %v6808_v45 = vpop.f32.mrb[138].mxu0 }
 0x8d6   :  { %v3523_v40 = vpop.f32.mrb[139].mxu0 }
 0x8d7   :  { %6820 = vmatprep.mubr.msk.f32.mxu1 %vm3245_vm7, %v3523_v40  ;;  %v4207_v40 = vld [vmem:[%s9429_s11 + $0xe8] sm:$0xff] }
 0x8d8   :  { %6821 = vmatmul.mubr.msk.f32.vlgmr.msra.gmra.mrb[234].mxu1 %vm3245_vm7, %v6808_v45 }
 0x8d9   :  { %v6811_v36 = vpop.f32.mrb[140].mxu0  ;;  %7293 = vmatpush3.bf16.msra.mxu1 %v7290_v28  ;;  %v6054_v28 = vcombine.high %v4194_v55, %v4198_v62  ;;  %v7376_v55 = vld [vmem:[#allocation12 + $0x14] ss:$8 sps:$4 sm:$0xff]   ;;  %v7374_v62 = vld [vmem:[#allocation12 + $0x10] ss:$8 sps:$4 sm:$0xff]  }
 0x8da   :  { %v3533_v60 = vpop.f32.mrb[141].mxu0  ;;  %7295 = vmatprep.subr.bf16.mxu1 %v7294_v4 }
 0x8db   :  { %6823 = vmatprep.mubr.msk.f32.mxu1 %vm3245_vm7, %v3533_v60  ;;  %v6064_v60 = vcombine.high %v4203_v35, %v4207_v40 }
 0x8dc   :  { %6824 = vmatmul.mubr.msk.f32.gmra.mrb[236].mxu1 %vm3245_vm7, %v6811_v36  ;;  %v6063_v36 = vcombine.low %v4203_v35, %v4207_v40  ;;  %v7391_v35 = vld [vmem:[#allocation12 + $0x64] ss:$8 sps:$4 sm:$0xff]   ;;  %v7394_v40 = vld [vmem:[#allocation12 + $0x74] ss:$8 sps:$4 sm:$0xff]  }
 0x8dd   :  { %7297 = vmatpush3.bf16.msra.mxu1 %v7294_v4 }
 0x8de   :  { %7304 = vmatprep.subr.bf16.mxu1 %v7860_v37 }
 0x8e3   :  { %v6842_v56 = vpop.f32.mrb[142].mxu0 }
 0x8e4   :  { %v3731_v2 = vpop.f32.mrb[143].mxu0 }
 0x8e5   :  { %6854 = vmatprep.mubr.msk.f32.mxu1 %vm3245_vm7, %v3731_v2  ;;  %v4184_v2 = vld [vmem:[%s9429_s11 + $0x30] sm:$0xff] }
 0x8e6   :  { %6855 = vmatmul.mubr.msk.f32.vlgmr.msra.gmra.mrb[234].mxu1 %vm3245_vm7, %v6842_v56  ;;  %v4180_v56 = vld [vmem:[%s9429_s11 + $0x10] sm:$0xff] }
 0x8e7   :  { %v6845_v5 = vpop.f32.mrb[144].mxu0 }
 0x8e8   :  { %v3741_v51 = vpop.f32.mrb[145].mxu0 }
 0x8e9   :  { %6857 = vmatprep.mubr.msk.f32.mxu1 %vm3245_vm7, %v3741_v51  ;;  %v6042_v51 = vcombine.high %v4180_v56, %v4184_v2 }
 0x8ea   :  { %6858 = vmatmul.mubr.msk.f32.gmra.mrb[236].mxu1 %vm3245_vm7, %v6845_v5  ;;  %v4181_v5 = vld [vmem:[%s9429_s11 + $0x18] sm:$0xff] }
 0x8eb   :  { %6879 = vmatprep.mubr.msk.f32.mxu1 %vm7862_vm4, %v7861_v8 }
 0x9b9   :  { %v6856_v42 = vpop.f32.mrb[234].mxu1 }
 0x9ba   :  { %v7322_v7 = vadd.f32 %v6856_v42, %v6774_v46  ;;  %v3833_v17 = vpop.f32.mrb[235].mxu1  ;;  %v4199_v46 = vld [vmem:[%s9429_s11 + $0xa8] sm:$0xff]  ;;  %v4185_v42 = vld [vmem:[%s9429_s11 + $0x38] sm:$0xff] }
 0x9bb   :  { %v7323_v11 = vadd.f32 %v3833_v17, %v3324_v57  ;;  %v6055_v57 = vcombine.low %v4195_v27, %v4199_v46  ;;  %v6044_v17 = vcombine.high %v4181_v5, %v4185_v42 }
 0x9bc   :  { %v3864_v47 = vadd.f32 %v7322_v7, %v6032_v12  ;;  %v6043_v7 = vcombine.low %v4181_v5, %v4185_v42  ;;  %v7403_v5 = vld [vmem:[#allocation12 + $0xa4] ss:$8 sps:$4 sm:$0xff]   ;;  %v7406_v42 = vld [vmem:[#allocation12 + $0xb4] ss:$8 sps:$4 sm:$0xff]  }
 0x9bd   :  { %v3863_v39 = vadd.f32 %v7323_v11, %v6032_v12  ;;  %v6859_v6 = vpop.f32.mrb[236].mxu1  ;;  %v7863_v11 = vmov 0  }
 0x9be   :  { %v3868_v15 = vmul.f32 0.01, %v3864_v47  ;;  %v7324_v25 = vadd.f32 %v6859_v6, %v6777_v0  ;;  %v3843_v26 = vpop.f32.mrb[237].mxu1  ;;  %v6056_v0 = vcombine.high %v4195_v27, %v4199_v46  ;;  %v7379_v27 = vld [vmem:[#allocation12 + $0x24] ss:$8 sps:$4 sm:$0xff]  }
 0x9bf   :  { %v3867_v21 = vmul.f32 0.01, %v3863_v39  ;;  %v7325_v50 = vadd.f32 %v3843_v26, %v3334_v61  ;;  %v4202_v61 = vld [vmem:[%s9429_s11 + $0xc0] sm:$0xff]  ;;  %v7380_v46 = vld [vmem:[#allocation12 + $0x30] ss:$8 sps:$4 sm:$0xff]  }
 0x9c0   :  { %v3872_v31 = vmax.f32 %v3864_v47, %v3868_v15  ;;  %v3866_v48 = vadd.f32 %v7324_v25, %v6032_v12  ;;  %v6062_v45 = vcombine.high %v4202_v61, %v4206_v34  ;;  %v6061_v4 = vcombine.low %v4202_v61, %v4206_v34  ;;  %v7388_v61 = vld [vmem:[#allocation12 + $0x54] ss:$8 sps:$4 sm:$0xff]   ;;  %v7386_v34 = vld [vmem:[#allocation12 + $0x50] ss:$8 sps:$4 sm:$0xff]  }
 0x9c1   :  { %v3871_v53 = vmax.f32 %v3863_v39, %v3867_v21  ;;  %v3865_v22 = vadd.f32 %v7325_v50, %v6032_v12  ;;  %v6041_v12 = vcombine.low %v4180_v56, %v4184_v2  ;;  %v7400_v56 = vld [vmem:[#allocation12 + $0x94] ss:$8 sps:$4 sm:$0xff]   ;;  %v7398_v2 = vld [vmem:[#allocation12 + $0x90] ss:$8 sps:$4 sm:$0xff]  }
 0x9c2   :  { %v3870_v14 = vmul.f32 0.01, %v3866_v48 }
 0x9c3   :  { %v7299_v9 = vpack.c.bf16 %v3872_v31, %v3871_v53  ;;  %v3869_v32 = vmul.f32 0.01, %v3865_v22 }
 0x9c4   :  { %v3874_v1 = vmax.f32 %v3866_v48, %v3870_v14  ;;  %v4188_v48 = vld [vmem:[%s9429_s11 + $0x50] sm:$0xff]  ;;  %v4189_v14 = vld [vmem:[%s9429_s11 + $0x58] sm:$0xff] }
 0x9c5   :  { %v3873_v58 = vmax.f32 %v3865_v22, %v3869_v32  ;;  %7300 = vmatpush3.bf16.msra.mxu0 %v7299_v9  ;;  %7306 = vmatpush3.bf16.msra.mxu1 %v7299_v9  ;;  %v4192_v22 = vld [vmem:[%s9429_s11 + $0x70] sm:$0xff] }
 0x9c6   :  { %7301 = vmatprep.subr.bf16.mxu0 %v7860_v37  ;;  %7307 = vmatprep.subr.bf16.mxu1 %v7860_v37  ;;  %v6049_v30 = vcombine.low %v4188_v48, %v4192_v22 }
 0x9c7   :  { %v7302_v29 = vpack.c.bf16 %v3874_v1, %v3873_v58  ;;  %v6050_v58 = vcombine.high %v4188_v48, %v4192_v22  ;;  %v9343_v48 = vld [vmem:[%s9430_s12] sm:$0xff] }
 0x9c9   :  { %7303 = vmatpush3.bf16.msra.mxu0 %v7302_v29  ;;  %7309 = vmatpush3.bf16.msra.mxu1 %v7302_v29 }
 0x9ca   :  { %7310 = vmatprep.subr.bf16.mxu0 %v7860_v37  ;;  %7316 = vmatprep.subr.bf16.mxu1 %v7860_v37 }
 0x9cc   :  { %6869 = vmatmul.mubr.msk.f32.vlgmr.msra.gmra.mrb[146].mxu0 %vm3245_vm7, %v3875_v16  ;;  %6880 = vmatmul.mubr.msk.f32.vlgmr.msra.gmra.mrb[238].mxu1 %vm3245_vm7, %v3950_v49  ;;  %v4196_v16 = vld [vmem:[%s9429_s11 + $0x90] sm:$0xff] }
 0x9cd   :  { %7312 = vmatpush3.bf16.msra.mxu0 %v7299_v9  ;;  %7318 = vmatpush3.bf16.msra.mxu1 %v7299_v9  ;;  %v4193_v9 = vld [vmem:[%s9429_s11 + $0x78] sm:$0xff]  ;;  %v4200_v49 = vld [vmem:[%s9429_s11 + $0xb0] sm:$0xff] }
 0x9ce   :  { %7313 = vmatprep.subr.bf16.mxu0 %v7860_v37  ;;  %7319 = vmatprep.subr.bf16.mxu1 %v7860_v37  ;;  %v4187_v37 = vld [vmem:[%s9429_s11 + $0x48] sm:$0xff]  ;;  %v6051_v18 = vcombine.low %v4189_v14, %v4193_v9 }
 0x9cf   :  { %6890 = vmatprep.mubr.msk.f32.mxu0 %vm7862_vm4, %v7861_v8  ;;  %6901 = vmatprep.mubr.msk.f32.mxu1 %vm7862_vm4, %v7861_v8  ;;  %v6048_v52 = vcombine.high %v4187_v37, %v4191_v20  ;;  %v6047_v54 = vcombine.low %v4187_v37, %v4191_v20  ;;  %v4205_v37 = vld [vmem:[%s9429_s11 + $0xd8] sm:$0xff] }
 0x9d0   :  { %v4209_v20 = vld [vmem:[%s9429_s11 + $0xf8] sm:$0xff] }
 0x9d1   :  { %7315 = vmatpush3.bf16.msra.mxu0 %v7302_v29  ;;  %7321 = vmatpush3.bf16.msra.mxu1 %v7302_v29  ;;  %v6052_v29 = vcombine.high %v4189_v14, %v4193_v9 }
 0x9d2   :  { %4416 = vmatprep.subr.bf16.mxu0 %v6038_v19  ;;  %4457 = vmatprep.subr.bf16.mxu1 %v6040_v24  ;;  %v6058_v19 = vcombine.high %v4196_v16, %v4200_v49  ;;  %v6060_v24 = vcombine.high %v4197_v41, %v4201_v10 }
 0x9d4   :  { %6891 = vmatmul.mubr.msk.f32.vlgmr.msra.gmra.mrb[148].mxu0 %vm3245_vm7, %v4026_v33  ;;  %6902 = vmatmul.mubr.msk.f32.vlgmr.msra.gmra.mrb[240].mxu1 %vm3245_vm7, %v4102_v59  ;;  %v6057_v33 = vcombine.low %v4196_v16, %v4200_v49  ;;  %v6059_v59 = vcombine.low %v4197_v41, %v4201_v10 }
 0x9d5   :  { %4417 = vmatpush1.bf16.msra.mxu0 %v6037_v44  ;;  %4458 = vmatpush1.bf16.msra.mxu1 %v6039_v43  ;;  %v6066_v44 = vcombine.high %v4204_v63, %v4208_v3  ;;  %v6068_v43 = vcombine.high %v4205_v37, %v4209_v20 }
 0x9d6   :  { %4418 = vmatprep.subr.bf16.mxu0 %v6046_v38  ;;  %4459 = vmatprep.subr.bf16.mxu1 %v6048_v52  ;;  %v6065_v38 = vcombine.low %v4204_v63, %v4208_v3  ;;  %v6067_v52 = vcombine.low %v4205_v37, %v4209_v20 }
 0x9d7   :  { %4448 = vmatprep.mubr.bf16.mxu0 %v7863_v11  ;;  %4489 = vmatprep.mubr.bf16.mxu1 %v7863_v11 }
 0x9d9   :  { %4419 = vmatpush1.bf16.msra.mxu0 %v6045_v23  ;;  %4460 = vmatpush1.bf16.msra.mxu1 %v6047_v54  ;;  %v7373_v23 = vld [vmem:[#allocation12 + $0x4] ss:$8 sps:$4 sm:$0xff]   ;;  %v7371_v54 = vld [vmem:[#allocation12] ss:$8 sps:$4 sm:$0xff]  }
 0x9da   :  { %4420 = vmatprep.subr.bf16.mxu0 %v6054_v28  ;;  %4461 = vmatprep.subr.bf16.mxu1 %v6056_v0  ;;  %v7382_v28 = vld [vmem:[#allocation12 + $0x34] ss:$8 sps:$4 sm:$0xff]   ;;  %v7383_v0 = vld [vmem:[#allocation12 + $0x40] ss:$8 sps:$4 sm:$0xff]  }
 0x9dd   :  { %4421 = vmatpush1.bf16.msra.mxu0 %v6053_v13  ;;  %4462 = vmatpush1.bf16.msra.mxu1 %v6055_v57  ;;  %v7377_v13 = vld [vmem:[#allocation12 + $0x20] ss:$8 sps:$4 sm:$0xff]   ;;  %v7385_v57 = vld [vmem:[#allocation12 + $0x44] ss:$8 sps:$4 sm:$0xff]  }
 0x9de   :  { %4422 = vmatprep.subr.bf16.mxu0 %v6062_v45  ;;  %4463 = vmatprep.subr.bf16.mxu1 %v6064_v60  ;;  %v7389_v45 = vld [vmem:[#allocation12 + $0x60] ss:$8 sps:$4 sm:$0xff]  }
 0x9df   :  { %v7395_v60 = vld [vmem:[#allocation12 + $0x80] ss:$8 sps:$4 sm:$0xff]  }
 0x9e1   :  { %4423 = vmatpush1.bf16.msra.mxu0 %v6061_v4  ;;  %4464 = vmatpush1.bf16.msra.mxu1 %v6063_v36  ;;  %v7392_v4 = vld [vmem:[#allocation12 + $0x70] ss:$8 sps:$4 sm:$0xff]   ;;  %v7397_v36 = vld [vmem:[#allocation12 + $0x84] ss:$8 sps:$4 sm:$0xff]  }
 0x9e2   :  { %4498 = vmatprep.subr.bf16.mxu0 %v6042_v51  ;;  %4539 = vmatprep.subr.bf16.mxu1 %v6044_v17  ;;  %v7401_v51 = vld [vmem:[#allocation12 + $0xa0] ss:$8 sps:$4 sm:$0xff]  }
 0x9e3   :  { %v7407_v17 = vld [vmem:[#allocation12 + $0xc0] ss:$8 sps:$4 sm:$0xff]  }
 0xa9f   :  { %v3945_v47 = vpop.f32.mrb[146].mxu0  ;;  %v4020_v39 = vpop.f32.mrb[238].mxu1 }
 0xaa0   :  { %v4024_v6 = vmax.f32 %v3945_v47, %v4020_v39  ;;  %v6870_v15 = vpop.f32.mrb[147].mxu0  ;;  %v6881_v25 = vpop.f32.mrb[239].mxu1  ;;  %v7410_v47 = vld [vmem:[#allocation12 + $0xd0] ss:$8 sps:$4 sm:$0xff]   ;;  %v7415_v39 = vld [vmem:[#allocation12 + $0xe4] ss:$8 sps:$4 sm:$0xff]  }
 0xaa1   :  { %v7418_v15 = vld [vmem:[#allocation12 + $0xf4] ss:$8 sps:$4 sm:$0xff]   ;;  %v7416_v25 = vld [vmem:[#allocation12 + $0xf0] ss:$8 sps:$4 sm:$0xff]  }
 0xaa7   :  { %v4096_v26 = vpop.f32.mrb[148].mxu0  ;;  %v4172_v21 = vpop.f32.mrb[240].mxu1 }
 0xaa8   :  { %v4100_v50 = vmax.f32 %v4024_v6, %v4096_v26  ;;  %v6892_v31 = vpop.f32.mrb[149].mxu0  ;;  %v6903_v53 = vpop.f32.mrb[241].mxu1  ;;  %v7413_v6 = vld [vmem:[#allocation12 + $0xe0] ss:$8 sps:$4 sm:$0xff]   ;;  %v7421_v26 = vld [vmem:[#allocation12 + $0x104] ss:$8 sps:$4 sm:$0xff]  }
 0xaaa   :  { %v4176_v32 = vmax.f32 %v4100_v50, %v4172_v21  ;;  %v4212_v21 = vlaneseq }
 0xaac   :  { %v4177_v1 = vpack.c.bf16 %v4176_v32, %v4176_v32  ;;  %v9337_v50 = vshrl.u32 %v4212_v21, 7  ;;  %v7455_v21 = vld [vmem:[#allocation12 + $0x1c0] ss:$8 sps:$4 sm:$0xff]  }
 0xaae   :  { %6069 = vmatmul.mubr.msk.bf16.vlgmr.msra.gmra.mrb[152].mxu0 %vm4412_vm8, %v4177_v1  ;;  %6070 = vmatmul.mubr.msk.bf16.vlgmr.msra.gmra.mrb[244].mxu1 %vm4412_vm8, %v4177_v1  ;;  %v4214_v31 = vsub.s32 0, %v9337_v50  ;;  %v4218_v53 = vsub.s32 1, %v9337_v50  ;;  %v4226_v22 = vsub.s32 3, %v9337_v50 }
 0xaaf   :  { %4499 = vmatpush1.bf16.msra.mxu0 %v6041_v12  ;;  %4540 = vmatpush1.bf16.msra.mxu1 %v6043_v7  ;;  %v7404_v12 = vld [vmem:[#allocation12 + $0xb0] ss:$8 sps:$4 sm:$0xff]   ;;  %v7409_v7 = vld [vmem:[#allocation12 + $0xc4] ss:$8 sps:$4 sm:$0xff]  }
 0xab0   :  { %4500 = vmatprep.subr.bf16.mxu0 %v6050_v58  ;;  %4541 = vmatprep.subr.bf16.mxu1 %v6052_v29  ;;  %v4215_v14 = vrot.slane %v9343_v48, %v4214_v31  ;;  %v4219_v9 = vrot.slane %v9343_v48, %v4218_v53  ;;  %v4227_v32 = vrot.slane %v9343_v48, %v4226_v22 }
 0xab1   :  { %4530 = vmatprep.mubr.bf16.mxu0 %v7863_v11  ;;  %4571 = vmatprep.mubr.bf16.mxu1 %v7863_v11  ;;  %v7412_v11 = vld [vmem:[#allocation12 + $0xd4] ss:$8 sps:$4 sm:$0xff]  }
 0xab3   :  { %4501 = vmatpush1.bf16.msra.mxu0 %v6049_v30  ;;  %4542 = vmatpush1.bf16.msra.mxu1 %v6051_v18 }
 0xab4   :  { %4502 = vmatprep.subr.bf16.mxu0 %v6058_v19  ;;  %4543 = vmatprep.subr.bf16.mxu1 %v6060_v24 }
 0xab7   :  { %4503 = vmatpush1.bf16.msra.mxu0 %v6057_v33  ;;  %4544 = vmatpush1.bf16.msra.mxu1 %v6059_v59 }
 0xab8   :  { %4504 = vmatprep.subr.bf16.mxu0 %v6066_v44  ;;  %4545 = vmatprep.subr.bf16.mxu1 %v6068_v43  ;;  %v7419_v43 = vld [vmem:[#allocation12 + $0x100] ss:$8 sps:$4 sm:$0xff]  }
 0xabb   :  { %4505 = vmatpush1.bf16.msra.mxu0 %v6065_v38  ;;  %4546 = vmatpush1.bf16.msra.mxu1 %v6067_v52  ;;  %v7424_v52 = vld [vmem:[#allocation12 + $0x114] ss:$8 sps:$4 sm:$0xff]  }
 0xabc   :  { %5384 = vmatprep.subr.bf16.mxu0 %v7373_v23 }
 0xabe   :  { %6071 = vmatmul.mubr.msk.bf16.vlgmr.msra.gmra.mrb[156].mxu0 %vm4412_vm8, %v4177_v1  ;;  %6072 = vmatmul.mubr.msk.bf16.vlgmr.msra.gmra.mrb[248].mxu1 %vm4412_vm8, %v4177_v1 }
 0xabf   :  { %5385 = vmatpush1.bf16.msra.mxu0 %v7371_v54  ;;  %v7422_v54 = vld [vmem:[#allocation12 + $0x110] ss:$8 sps:$4 sm:$0xff]  }
 0xac0   :  { %5386 = vmatprep.subr.bf16.mxu0 %v7376_v55  ;;  %v7427_v55 = vld [vmem:[#allocation12 + $0x124] ss:$8 sps:$4 sm:$0xff]  }
 0xac3   :  { %5387 = vmatpush1.bf16.msra.mxu0 %v7374_v62 }
 0xac4   :  { %5388 = vmatprep.subr.bf16.mxu0 %v7379_v27 }
 0xac7   :  { %5389 = vmatpush1.bf16.msra.mxu0 %v7377_v13  ;;  %v7425_v13 = vld [vmem:[#allocation12 + $0x120] ss:$8 sps:$4 sm:$0xff]  }
 0xac8   :  { %5390 = vmatprep.subr.bf16.mxu0 %v7382_v28 }
 0xacb   :  { %5391 = vmatpush1.bf16.msra.mxu0 %v7380_v46 }
 0xacc   :  { %5392 = vmatprep.subr.bf16.mxu0 %v7385_v57  ;;  %v7430_v57 = vld [vmem:[#allocation12 + $0x134] ss:$8 sps:$4 sm:$0xff]  }
 0xacf   :  { %5393 = vmatpush1.bf16.msra.mxu0 %v7383_v0 }
 0xad0   :  { %5394 = vmatprep.subr.bf16.mxu0 %v7388_v61 }
 0xad3   :  { %5395 = vmatpush1.bf16.msra.mxu0 %v7386_v34 }
 0xad4   :  { %5396 = vmatprep.subr.bf16.mxu0 %v7391_v35 }
 0xad7   :  { %5397 = vmatpush1.bf16.msra.mxu0 %v7389_v45  ;;  %v7428_v45 = vld [vmem:[#allocation12 + $0x130] ss:$8 sps:$4 sm:$0xff]  }
 0xad8   :  { %5398 = vmatprep.subr.bf16.mxu0 %v7394_v40  ;;  %v7433_v40 = vld [vmem:[#allocation12 + $0x144] ss:$8 sps:$4 sm:$0xff]  }
 0xadb   :  { %5399 = vmatpush1.bf16.msra.mxu0 %v7392_v4  ;;  %v7431_v4 = vld [vmem:[#allocation12 + $0x140] ss:$8 sps:$4 sm:$0xff]  }
 0xadc   :  { %5400 = vmatprep.subr.bf16.mxu0 %v7397_v36  ;;  %v7436_v36 = vld [vmem:[#allocation12 + $0x154] ss:$8 sps:$4 sm:$0xff]  }
 0xadf   :  { %5401 = vmatpush1.bf16.msra.mxu0 %v7395_v60  ;;  %v7434_v60 = vld [vmem:[#allocation12 + $0x150] ss:$8 sps:$4 sm:$0xff]  }
 0xae0   :  { %5402 = vmatprep.subr.bf16.mxu0 %v7400_v56  ;;  %v7439_v56 = vld [vmem:[#allocation12 + $0x164] ss:$8 sps:$4 sm:$0xff]  }
 0xae3   :  { %5403 = vmatpush1.bf16.msra.mxu0 %v7398_v2  ;;  %v7437_v2 = vld [vmem:[#allocation12 + $0x160] ss:$8 sps:$4 sm:$0xff]  }
 0xae4   :  { %5404 = vmatprep.subr.bf16.mxu0 %v7403_v5  ;;  %v7442_v5 = vld [vmem:[#allocation12 + $0x174] ss:$8 sps:$4 sm:$0xff]  }
 0xae7   :  { %5405 = vmatpush1.bf16.msra.mxu0 %v7401_v51  ;;  %v7440_v51 = vld [vmem:[#allocation12 + $0x170] ss:$8 sps:$4 sm:$0xff]  }
 0xae8   :  { %5406 = vmatprep.subr.bf16.mxu0 %v7406_v42  ;;  %v7445_v42 = vld [vmem:[#allocation12 + $0x184] ss:$8 sps:$4 sm:$0xff]  }
 0xaeb   :  { %5407 = vmatpush1.bf16.msra.mxu0 %v7404_v12  ;;  %v7443_v12 = vld [vmem:[#allocation12 + $0x180] ss:$8 sps:$4 sm:$0xff]  }
 0xaec   :  { %5408 = vmatprep.subr.bf16.mxu0 %v7409_v7  ;;  %v7448_v7 = vld [vmem:[#allocation12 + $0x194] ss:$8 sps:$4 sm:$0xff]  }
 0xaef   :  { %5409 = vmatpush1.bf16.msra.mxu0 %v7407_v17  ;;  %v7446_v17 = vld [vmem:[#allocation12 + $0x190] ss:$8 sps:$4 sm:$0xff]  }
 0xaf0   :  { %5410 = vmatprep.subr.bf16.mxu0 %v7412_v11  ;;  %v7451_v11 = vld [vmem:[#allocation12 + $0x1a4] ss:$8 sps:$4 sm:$0xff]  }
 0xaf3   :  { %5411 = vmatpush1.bf16.msra.mxu0 %v7410_v47  ;;  %v7449_v47 = vld [vmem:[#allocation12 + $0x1a0] ss:$8 sps:$4 sm:$0xff]  }
 0xaf4   :  { %5412 = vmatprep.subr.bf16.mxu0 %v7415_v39  ;;  %v7454_v39 = vld [vmem:[#allocation12 + $0x1b4] ss:$8 sps:$4 sm:$0xff]  }
 0xaf7   :  { %5413 = vmatpush1.bf16.msra.mxu0 %v7413_v6  ;;  %v7452_v6 = vld [vmem:[#allocation12 + $0x1b0] ss:$8 sps:$4 sm:$0xff]  }
 0xaf8   :  { %5414 = vmatprep.subr.bf16.mxu0 %v7418_v15  ;;  %v4222_v15 = vsub.s32 2, %v9337_v50 }
 0xafa   :  { %v4223_v22 = vrot.slane %v9343_v48, %v4222_v15  ;;  %v7505_v15 = vld [vmem:[#allocation12 + $0x2c4] ss:$8 sps:$4 sm:$0xff]  }
 0xafb   :  { %5415 = vmatpush1.bf16.msra.mxu0 %v7416_v25  ;;  %v7457_v25 = vld [vmem:[#allocation12 + $0x1c4] ss:$8 sps:$4 sm:$0xff]  }
 0xafc   :  { %5425 = vmatprep.subr.bf16.mxu0 %v7421_v26  ;;  %v4234_v26 = vsub.s32 5, %v9337_v50 }
 0xb81   :  { %v4450_v1 = vpop.f32.mrb[152].mxu0  ;;  %v9354_v58 = vpop.f32.mrb[244].mxu1 }
 0xb82   :  { %v4451_v29 = vadd.f32 %v4450_v1, %v4215_v14  ;;  %v4452_v16 = vpop.f32.mrb[153].mxu0  ;;  %v4493_v49 = vpop.f32.mrb[245].mxu1  ;;  %v7460_v14 = vld [vmem:[#allocation12 + $0x1d4] ss:$8 sps:$4 sm:$0xff]   ;;  %v4492_v1 = vadd.f32 %v9354_v58, %v4223_v22 }
 0xb83   :  { %v4453_v41 = vadd.f32 %v4452_v16, %v4219_v9  ;;  %v4494_v10 = vadd.f32 %v4493_v49, %v4227_v32  ;;  %v4454_v30 = vpop.f32.mrb[154].mxu0  ;;  %v4495_v18 = vpop.f32.mrb[246].mxu1  ;;  %v4235_v9 = vrot.slane %v9343_v48, %v4234_v26  ;;  %v7458_v32 = vld [vmem:[#allocation12 + $0x1d0] ss:$8 sps:$4 sm:$0xff]   ;;  %v7461_v49 = vld [vmem:[#allocation12 + $0x1e0] ss:$8 sps:$4 sm:$0xff]  }
 0xb84   :  { %v4580_v19 = vmul.f32 0.01, %v4451_v29  ;;  %v4455_v24 = vpop.f32.mrb[155].mxu0  ;;  %v4496_v63 = vpop.f32.mrb[247].mxu1  ;;  %v7464_v18 = vld [vmem:[#allocation12 + $0x1f0] ss:$8 sps:$4 sm:$0xff]  }
 0xb85   :  { %v4581_v3 = vmul.f32 0.01, %v4453_v41  ;;  %v4583_v37 = vmul.f32 0.01, %v4494_v10  ;;  %v7469_v24 = vld [vmem:[#allocation12 + $0x204] ss:$8 sps:$4 sm:$0xff]  }
 0xb86   :  { %v4588_v20 = vmax.f32 %v4451_v29, %v4580_v19  ;;  %v7463_v29 = vld [vmem:[#allocation12 + $0x1e4] ss:$8 sps:$4 sm:$0xff]   ;;  %v7472_v58 = vld [vmem:[#allocation12 + $0x214] ss:$8 sps:$4 sm:$0xff]   ;;  %v7503_v26 = vld [vmem:[#allocation12 + $0x2c0] ss:$8 sps:$4 sm:$0xff]  }
 0xb87   :  { %v4589_v33 = vmax.f32 %v4453_v41, %v4581_v3  ;;  %v4591_v59 = vmax.f32 %v4494_v10, %v4583_v37  ;;  %v4582_v41 = vmul.f32 0.01, %v4492_v1  ;;  %v7466_v10 = vld [vmem:[#allocation12 + $0x1f4] ss:$8 sps:$4 sm:$0xff]   ;;  %v7467_v3 = vld [vmem:[#allocation12 + $0x200] ss:$8 sps:$4 sm:$0xff]  }
 0xb88   :  { %v4596_v38 = vpack.c.bf16 %v4588_v20, %v4588_v20  ;;  %v7508_v22 = vld [vmem:[#allocation12 + $0x2d4] ss:$8 sps:$4 sm:$0xff]  }
 0xb89   :  { %v4597_v44 = vpack.c.bf16 %v4589_v33, %v4589_v33  ;;  %v4599_v23 = vpack.c.bf16 %v4591_v59, %v4591_v59  ;;  %v4590_v19 = vmax.f32 %v4492_v1, %v4582_v41  ;;  %v7563_v33 = vld [vmem:[#allocation15 + $0x40] sm:$0xff]   ;;  %v7514_v41 = vld [vmem:[#allocation12 + $0x2f4] ss:$8 sps:$4 sm:$0xff]  }
 0xb8a   :  { %v7564_v59 = vld [vmem:[#allocation15] sm:$0xff]   ;;  %6429 = vmatprep.subr.bf16.mxu1 %v7563_v33  ;;  %v7526_v33 = vld [vmem:[#allocation12 + $0x334] ss:$8 sps:$4 sm:$0xff]  }
 0xb8b   :  { %5416 = vmatprep.mubr.bf16.mxu0 %v4597_v44  ;;  %v4598_v37 = vpack.c.bf16 %v4590_v19, %v4590_v19  ;;  %v7565_v44 = vld [vmem:[#allocation15 + $0x48] sm:$0xff]   ;;  %6430 = vmatpush3.bf16.msra.mxu1 %v7564_v59 }
 0xb8c   :  { %5417 = vmatmul.mubr.bf16.vlgmr.msra.gmra.mrb[160].mxu0 %v4596_v38  ;;  %v7475_v38 = vld [vmem:[#allocation12 + $0x224] ss:$8 sps:$4 sm:$0xff]   ;;  %6431 = vmatprep.subr.bf16.mxu1 %v7565_v44  ;;  %v7524_v59 = vld [vmem:[#allocation12 + $0x330] ss:$8 sps:$4 sm:$0xff]  }
 0xb8d   :  { %5426 = vmatpush1.bf16.msra.mxu0 %v7419_v43  ;;  %5457 = vmatprep.mubr.bf16.mxu0 %v4599_v23  ;;  %v7470_v43 = vld [vmem:[#allocation12 + $0x210] ss:$8 sps:$4 sm:$0xff]   ;;  %v7511_v1 = vld [vmem:[#allocation12 + $0x2e4] ss:$8 sps:$4 sm:$0xff]  }
 0xb8e   :  { %5427 = vmatprep.subr.bf16.mxu0 %v7424_v52  ;;  %v7566_v52 = vld [vmem:[#allocation15 + $0x8] sm:$0xff]   ;;  %v7567_v23 = vld [vmem:[#allocation15 + $0x50] sm:$0xff]  }
 0xb8f   :  { %6432 = vmatpush3.bf16.msra.mxu1 %v7566_v52  ;;  %v7517_v19 = vld [vmem:[#allocation12 + $0x304] ss:$8 sps:$4 sm:$0xff]   ;;  %v7530_v52 = vld [vmem:[#allocation12 + $0x350] ss:$8 sps:$4 sm:$0xff]  }
 0xb90   :  { %6433 = vmatprep.subr.bf16.mxu1 %v7567_v23  ;;  %v7529_v44 = vld [vmem:[#allocation12 + $0x344] ss:$8 sps:$4 sm:$0xff]  }
 0xb91   :  { %v9356_v62 = vpop.f32.mrb[156].mxu0  ;;  %v9358_v27 = vpop.f32.mrb[248].mxu1  ;;  %5428 = vmatpush1.bf16.msra.mxu0 %v7422_v54  ;;  %v7473_v54 = vld [vmem:[#allocation12 + $0x220] ss:$8 sps:$4 sm:$0xff]   ;;  %v7535_v23 = vld [vmem:[#allocation12 + $0x364] ss:$8 sps:$4 sm:$0xff]  }
 0xb92   :  { %v4534_v28 = vpop.f32.mrb[157].mxu0  ;;  %v9360_v46 = vpop.f32.mrb[249].mxu1  ;;  %5429 = vmatprep.subr.bf16.mxu0 %v7427_v55  ;;  %v7478_v55 = vld [vmem:[#allocation12 + $0x234] ss:$8 sps:$4 sm:$0xff]  }
 0xb93   :  { %v4536_v0 = vpop.f32.mrb[158].mxu0  ;;  %v4577_v61 = vpop.f32.mrb[250].mxu1  ;;  %v4535_v16 = vadd.f32 %v4534_v28, %v4235_v9  ;;  %v7569_v28 = vld [vmem:[#allocation15 + $0x58] sm:$0xff]  }
 0xb94   :  { %v4537_v34 = vpop.f32.mrb[159].mxu0  ;;  %v4578_v35 = vpop.f32.mrb[251].mxu1  ;;  %v7481_v0 = vld [vmem:[#allocation12 + $0x244] ss:$8 sps:$4 sm:$0xff]   ;;  %v7570_v61 = vld [vmem:[#allocation15 + $0x18] sm:$0xff]  }
 0xb95   :  { %5430 = vmatpush1.bf16.msra.mxu0 %v7425_v13  ;;  %v4585_v30 = vmul.f32 0.01, %v4535_v16  ;;  %v7568_v13 = vld [vmem:[#allocation15 + $0x10] sm:$0xff]   ;;  %v7571_v34 = vld [vmem:[#allocation15 + $0x60] sm:$0xff]  }
 0xb96   :  { %5431 = vmatprep.subr.bf16.mxu0 %v7430_v57  ;;  %v7476_v57 = vld [vmem:[#allocation12 + $0x230] ss:$8 sps:$4 sm:$0xff]   ;;  %6434 = vmatpush3.bf16.msra.mxu1 %v7568_v13  ;;  %v7479_v35 = vld [vmem:[#allocation12 + $0x240] ss:$8 sps:$4 sm:$0xff]  }
 0xb97   :  { %v4593_v63 = vmax.f32 %v4535_v16, %v4585_v30  ;;  %6435 = vmatprep.subr.bf16.mxu1 %v7569_v28  ;;  %v7506_v9 = vld [vmem:[#allocation12 + $0x2d0] ss:$8 sps:$4 sm:$0xff]   ;;  %v7509_v16 = vld [vmem:[#allocation12 + $0x2e0] ss:$8 sps:$4 sm:$0xff]   ;;  %v7541_v28 = vld [vmem:[#allocation12 + $0x384] ss:$8 sps:$4 sm:$0xff]  }
 0xb98   :  { %v7512_v30 = vld [vmem:[#allocation12 + $0x2f0] ss:$8 sps:$4 sm:$0xff]  }
 0xb99   :  { %5432 = vmatpush1.bf16.msra.mxu0 %v7428_v45  ;;  %v4601_v20 = vpack.c.bf16 %v4593_v63, %v4593_v63  ;;  %v7484_v45 = vld [vmem:[#allocation12 + $0x254] ss:$8 sps:$4 sm:$0xff]   ;;  %v7515_v63 = vld [vmem:[#allocation12 + $0x300] ss:$8 sps:$4 sm:$0xff]   ;;  %v7536_v13 = vld [vmem:[#allocation12 + $0x370] ss:$8 sps:$4 sm:$0xff]  }
 0xb9a   :  { %5433 = vmatprep.subr.bf16.mxu0 %v7433_v40  ;;  %6436 = vmatpush3.bf16.msra.mxu1 %v7570_v61  ;;  %v7572_v40 = vld [vmem:[#allocation15 + $0x20] sm:$0xff]   ;;  %v7542_v61 = vld [vmem:[#allocation12 + $0x390] ss:$8 sps:$4 sm:$0xff]  }
 0xb9b   :  { %6437 = vmatprep.subr.bf16.mxu1 %v7571_v34  ;;  %v7547_v34 = vld [vmem:[#allocation12 + $0x3a4] ss:$8 sps:$4 sm:$0xff]  }
 0xb9d   :  { %5434 = vmatpush1.bf16.msra.mxu0 %v7431_v4  ;;  %v7573_v4 = vld [vmem:[#allocation15 + $0x68] sm:$0xff]  }
 0xb9e   :  { %5435 = vmatprep.subr.bf16.mxu0 %v7436_v36  ;;  %v7482_v36 = vld [vmem:[#allocation12 + $0x250] ss:$8 sps:$4 sm:$0xff]   ;;  %6438 = vmatpush3.bf16.msra.mxu1 %v7572_v40 }
 0xb9f   :  { %6439 = vmatprep.subr.bf16.mxu1 %v7573_v4  ;;  %v7548_v40 = vld [vmem:[#allocation12 + $0x3b0] ss:$8 sps:$4 sm:$0xff]   ;;  %v4238_v4 = vsub.s32 6, %v9337_v50 }
 0xba1   :  { %5436 = vmatpush1.bf16.msra.mxu0 %v7434_v60  ;;  %v7487_v60 = vld [vmem:[#allocation12 + $0x264] ss:$8 sps:$4 sm:$0xff]  }
 0xba2   :  { %5437 = vmatprep.subr.bf16.mxu0 %v7439_v56  ;;  %v7485_v56 = vld [vmem:[#allocation12 + $0x260] ss:$8 sps:$4 sm:$0xff]  }
 0xba5   :  { %5438 = vmatpush1.bf16.msra.mxu0 %v7437_v2  ;;  %v7490_v2 = vld [vmem:[#allocation12 + $0x274] ss:$8 sps:$4 sm:$0xff]  }
 0xba6   :  { %5439 = vmatprep.subr.bf16.mxu0 %v7442_v5  ;;  %v7488_v5 = vld [vmem:[#allocation12 + $0x270] ss:$8 sps:$4 sm:$0xff]  }
 0xba9   :  { %5440 = vmatpush1.bf16.msra.mxu0 %v7440_v51  ;;  %v7493_v51 = vld [vmem:[#allocation12 + $0x284] ss:$8 sps:$4 sm:$0xff]  }
 0xbaa   :  { %5441 = vmatprep.subr.bf16.mxu0 %v7445_v42  ;;  %v7491_v42 = vld [vmem:[#allocation12 + $0x280] ss:$8 sps:$4 sm:$0xff]  }
 0xbad   :  { %5442 = vmatpush1.bf16.msra.mxu0 %v7443_v12  ;;  %v7496_v12 = vld [vmem:[#allocation12 + $0x294] ss:$8 sps:$4 sm:$0xff]  }
 0xbae   :  { %5443 = vmatprep.subr.bf16.mxu0 %v7448_v7  ;;  %v7494_v7 = vld [vmem:[#allocation12 + $0x290] ss:$8 sps:$4 sm:$0xff]  }
 0xbb1   :  { %5444 = vmatpush1.bf16.msra.mxu0 %v7446_v17  ;;  %v7499_v17 = vld [vmem:[#allocation12 + $0x2a4] ss:$8 sps:$4 sm:$0xff]  }
 0xbb2   :  { %5445 = vmatprep.subr.bf16.mxu0 %v7451_v11  ;;  %v7497_v11 = vld [vmem:[#allocation12 + $0x2a0] ss:$8 sps:$4 sm:$0xff]  }
 0xbb5   :  { %5446 = vmatpush1.bf16.msra.mxu0 %v7449_v47  ;;  %v7502_v47 = vld [vmem:[#allocation12 + $0x2b4] ss:$8 sps:$4 sm:$0xff]  }
 0xbb6   :  { %5447 = vmatprep.subr.bf16.mxu0 %v7454_v39  ;;  %v7500_v39 = vld [vmem:[#allocation12 + $0x2b0] ss:$8 sps:$4 sm:$0xff]  }
 0xbb9   :  { %5448 = vmatpush1.bf16.msra.mxu0 %v7452_v6  ;;  %v4230_v6 = vsub.s32 4, %v9337_v50 }
 0xbba   :  { %5449 = vmatprep.subr.bf16.mxu0 %v7457_v25  ;;  %v4242_v25 = vsub.s32 7, %v9337_v50  ;;  %v7580_v50 = vld [vmem:[%s9435_s17 + $0x8] sm:$0xff]  }
 0xbbd   :  { %5450 = vmatpush1.bf16.msra.mxu0 %v7455_v21  ;;  %v4231_v21 = vrot.slane %v9343_v48, %v4230_v6  ;;  %v7575_v6 = vld [vmem:[#allocation15 + $0x70] sm:$0xff]  }
 0xbbe   :  { %5451 = vmatprep.subr.bf16.mxu0 %v7460_v14  ;;  %v4243_v14 = vrot.slane %v9343_v48, %v4242_v25  ;;  %v7578_v25 = vld [vmem:[#allocation15 + $0x38] sm:$0xff]  }
 0xbc1   :  { %5452 = vmatpush1.bf16.msra.mxu0 %v7458_v32  ;;  %v4533_v32 = vadd.f32 %v9356_v62, %v4231_v21  ;;  %v7520_v62 = vld [vmem:[#allocation12 + $0x314] ss:$8 sps:$4 sm:$0xff]  }
 0xbc2   :  { %5453 = vmatprep.subr.bf16.mxu0 %v7463_v29  ;;  %v4576_v29 = vadd.f32 %v9360_v46, %v4243_v14  ;;  %v7518_v46 = vld [vmem:[#allocation12 + $0x310] ss:$8 sps:$4 sm:$0xff]  }
 0xbc5   :  { %5454 = vmatpush1.bf16.msra.mxu0 %v7461_v49  ;;  %v4584_v49 = vmul.f32 0.01, %v4533_v32 }
 0xbc6   :  { %5455 = vmatprep.subr.bf16.mxu0 %v7466_v10  ;;  %v4587_v10 = vmul.f32 0.01, %v4576_v29 }
 0xbc9   :  { %5456 = vmatpush1.bf16.msra.mxu0 %v7464_v18  ;;  %v4592_v18 = vmax.f32 %v4533_v32, %v4584_v49 }
 0xbca   :  { %5466 = vmatprep.subr.bf16.mxu0 %v7469_v24  ;;  %v4595_v24 = vmax.f32 %v4576_v29, %v4587_v10 }
 0xbcc   :  { %5458 = vmatmul.mubr.bf16.vlgmr.msra.gmra.mrb[160].mxu0 %v4598_v37  ;;  %v4603_v37 = vpack.c.bf16 %v4595_v24, %v4595_v24 }
 0xbcd   :  { %5467 = vmatpush1.bf16.msra.mxu0 %v7467_v3  ;;  %5498 = vmatprep.mubr.bf16.mxu0 %v4601_v20  ;;  %v4600_v3 = vpack.c.bf16 %v4592_v18, %v4592_v18  ;;  %v7521_v20 = vld [vmem:[#allocation12 + $0x320] ss:$8 sps:$4 sm:$0xff]  }
 0xbce   :  { %5468 = vmatprep.subr.bf16.mxu0 %v7472_v58  ;;  %v7523_v58 = vld [vmem:[#allocation12 + $0x324] ss:$8 sps:$4 sm:$0xff]  }
 0xbd1   :  { %5469 = vmatpush1.bf16.msra.mxu0 %v7470_v43  ;;  %v7527_v43 = vld [vmem:[#allocation12 + $0x340] ss:$8 sps:$4 sm:$0xff]  }
 0xbd2   :  { %5470 = vmatprep.subr.bf16.mxu0 %v7475_v38  ;;  %v7532_v38 = vld [vmem:[#allocation12 + $0x354] ss:$8 sps:$4 sm:$0xff]  }
 0xbd5   :  { %5471 = vmatpush1.bf16.msra.mxu0 %v7473_v54  ;;  %v7533_v54 = vld [vmem:[#allocation12 + $0x360] ss:$8 sps:$4 sm:$0xff]  }
 0xbd6   :  { %5472 = vmatprep.subr.bf16.mxu0 %v7478_v55  ;;  %v7538_v55 = vld [vmem:[#allocation12 + $0x374] ss:$8 sps:$4 sm:$0xff]  }
 0xbd9   :  { %5473 = vmatpush1.bf16.msra.mxu0 %v7476_v57  ;;  %v7539_v57 = vld [vmem:[#allocation12 + $0x380] ss:$8 sps:$4 sm:$0xff]  }
 0xbda   :  { %5474 = vmatprep.subr.bf16.mxu0 %v7481_v0  ;;  %v7544_v0 = vld [vmem:[#allocation12 + $0x394] ss:$8 sps:$4 sm:$0xff]  }
 0xbdd   :  { %5475 = vmatpush1.bf16.msra.mxu0 %v7479_v35  ;;  %v7545_v35 = vld [vmem:[#allocation12 + $0x3a0] ss:$8 sps:$4 sm:$0xff]  }
 0xbde   :  { %5476 = vmatprep.subr.bf16.mxu0 %v7484_v45  ;;  %v7550_v45 = vld [vmem:[#allocation12 + $0x3b4] ss:$8 sps:$4 sm:$0xff]  }
 0xbe1   :  { %5477 = vmatpush1.bf16.msra.mxu0 %v7482_v36  ;;  %v7553_v36 = vld [vmem:[#allocation12 + $0x3c4] ss:$8 sps:$4 sm:$0xff]  }
 0xbe2   :  { %5478 = vmatprep.subr.bf16.mxu0 %v7487_v60  ;;  %v7551_v60 = vld [vmem:[#allocation12 + $0x3c0] ss:$8 sps:$4 sm:$0xff]  }
 0xbe5   :  { %5479 = vmatpush1.bf16.msra.mxu0 %v7485_v56  ;;  %v4239_v56 = vrot.slane %v9343_v48, %v4238_v4  ;;  %v7574_v48 = vld [vmem:[#allocation15 + $0x28] sm:$0xff]  }
 0xbe6   :  { %5480 = vmatprep.subr.bf16.mxu0 %v7490_v2  ;;  %v7556_v2 = vld [vmem:[#allocation12 + $0x3d4] ss:$8 sps:$4 sm:$0xff]   ;;  %6440 = vmatpush3.bf16.msra.mxu1 %v7574_v48 }
 0xbe7   :  { %6441 = vmatprep.subr.bf16.mxu1 %v7575_v6 }
 0xbe9   :  { %5481 = vmatpush1.bf16.msra.mxu0 %v7488_v5  ;;  %v7554_v5 = vld [vmem:[#allocation12 + $0x3d0] ss:$8 sps:$4 sm:$0xff]  }
 0xbea   :  { %5482 = vmatprep.subr.bf16.mxu0 %v7493_v51  ;;  %v4574_v51 = vadd.f32 %v9358_v27, %v4239_v56  ;;  %v7577_v27 = vld [vmem:[#allocation15 + $0x78] sm:$0xff]  }
 0xbed   :  { %5483 = vmatpush1.bf16.msra.mxu0 %v7491_v42  ;;  %v7559_v42 = vld [vmem:[#allocation12 + $0x3e4] ss:$8 sps:$4 sm:$0xff]  }
 0xbee   :  { %5484 = vmatprep.subr.bf16.mxu0 %v7496_v12  ;;  %v7557_v12 = vld [vmem:[#allocation12 + $0x3e0] ss:$8 sps:$4 sm:$0xff]  }
 0xbf1   :  { %5485 = vmatpush1.bf16.msra.mxu0 %v7494_v7  ;;  %v4586_v7 = vmul.f32 0.01, %v4574_v51 }
 0xbf2   :  { %5486 = vmatprep.subr.bf16.mxu0 %v7499_v17  ;;  %v7562_v17 = vld [vmem:[#allocation12 + $0x3f4] ss:$8 sps:$4 sm:$0xff]  }
 0xbf5   :  { %5487 = vmatpush1.bf16.msra.mxu0 %v7497_v11  ;;  %v7560_v11 = vld [vmem:[#allocation12 + $0x3f0] ss:$8 sps:$4 sm:$0xff]  }
 0xbf6   :  { %5488 = vmatprep.subr.bf16.mxu0 %v7502_v47  ;;  %v4594_v47 = vmax.f32 %v4574_v51, %v4586_v7 }
 0xbf9   :  { %5489 = vmatpush1.bf16.msra.mxu0 %v7500_v39  ;;  %v4602_v39 = vpack.c.bf16 %v4594_v47, %v4594_v47 }
 0xbfa   :  { %5490 = vmatprep.subr.bf16.mxu0 %v7505_v15  ;;  %v7576_v15 = vld [vmem:[#allocation15 + $0x30] sm:$0xff]  }
 0xbfb   :  { %6442 = vmatpush3.bf16.msra.mxu1 %v7576_v15 }
 0xbfc   :  { %6443 = vmatprep.subr.bf16.mxu1 %v7577_v27 }
 0xbfd   :  { %5491 = vmatpush1.bf16.msra.mxu0 %v7503_v26  ;;  %v4732_v26 = vld [vmem:[#allocation13] sm:$0x3] }
 0xbfe   :  { %5492 = vmatprep.subr.bf16.mxu0 %v7508_v22  ;;  %v4737_v21 = vrot.slane %v4732_v26, %v4214_v31  ;;  %v4741_v22 = vrot.slane %v4732_v26, %v4218_v53  ;;  %v7581_v31 = vld [vmem:[%s9435_s17 + $0x10] sm:$0xff]   ;;  %v7582_v53 = vld [vmem:[%s9435_s17 + $0x18] sm:$0xff]  }
 0xbff   :  { %6444 = vmatpush3.bf16.msra.mxu1 %v7578_v25 }
 0xc00   :  { %6904 = vmatprep.subr.bf16.mxu1 %v7861_v8 }
 0xc01   :  { %5493 = vmatpush1.bf16.msra.mxu0 %v7506_v9 }
 0xc02   :  { %5494 = vmatprep.subr.bf16.mxu0 %v7511_v1 }
 0xc05   :  { %5495 = vmatpush1.bf16.msra.mxu0 %v7509_v16 }
 0xc06   :  { %5496 = vmatprep.subr.bf16.mxu0 %v7514_v41 }
 0xc09   :  { %5497 = vmatpush1.bf16.msra.mxu0 %v7512_v30 }
 0xc0a   :  { %5507 = vmatprep.subr.bf16.mxu0 %v7517_v19  ;;  %v7579_v19 = vld [vmem:[%s9435_s17] sm:$0xff]  }
 0xc0c   :  { %5499 = vmatmul.mubr.bf16.vlgmr.msra.gmra.mrb[160].mxu0 %v4600_v3  ;;  %v7584_v3 = vld [vmem:[%s9435_s17 + $0x28] sm:$0xff]  }
 0xc0d   :  { %5508 = vmatpush1.bf16.msra.mxu0 %v7515_v63  ;;  %5539 = vmatprep.mubr.bf16.mxu0 %v4603_v37  ;;  %v7583_v63 = vld [vmem:[%s9435_s17 + $0x20] sm:$0xff]   ;;  %v7586_v37 = vld [vmem:[%s9435_s17 + $0x38] sm:$0xff]  }
 0xc0e   :  { %5509 = vmatprep.subr.bf16.mxu0 %v7520_v62  ;;  %v7585_v62 = vld [vmem:[%s9435_s17 + $0x30] sm:$0xff]  }
 0xc11   :  { %5510 = vmatpush1.bf16.msra.mxu0 %v7518_v46 }
 0xc12   :  { %5511 = vmatprep.subr.bf16.mxu0 %v7523_v58  ;;  %v6201_v58 = vld [vmem:[#allocation16] ss:$0 sm:$0xff] }
 0xc15   :  { %5512 = vmatpush1.bf16.msra.mxu0 %v7521_v20 }
 0xc16   :  { %5513 = vmatprep.subr.bf16.mxu0 %v7526_v33 }
 0xc19   :  { %5514 = vmatpush1.bf16.msra.mxu0 %v7524_v59 }
 0xc1a   :  { %5515 = vmatprep.subr.bf16.mxu0 %v7529_v44 }
 0xc1d   :  { %5516 = vmatpush1.bf16.msra.mxu0 %v7527_v43 }
 0xc1e   :  { %5517 = vmatprep.subr.bf16.mxu0 %v7532_v38 }
 0xc21   :  { %5518 = vmatpush1.bf16.msra.mxu0 %v7530_v52 }
 0xc22   :  { %5519 = vmatprep.subr.bf16.mxu0 %v7535_v23 }
 0xc25   :  { %5520 = vmatpush1.bf16.msra.mxu0 %v7533_v54  ;;  %v6218_v54 = vld [vmem:[#allocation18] ss:$0 sm:$0xff] }
 0xc26   :  { %5521 = vmatprep.subr.bf16.mxu0 %v7538_v55 }
 0xc29   :  { %5522 = vmatpush1.bf16.msra.mxu0 %v7536_v13 }
 0xc2a   :  { %5523 = vmatprep.subr.bf16.mxu0 %v7541_v28 }
 0xc2d   :  { %5524 = vmatpush1.bf16.msra.mxu0 %v7539_v57 }
 0xc2e   :  { %5525 = vmatprep.subr.bf16.mxu0 %v7544_v0 }
 0xc31   :  { %5526 = vmatpush1.bf16.msra.mxu0 %v7542_v61 }
 0xc32   :  { %5527 = vmatprep.subr.bf16.mxu0 %v7547_v34 }
 0xc35   :  { %5528 = vmatpush1.bf16.msra.mxu0 %v7545_v35 }
 0xc36   :  { %5529 = vmatprep.subr.bf16.mxu0 %v7550_v45 }
 0xc39   :  { %5530 = vmatpush1.bf16.msra.mxu0 %v7548_v40 }
 0xc3a   :  { %5531 = vmatprep.subr.bf16.mxu0 %v7553_v36 }
 0xc3d   :  { %5532 = vmatpush1.bf16.msra.mxu0 %v7551_v60 }
 0xc3e   :  { %5533 = vmatprep.subr.bf16.mxu0 %v7556_v2 }
 0xc41   :  { %5534 = vmatpush1.bf16.msra.mxu0 %v7554_v5 }
 0xc42   :  { %5535 = vmatprep.subr.bf16.mxu0 %v7559_v42 }
 0xc45   :  { %5536 = vmatpush1.bf16.msra.mxu0 %v7557_v12 }
 0xc46   :  { %5537 = vmatprep.subr.bf16.mxu0 %v7562_v17 }
 0xc49   :  { %5538 = vmatpush1.bf16.msra.mxu0 %v7560_v11 }
 0xc4c   :  { %5540 = vmatmul.mubr.bf16.vlgmr.msra.gmra.mrb[160].mxu0 %v4602_v39 }
 0xd1f   :  { %v5541_v14 = vpop.f32.mrb[160].mxu0 }
 0xd20   :  { %v7326_v9 = vadd.f32 %v5541_v14, %v4737_v21  ;;  %v5543_v32 = vpop.f32.mrb[161].mxu0 }
 0xd21   :  { %v7327_v1 = vadd.f32 %v5543_v32, %v4741_v22  ;;  %v5545_v29 = vpop.f32.mrb[162].mxu0 }
 0xd22   :  { %v5548_v16 = vmul.f32 0.01, %v7326_v9  ;;  %v5546_v49 = vpop.f32.mrb[163].mxu0 }
 0xd23   :  { %v5549_v41 = vmul.f32 0.01, %v7327_v1 }
 0xd24   :  { %v5550_v10 = vmax.f32 %v7326_v9, %v5548_v16 }
 0xd25   :  { %v5551_v30 = vmax.f32 %v7327_v1, %v5549_v41 }
 0xd26   :  { %v5552_v24 = vpack.c.bf16 %v5550_v10, %v5550_v10 }
 0xd27   :  { %v5553_v18 = vpack.c.bf16 %v5551_v30, %v5551_v30 }
 0xd29   :  { %5721 = vmatprep.mubr.bf16.mxu1 %v5553_v18 }
 0xd2a   :  { %5722 = vmatmul.mubr.bf16.vlgmr.msra.gmra.mrb[252].mxu1 %v5552_v24 }
 0xd2b   :  { %6905 = vmatpush3.bf16.msra.mxu1 %v7579_v19  ;;  %6920 = vmatprep.mubr.msk.bf16.mxu1 %vm7862_vm4, %v7861_v8 }
 0xd2c   :  { %6906 = vmatprep.subr.bf16.mxu1 %v7861_v8 }
 0xd2f   :  { %6907 = vmatpush3.bf16.msra.mxu1 %v7580_v50 }
 0xd30   :  { %6908 = vmatprep.subr.bf16.mxu1 %v7861_v8 }
 0xd33   :  { %6909 = vmatpush3.bf16.msra.mxu1 %v7581_v31 }
 0xd34   :  { %6910 = vmatprep.subr.bf16.mxu1 %v7861_v8 }
 0xd37   :  { %6911 = vmatpush3.bf16.msra.mxu1 %v7582_v53 }
 0xd38   :  { %6912 = vmatprep.subr.bf16.mxu1 %v7861_v8 }
 0xd3b   :  { %6913 = vmatpush3.bf16.msra.mxu1 %v7583_v63 }
 0xd3c   :  { %6914 = vmatprep.subr.bf16.mxu1 %v7861_v8 }
 0xd3f   :  { %6915 = vmatpush3.bf16.msra.mxu1 %v7584_v3 }
 0xd40   :  { %6916 = vmatprep.subr.bf16.mxu1 %v7861_v8 }
 0xd43   :  { %6917 = vmatpush3.bf16.msra.mxu1 %v7585_v62 }
 0xd44   :  { %6918 = vmatprep.subr.bf16.mxu1 %v7861_v8 }
 0xd47   :  { %6919 = vmatpush3.bf16.msra.mxu1 %v7586_v37 }
 0xdfd   :  { %v6445_v46 = vpop.f32.mrb[252].mxu1 }
 0xdfe   :  { %v6446_v20 = vpop.f32.mrb[253].mxu1 }
 0xdff   :  { %v6447_v33 = vadd.f32 %v6446_v20, %v6445_v46  ;;  %v6448_v59 = vpop.f32.mrb[254].mxu1 }
 0xe00   :  { %v6449_v44 = vpop.f32.mrb[255].mxu1 }
 0xe01   :  { %v5724_v43 = vadd.f32 %v6447_v33, %v6201_v58 }
 0xe03   :  { %v5729_v38 = vmul.f32 0.01, %v5724_v43 }
 0xe05   :  { %v5730_v52 = vmax.f32 %v5724_v43, %v5729_v38 }
 0xe07   :  { %v5731_v23 = vpack.c.bf16 %v5730_v52, %v5730_v52 }
 0xe09   :  { %6921 = vmatmul.mubr.bf16.vlgmr.msra.gmra.mrb[0].mxu1 %v5731_v23 }
 0xedc   :  { %v5837_v55 = vpop.f32.mrb[0].mxu1 }
 0xedd   :  { %v5838_v13 = vadd.f32 %v6218_v54, %v5837_v55  ;;  %v6922_v8 = vpop.f32.mrb[1].mxu1 }
 0xede   :  { %v5840_v28 = vpop.f32.mrb[2].mxu1 }
 0xedf   :  { %5843 = vst.msk [vmem:[%s9437_s19] sm:$0xff] %vm236_vm1, %v5838_v13  ;;  %v6923_v57 = vpop.f32.mrb[3].mxu1 }
 0xee0   :  { %5848 = vsyncpa [#allocation3], 1 }
 0xee1   :  { %5849 = vsyncpa [#allocation5], 1 }
 0xee2   :  { %5850 = vsyncpa [#allocation8], 1 }
 0xee3   :  { %5851 = vsyncpa [#allocation11], 1 }
 0xee4   :  { %5852 = vsyncpa [#allocation14], 1 }
 0xee5   :  { %5853 = vsyncpa [#allocation17], 1 }

</bundles_post_ra>
